<compile_context>
chip_gen: v7x
topology: tpu7x:2x2x1
jax: 0.10.0
libtpu: 0.0.40
codegen_flags: <defaults>
</compile_context>

<pallas_src>
import jax
import jax.numpy as jnp
import numpy as np
from jax.experimental import pallas as pl
from jax.experimental.pallas import tpu as pltpu

WINDOW = 5
NUM_FEATURES = 16 * WINDOW          # 80
OUT_FEATURES = 24
OUT_PAD = 128                       # lane-dense output slab width

# Path indices (order matches the parameter list and all slab layouts).
P1, P2, P3, P6, P7, P10 = range(6)
PATH_WIDTHS = (WINDOW, 2 * WINDOW, 3 * WINDOW, 6 * WINDOW, 7 * WINDOW, 10 * WINDOW)
COMBINE_W, COMBINE_B = 48, 49
NUM_PARAMS = 50

# x windows fed to path1 (in fused-stack order): N_e, u_egrv, u_vgt, u_rp, T_egrsys_out
P1_WINDOWS = (0, 9, 8, 7, 10)

# xw slab indices (zero-padded [80, 64] first-layer x-contribution weights)
XW_OUT6, XW_OUT11, XW_OUT4, XW_OUT12, XW_OUT8, XW_OUT13 = 5, 6, 7, 8, 9, 10
NUM_XW = 11

# pw slab indices (zero-padded [64, 64] first-layer prev-output weights)
(PW_OUT4_OUT2, PW_OUT4_OUT3, PW_P2_TAIL, PW_OUT8_OUT1, PW_OUT8_OUT4,
 PW_OUT8_OUT6, PW_OUT13_OUT9, PW_OUT13_OUT11, PW_OUT13_OUT12) = range(9)
NUM_PW = 9


# ----------------------------------------------------------------------------
# Parameter construction (PyTorch-style init, W stored as [in, out]) + packing
# ----------------------------------------------------------------------------
def init_params(key):
    """Deterministic PyTorch-style (uniform +/- 1/sqrt(fan_in)) init, W as [in, out]."""
    params = []

    def linear(k, fan_in, fan_out):
        kw, kb = jax.random.split(k)
        bound = 1.0 / np.sqrt(fan_in)
        W = jax.random.uniform(kw, (fan_in, fan_out), jnp.float32, -bound, bound)
        b = jax.random.uniform(kb, (1, fan_out), jnp.float32, -bound, bound)
        return W, b

    keys = jax.random.split(key, len(PATH_WIDTHS) + 1)
    for k, ws in zip(keys[: len(PATH_WIDTHS)], PATH_WIDTHS):
        dims = (ws, 64, 128, 64, ws)
        lkeys = jax.random.split(k, 4)
        for i in range(4):
            W, b = linear(lkeys[i], dims[i], dims[i + 1])
            params += [W, b]
    Wc, bc = linear(keys[-1], 24 * WINDOW, OUT_FEATURES)
    params += [Wc, bc]
    assert len(params) == NUM_PARAMS
    return params


def pack_params(params):
    """Re-pack the 50 PyTorch-style arrays into 13 dense, MXU-friendly slabs."""
    W = lambda p, l: np.asarray(params[8 * p + 2 * l], np.float32)
    Bv = lambda p, l: np.asarray(params[8 * p + 2 * l + 1], np.float32)
    Wc = np.asarray(params[COMBINE_W], np.float32)     # [120, 24]
    bc = np.asarray(params[COMBINE_B], np.float32)     # [1, 24]
    WS = WINDOW

    # --- first-layer x-contribution weights, zero-padded to [80, 64] ----------
    xw = np.zeros((NUM_XW, NUM_FEATURES, 64), np.float32)
    for k, win in enumerate(P1_WINDOWS):               # fused path1 (5 windows)
        xw[k, win * WS:(win + 1) * WS, :] = W(P1, 0)
    xw[XW_OUT6, 12 * WS:13 * WS, :] = W(P2, 0)[0:5, :]      # W_a
    xw[XW_OUT11, 11 * WS:12 * WS, :] = W(P2, 0)[0:5, :]     # T_intclr_out
    xw[XW_OUT4, 13 * WS:14 * WS, :] = W(P3, 0)[5:10, :]     # W_egr
    xw[XW_OUT12, 1 * WS:7 * WS, :] = W(P6, 0)               # 6 injection windows
    xw[XW_OUT8, 14 * WS:15 * WS, :] = W(P7, 0)[30:35, :]    # InCylO2
    xw[XW_OUT13, 15 * WS:16 * WS, :] = W(P10, 0)[5:10, :]   # T_tur_in

    # --- first-layer prev-output contribution weights, zero-padded [64, 64] ---
    pw = np.zeros((NUM_PW, 64, 64), np.float32)
    pw[PW_OUT4_OUT2, 0:5, :] = W(P3, 0)[0:5, :]
    pw[PW_OUT4_OUT3, 0:5, :] = W(P3, 0)[10:15, :]
    pw[PW_P2_TAIL, 0:5, :] = W(P2, 0)[5:10, :]          # out3->out6 and out10->out11
    pw[PW_OUT8_OUT1, 0:5, :] = W(P7, 0)[0:5, :]
    pw[PW_OUT8_OUT4, 0:15, :] = W(P7, 0)[5:20, :]
    pw[PW_OUT8_OUT6, 0:10, :] = W(P7, 0)[20:30, :]
    pw[PW_OUT13_OUT9, 0:5, :] = W(P10, 0)[0:5, :]
    pw[PW_OUT13_OUT11, 0:10, :] = W(P10, 0)[10:20, :]
    pw[PW_OUT13_OUT12, 0:30, :] = W(P10, 0)[20:50, :]

    # --- mid / last layer weights and biases (per path slabs) -----------------
    w2 = np.stack([W(p, 1) for p in range(6)])          # [6, 64, 128]
    w3 = np.stack([W(p, 2) for p in range(6)])          # [6, 128, 64]
    w4 = np.zeros((6, 64, 64), np.float32)              # columns padded w_p -> 64
    b4 = np.zeros((6, 64), np.float32)
    for p, wdt in enumerate(PATH_WIDTHS):
        w4[p, :, :wdt] = W(p, 3)
        b4[p, :wdt] = Bv(p, 3)[0]
    b1 = np.stack([Bv(p, 0)[0] for p in range(6)])      # [6, 64]
    b2 = np.stack([Bv(p, 1)[0] for p in range(6)])      # [6, 128]
    b3 = np.stack([Bv(p, 2)[0] for p in range(6)])      # [6, 64]

    # --- combine layer, padded to a lane-dense 128-wide output slab -----------
    wcx = np.zeros((NUM_FEATURES, OUT_PAD), np.float32)     # x contributions
    wcx[7 * WS:8 * WS, 0:24] = Wc[35:40, :]                 # u_rp
    wcx[1 * WS:7 * WS, 0:24] = Wc[90:120, :]                # 6 injection windows
    wc8 = np.zeros((64, OUT_PAD), np.float32)               # out8 contribution
    wc8[0:35, 0:24] = Wc[0:35, :]
    wc13 = np.zeros((64, OUT_PAD), np.float32)              # out13 contribution
    wc13[0:50, 0:24] = Wc[40:90, :]
    bcp = np.zeros((1, OUT_PAD), np.float32)
    bcp[0, :OUT_FEATURES] = bc[0]

    return tuple(jnp.asarray(a) for a in
                 (xw, pw, w2, w3, w4, b1, b2, b3, b4, wcx, wc8, wc13, bcp))


# ----------------------------------------------------------------------------
# Kernel
# ----------------------------------------------------------------------------
def fcn_kernel(x_ref, xw_ref, pw_ref, w2_ref, w3_ref, w4_ref,
               b1_ref, b2_ref, b3_ref, b4_ref,
               wcx_ref, wc8_ref, wc13_ref, bc_ref, o_ref):
    x = x_ref[...]                         # [TB, 80] f32
    tb = x.shape[0]

    def mm(a, w):
        return jnp.dot(a, w, preferred_element_type=jnp.float32)

    def b1(p):                             # [1, 64]
        return b1_ref[p:p + 1, :]

    def finish_path(h1, p):
        """ReLU(h1) then layers 2..4 of path p.  Output [M, 64]; cols >= width are 0."""
        h = jnp.maximum(h1, 0.0)
        h = jnp.maximum(mm(h, w2_ref[p]) + b2_ref[p:p + 1, :], 0.0)   # [M, 128]
        h = jnp.maximum(mm(h, w3_ref[p]) + b3_ref[p:p + 1, :], 0.0)   # [M, 64]
        return jnp.maximum(mm(h, w4_ref[p]) + b4_ref[p:p + 1, :], 0.0)

    # --- path1 applied to 5 x-windows, fused along the sublane (batch) axis ---
    h1_p1 = [mm(x, xw_ref[k]) + b1(P1) for k in range(5)]
    p1_out = finish_path(jnp.concatenate(h1_p1, axis=0), P1)          # [5*TB, 64]
    out1 = p1_out[0 * tb:1 * tb]    # path1(N_e)
    out2 = p1_out[1 * tb:2 * tb]    # path1(u_egrv)
    out3 = p1_out[2 * tb:3 * tb]    # path1(u_vgt)
    out9 = p1_out[3 * tb:4 * tb]    # path1(u_rp)
    out10 = p1_out[4 * tb:5 * tb]   # path1(T_egrsys_out)

    # --- path6 (out12): pure x input ------------------------------------------
    out12 = finish_path(mm(x, xw_ref[XW_OUT12]) + b1(P6), P6)

    # --- path2 applied twice (out6, out11), fused along the sublane axis ------
    h6 = mm(x, xw_ref[XW_OUT6]) + mm(out3, pw_ref[PW_P2_TAIL]) + b1(P2)
    h11 = mm(x, xw_ref[XW_OUT11]) + mm(out10, pw_ref[PW_P2_TAIL]) + b1(P2)
    p2_out = finish_path(jnp.concatenate([h6, h11], axis=0), P2)      # [2*TB, 64]
    out6, out11 = p2_out[:tb], p2_out[tb:]

    # --- path3: out4 = path3(cat(out2, W_egr, out3)) --------------------------
    out4 = finish_path(mm(out2, pw_ref[PW_OUT4_OUT2]) + mm(x, xw_ref[XW_OUT4])
                       + mm(out3, pw_ref[PW_OUT4_OUT3]) + b1(P3), P3)

    # --- path7: out8 = path7(cat(out1, out4, out6, InCylO2)) -------------------
    out8 = finish_path(mm(out1, pw_ref[PW_OUT8_OUT1]) + mm(out4, pw_ref[PW_OUT8_OUT4])
                       + mm(out6, pw_ref[PW_OUT8_OUT6]) + mm(x, xw_ref[XW_OUT8])
                       + b1(P7), P7)

    # --- path10: out13 = path10(cat(out9, T_tur_in, out11, out12)) ------------
    out13 = finish_path(mm(out9, pw_ref[PW_OUT13_OUT9]) + mm(x, xw_ref[XW_OUT13])
                        + mm(out11, pw_ref[PW_OUT13_OUT11])
                        + mm(out12, pw_ref[PW_OUT13_OUT12]) + b1(P10), P10)

    # --- combine (Linear, no ReLU); 128-wide lane-dense output store ----------
    y = (mm(out8, wc8_ref[...]) + mm(out13, wc13_ref[...])
         + mm(x, wcx_ref[...]) + bc_ref[...])                         # [TB, 128]
    o_ref[...] = y


# ----------------------------------------------------------------------------
# Wrapper
# ----------------------------------------------------------------------------
def _round_up(v, m):
    return (v + m - 1) // m * m


def _pick_batch_tile(batch, max_tile):
    max_tile = max(8, _round_up(max_tile, 8))
    if batch <= 8:
        return 8
    # Prefer >= 2 grid steps (v7x has 2 TensorCores) without exceeding max_tile.
    half = _round_up((batch + 1) // 2, 8)
    return min(max_tile, half)


def feature_extractor_causal_fcn(x, packed, *, batch_tile=512):
    """x: [B, 80] f32.  packed: output of pack_params().  Returns [B, 24] f32."""
    B, F = x.shape
    assert F == NUM_FEATURES
    tile = _pick_batch_tile(B, batch_tile)
    grid_b = pl.cdiv(B, tile)
    B_pad = grid_b * tile
    if B_pad != B:
        x = jnp.pad(x, ((0, B_pad - B), (0, 0)))

    x_spec = pl.BlockSpec((tile, NUM_FEATURES), lambda i: (i, 0))
    out_spec = pl.BlockSpec((tile, OUT_PAD), lambda i: (i, 0))
    # Weight slabs: full arrays, block index constant across the batch grid
    # (Pallas only DMAs them once since the block never changes).
    w_specs = [pl.BlockSpec(p.shape, lambda i, n=p.ndim: (0,) * n) for p in packed]

    out = pl.pallas_call(
        fcn_kernel,
        out_shape=jax.ShapeDtypeStruct((B_pad, OUT_PAD), jnp.float32),
        grid_spec=pltpu.PrefetchScalarGridSpec(
            num_scalar_prefetch=0,
            grid=(grid_b,),
            in_specs=[x_spec] + w_specs,
            out_specs=out_spec,
        ),
        compiler_params=pltpu.CompilerParams(
            dimension_semantics=("parallel",),
            # Far above our ~10 MiB need, yet below the 64 MiB physical VMEM of
            # v7x (v5e/v6e have 128 MiB, so this is safe everywhere).
            vmem_limit_bytes=48 * 1024 * 1024,
        ),
    )(x, *packed)
    return out[:B, :OUT_FEATURES]


# ----------------------------------------------------------------------------
# Pure-JAX reference (mirrors the PyTorch forward exactly)
# ----------------------------------------------------------------------------
def reference_forward(x, params):
    def apply_path(h, p):
        for layer in range(4):
            W = params[8 * p + 2 * layer]
            b = params[8 * p + 2 * layer + 1]
            h = jnp.maximum(h @ W + b, 0.0)
        return h

    def sl(i):
        return x[:, i * WINDOW:(i + 1) * WINDOW]

    out1 = apply_path(sl(0), P1)                 # N_e
    out2 = apply_path(sl(9), P1)                 # u_egrv
    out3 = apply_path(sl(8), P1)                 # u_vgt
    out4 = apply_path(jnp.concatenate([out2, sl(13), out3], axis=1), P3)
    out6 = apply_path(jnp.concatenate([sl(12), out3], axis=1), P2)
    out8 = apply_path(jnp.concatenate([out1, out4, out6, sl(14)], axis=1), P7)
    out9 = apply_path(sl(7), P1)                 # u_rp
    out10 = apply_path(sl(10), P1)               # T_egrsys_out
    out11 = apply_path(jnp.concatenate([sl(11), out10], axis=1), P2)
    out12 = apply_path(x[:, WINDOW:7 * WINDOW], P6)
    out13 = apply_path(jnp.concatenate([out9, sl(15), out11, out12], axis=1), P10)
    out_combine = jnp.concatenate(
        [out8, sl(7), out13, x[:, WINDOW:7 * WINDOW]], axis=1)        # [B, 120]
    return out_combine @ params[COMBINE_W] + params[COMBINE_B]


if __name__ == "__main__":
    key = jax.random.PRNGKey(0)
    k_param, k_x = jax.random.split(key)

    params = init_params(k_param)
    packed = pack_params(params)

    # Small shape that still exercises batch padding and a multi-step grid
    # (tile=16 -> grid of 2 steps, batch padded 24 -> 32).
    B = 24
    x = jax.random.normal(k_x, (B, NUM_FEATURES), dtype=jnp.float32)

    out = feature_extractor_causal_fcn(x, packed)
    out = jax.block_until_ready(out)

    ref = reference_forward(x, params)
    np.testing.assert_allclose(np.asarray(out), np.asarray(ref),
                               rtol=1e-4, atol=1e-4)

    print("KERNEL_OK")
</pallas_src>

<mosaic_0001>
module attributes {stable_mosaic.version = 11 : i64} {
  func.func @fcn_kernel(%arg0: i32, %arg1: memref<16x80xf32, #tpu.memory_space<vmem>>, %arg2: memref<11x80x64xf32, #tpu.memory_space<vmem>>, %arg3: memref<9x64x64xf32, #tpu.memory_space<vmem>>, %arg4: memref<6x64x128xf32, #tpu.memory_space<vmem>>, %arg5: memref<6x128x64xf32, #tpu.memory_space<vmem>>, %arg6: memref<6x64x64xf32, #tpu.memory_space<vmem>>, %arg7: memref<6x64xf32, #tpu.memory_space<vmem>>, %arg8: memref<6x128xf32, #tpu.memory_space<vmem>>, %arg9: memref<6x64xf32, #tpu.memory_space<vmem>>, %arg10: memref<6x64xf32, #tpu.memory_space<vmem>>, %arg11: memref<80x128xf32, #tpu.memory_space<vmem>>, %arg12: memref<64x128xf32, #tpu.memory_space<vmem>>, %arg13: memref<64x128xf32, #tpu.memory_space<vmem>>, %arg14: memref<1x128xf32, #tpu.memory_space<vmem>>, %arg15: memref<16x128xf32, #tpu.memory_space<vmem>>) attributes {dimension_semantics = [#tpu.dimension_semantics<parallel>], iteration_bounds = array<i64: 2>, scalar_prefetch = 0 : i64, scratch_operands = 0 : i64, tpu.core_type = #tpu.core_type<tc>, window_params = [{transform_indices = @transform_0, window_bounds = array<i64: 16, 80>}, {pipeline_mode = #tpu.pipeline_mode<synchronous>, transform_indices = @transform_1, window_bounds = array<i64: 11, 80, 64>}, {pipeline_mode = #tpu.pipeline_mode<synchronous>, transform_indices = @transform_2, window_bounds = array<i64: 9, 64, 64>}, {pipeline_mode = #tpu.pipeline_mode<synchronous>, transform_indices = @transform_3, window_bounds = array<i64: 6, 64, 128>}, {pipeline_mode = #tpu.pipeline_mode<synchronous>, transform_indices = @transform_4, window_bounds = array<i64: 6, 128, 64>}, {pipeline_mode = #tpu.pipeline_mode<synchronous>, transform_indices = @transform_5, window_bounds = array<i64: 6, 64, 64>}, {pipeline_mode = #tpu.pipeline_mode<synchronous>, transform_indices = @transform_6, window_bounds = array<i64: 6, 64>}, {pipeline_mode = #tpu.pipeline_mode<synchronous>, transform_indices = @transform_7, window_bounds = array<i64: 6, 128>}, {pipeline_mode = #tpu.pipeline_mode<synchronous>, transform_indices = @transform_8, window_bounds = array<i64: 6, 64>}, {pipeline_mode = #tpu.pipeline_mode<synchronous>, transform_indices = @transform_9, window_bounds = array<i64: 6, 64>}, {pipeline_mode = #tpu.pipeline_mode<synchronous>, transform_indices = @transform_10, window_bounds = array<i64: 80, 128>}, {pipeline_mode = #tpu.pipeline_mode<synchronous>, transform_indices = @transform_11, window_bounds = array<i64: 64, 128>}, {pipeline_mode = #tpu.pipeline_mode<synchronous>, transform_indices = @transform_12, window_bounds = array<i64: 64, 128>}, {pipeline_mode = #tpu.pipeline_mode<synchronous>, transform_indices = @transform_13, window_bounds = array<i64: 1, 128>}, {transform_indices = @transform_14, window_bounds = array<i64: 16, 128>}]} {
    %c0 = arith.constant 0 : index
    %c0_0 = arith.constant 0 : index
    %0 = vector.load %arg1[%c0, %c0_0] : memref<16x80xf32, #tpu.memory_space<vmem>>, vector<16x80xf32>
    %c0_1 = arith.constant 0 : index
    %c0_2 = arith.constant 0 : index
    %c0_3 = arith.constant 0 : index
    %1 = vector.load %arg2[%c0_1, %c0_2, %c0_3] : memref<11x80x64xf32, #tpu.memory_space<vmem>>, vector<1x80x64xf32>
    %2 = vector.shape_cast %1 : vector<1x80x64xf32> to vector<80x64xf32>
    %cst = arith.constant dense<0.000000e+00> : vector<16x64xf32>
    %3 = tpu.matmul %0, %2, %cst {dimension_numbers = #tpu.dot_dimension_numbers<[1], [0], [0], [1], [0, 0, 1, 1], [], []>} : vector<16x80xf32>, vector<80x64xf32>, vector<16x64xf32> -> vector<16x64xf32>
    %c0_4 = arith.constant 0 : index
    %c0_5 = arith.constant 0 : index
    %4 = vector.load %arg7[%c0_4, %c0_5] : memref<6x64xf32, #tpu.memory_space<vmem>>, vector<1x64xf32>
    %5 = vector.broadcast %4 : vector<1x64xf32> to vector<16x64xf32>
    %6 = arith.addf %3, %5 : vector<16x64xf32>
    %c1 = arith.constant 1 : index
    %c0_6 = arith.constant 0 : index
    %c0_7 = arith.constant 0 : index
    %7 = vector.load %arg2[%c1, %c0_6, %c0_7] : memref<11x80x64xf32, #tpu.memory_space<vmem>>, vector<1x80x64xf32>
    %8 = vector.shape_cast %7 : vector<1x80x64xf32> to vector<80x64xf32>
    %cst_8 = arith.constant dense<0.000000e+00> : vector<16x64xf32>
    %9 = tpu.matmul %0, %8, %cst_8 {dimension_numbers = #tpu.dot_dimension_numbers<[1], [0], [0], [1], [0, 0, 1, 1], [], []>} : vector<16x80xf32>, vector<80x64xf32>, vector<16x64xf32> -> vector<16x64xf32>
    %c0_9 = arith.constant 0 : index
    %c0_10 = arith.constant 0 : index
    %10 = vector.load %arg7[%c0_9, %c0_10] : memref<6x64xf32, #tpu.memory_space<vmem>>, vector<1x64xf32>
    %11 = vector.broadcast %10 : vector<1x64xf32> to vector<16x64xf32>
    %12 = arith.addf %9, %11 : vector<16x64xf32>
    %c2 = arith.constant 2 : index
    %c0_11 = arith.constant 0 : index
    %c0_12 = arith.constant 0 : index
    %13 = vector.load %arg2[%c2, %c0_11, %c0_12] : memref<11x80x64xf32, #tpu.memory_space<vmem>>, vector<1x80x64xf32>
    %14 = vector.shape_cast %13 : vector<1x80x64xf32> to vector<80x64xf32>
    %cst_13 = arith.constant dense<0.000000e+00> : vector<16x64xf32>
    %15 = tpu.matmul %0, %14, %cst_13 {dimension_numbers = #tpu.dot_dimension_numbers<[1], [0], [0], [1], [0, 0, 1, 1], [], []>} : vector<16x80xf32>, vector<80x64xf32>, vector<16x64xf32> -> vector<16x64xf32>
    %c0_14 = arith.constant 0 : index
    %c0_15 = arith.constant 0 : index
    %16 = vector.load %arg7[%c0_14, %c0_15] : memref<6x64xf32, #tpu.memory_space<vmem>>, vector<1x64xf32>
    %17 = vector.broadcast %16 : vector<1x64xf32> to vector<16x64xf32>
    %18 = arith.addf %15, %17 : vector<16x64xf32>
    %c3 = arith.constant 3 : index
    %c0_16 = arith.constant 0 : index
    %c0_17 = arith.constant 0 : index
    %19 = vector.load %arg2[%c3, %c0_16, %c0_17] : memref<11x80x64xf32, #tpu.memory_space<vmem>>, vector<1x80x64xf32>
    %20 = vector.shape_cast %19 : vector<1x80x64xf32> to vector<80x64xf32>
    %cst_18 = arith.constant dense<0.000000e+00> : vector<16x64xf32>
    %21 = tpu.matmul %0, %20, %cst_18 {dimension_numbers = #tpu.dot_dimension_numbers<[1], [0], [0], [1], [0, 0, 1, 1], [], []>} : vector<16x80xf32>, vector<80x64xf32>, vector<16x64xf32> -> vector<16x64xf32>
    %c0_19 = arith.constant 0 : index
    %c0_20 = arith.constant 0 : index
    %22 = vector.load %arg7[%c0_19, %c0_20] : memref<6x64xf32, #tpu.memory_space<vmem>>, vector<1x64xf32>
    %23 = vector.broadcast %22 : vector<1x64xf32> to vector<16x64xf32>
    %24 = arith.addf %21, %23 : vector<16x64xf32>
    %c4 = arith.constant 4 : index
    %c0_21 = arith.constant 0 : index
    %c0_22 = arith.constant 0 : index
    %25 = vector.load %arg2[%c4, %c0_21, %c0_22] : memref<11x80x64xf32, #tpu.memory_space<vmem>>, vector<1x80x64xf32>
    %26 = vector.shape_cast %25 : vector<1x80x64xf32> to vector<80x64xf32>
    %cst_23 = arith.constant dense<0.000000e+00> : vector<16x64xf32>
    %27 = tpu.matmul %0, %26, %cst_23 {dimension_numbers = #tpu.dot_dimension_numbers<[1], [0], [0], [1], [0, 0, 1, 1], [], []>} : vector<16x80xf32>, vector<80x64xf32>, vector<16x64xf32> -> vector<16x64xf32>
    %c0_24 = arith.constant 0 : index
    %c0_25 = arith.constant 0 : index
    %28 = vector.load %arg7[%c0_24, %c0_25] : memref<6x64xf32, #tpu.memory_space<vmem>>, vector<1x64xf32>
    %29 = vector.broadcast %28 : vector<1x64xf32> to vector<16x64xf32>
    %30 = arith.addf %27, %29 : vector<16x64xf32>
    %31 = tpu.concatenate %6, %12, %18, %24, %30 in 0 : vector<16x64xf32>, vector<16x64xf32>, vector<16x64xf32>, vector<16x64xf32>, vector<16x64xf32> -> vector<80x64xf32>
    %cst_26 = arith.constant 0.000000e+00 : f32
    %32 = vector.broadcast %cst_26 : f32 to vector<80x64xf32>
    %33 = arith.maximumf %31, %32 : vector<80x64xf32>
    %c0_27 = arith.constant 0 : index
    %c0_28 = arith.constant 0 : index
    %c0_29 = arith.constant 0 : index
    %34 = vector.load %arg4[%c0_27, %c0_28, %c0_29] : memref<6x64x128xf32, #tpu.memory_space<vmem>>, vector<1x64x128xf32>
    %35 = vector.shape_cast %34 : vector<1x64x128xf32> to vector<64x128xf32>
    %cst_30 = arith.constant dense<0.000000e+00> : vector<80x128xf32>
    %36 = tpu.matmul %33, %35, %cst_30 {dimension_numbers = #tpu.dot_dimension_numbers<[1], [0], [0], [1], [0, 0, 1, 1], [], []>} : vector<80x64xf32>, vector<64x128xf32>, vector<80x128xf32> -> vector<80x128xf32>
    %c0_31 = arith.constant 0 : index
    %c0_32 = arith.constant 0 : index
    %37 = vector.load %arg8[%c0_31, %c0_32] : memref<6x128xf32, #tpu.memory_space<vmem>>, vector<1x128xf32>
    %38 = vector.broadcast %37 : vector<1x128xf32> to vector<80x128xf32>
    %39 = arith.addf %36, %38 : vector<80x128xf32>
    %cst_33 = arith.constant 0.000000e+00 : f32
    %40 = vector.broadcast %cst_33 : f32 to vector<80x128xf32>
    %41 = arith.maximumf %39, %40 : vector<80x128xf32>
    %c0_34 = arith.constant 0 : index
    %c0_35 = arith.constant 0 : index
    %c0_36 = arith.constant 0 : index
    %42 = vector.load %arg5[%c0_34, %c0_35, %c0_36] : memref<6x128x64xf32, #tpu.memory_space<vmem>>, vector<1x128x64xf32>
    %43 = vector.shape_cast %42 : vector<1x128x64xf32> to vector<128x64xf32>
    %cst_37 = arith.constant dense<0.000000e+00> : vector<80x64xf32>
    %44 = tpu.matmul %41, %43, %cst_37 {dimension_numbers = #tpu.dot_dimension_numbers<[1], [0], [0], [1], [0, 0, 1, 1], [], []>} : vector<80x128xf32>, vector<128x64xf32>, vector<80x64xf32> -> vector<80x64xf32>
    %c0_38 = arith.constant 0 : index
    %c0_39 = arith.constant 0 : index
    %45 = vector.load %arg9[%c0_38, %c0_39] : memref<6x64xf32, #tpu.memory_space<vmem>>, vector<1x64xf32>
    %46 = vector.broadcast %45 : vector<1x64xf32> to vector<80x64xf32>
    %47 = arith.addf %44, %46 : vector<80x64xf32>
    %cst_40 = arith.constant 0.000000e+00 : f32
    %48 = vector.broadcast %cst_40 : f32 to vector<80x64xf32>
    %49 = arith.maximumf %47, %48 : vector<80x64xf32>
    %c0_41 = arith.constant 0 : index
    %c0_42 = arith.constant 0 : index
    %c0_43 = arith.constant 0 : index
    %50 = vector.load %arg6[%c0_41, %c0_42, %c0_43] : memref<6x64x64xf32, #tpu.memory_space<vmem>>, vector<1x64x64xf32>
    %51 = vector.shape_cast %50 : vector<1x64x64xf32> to vector<64x64xf32>
    %cst_44 = arith.constant dense<0.000000e+00> : vector<80x64xf32>
    %52 = tpu.matmul %49, %51, %cst_44 {dimension_numbers = #tpu.dot_dimension_numbers<[1], [0], [0], [1], [0, 0, 1, 1], [], []>} : vector<80x64xf32>, vector<64x64xf32>, vector<80x64xf32> -> vector<80x64xf32>
    %c0_45 = arith.constant 0 : index
    %c0_46 = arith.constant 0 : index
    %53 = vector.load %arg10[%c0_45, %c0_46] : memref<6x64xf32, #tpu.memory_space<vmem>>, vector<1x64xf32>
    %54 = vector.broadcast %53 : vector<1x64xf32> to vector<80x64xf32>
    %55 = arith.addf %52, %54 : vector<80x64xf32>
    %cst_47 = arith.constant 0.000000e+00 : f32
    %56 = vector.broadcast %cst_47 : f32 to vector<80x64xf32>
    %57 = arith.maximumf %55, %56 : vector<80x64xf32>
    %58 = vector.extract_strided_slice %57 {offsets = [0, 0], sizes = [16, 64], strides = [1, 1]} : vector<80x64xf32> to vector<16x64xf32>
    %59 = vector.extract_strided_slice %57 {offsets = [16, 0], sizes = [16, 64], strides = [1, 1]} : vector<80x64xf32> to vector<16x64xf32>
    %60 = vector.extract_strided_slice %57 {offsets = [32, 0], sizes = [16, 64], strides = [1, 1]} : vector<80x64xf32> to vector<16x64xf32>
    %61 = vector.extract_strided_slice %57 {offsets = [48, 0], sizes = [16, 64], strides = [1, 1]} : vector<80x64xf32> to vector<16x64xf32>
    %62 = vector.extract_strided_slice %57 {offsets = [64, 0], sizes = [16, 64], strides = [1, 1]} : vector<80x64xf32> to vector<16x64xf32>
    %c8 = arith.constant 8 : index
    %c0_48 = arith.constant 0 : index
    %c0_49 = arith.constant 0 : index
    %63 = vector.load %arg2[%c8, %c0_48, %c0_49] : memref<11x80x64xf32, #tpu.memory_space<vmem>>, vector<1x80x64xf32>
    %64 = vector.shape_cast %63 : vector<1x80x64xf32> to vector<80x64xf32>
    %cst_50 = arith.constant dense<0.000000e+00> : vector<16x64xf32>
    %65 = tpu.matmul %0, %64, %cst_50 {dimension_numbers = #tpu.dot_dimension_numbers<[1], [0], [0], [1], [0, 0, 1, 1], [], []>} : vector<16x80xf32>, vector<80x64xf32>, vector<16x64xf32> -> vector<16x64xf32>
    %c3_51 = arith.constant 3 : index
    %c0_52 = arith.constant 0 : index
    %66 = vector.load %arg7[%c3_51, %c0_52] : memref<6x64xf32, #tpu.memory_space<vmem>>, vector<1x64xf32>
    %67 = vector.broadcast %66 : vector<1x64xf32> to vector<16x64xf32>
    %68 = arith.addf %65, %67 : vector<16x64xf32>
    %cst_53 = arith.constant 0.000000e+00 : f32
    %69 = vector.broadcast %cst_53 : f32 to vector<16x64xf32>
    %70 = arith.maximumf %68, %69 : vector<16x64xf32>
    %c3_54 = arith.constant 3 : index
    %c0_55 = arith.constant 0 : index
    %c0_56 = arith.constant 0 : index
    %71 = vector.load %arg4[%c3_54, %c0_55, %c0_56] : memref<6x64x128xf32, #tpu.memory_space<vmem>>, vector<1x64x128xf32>
    %72 = vector.shape_cast %71 : vector<1x64x128xf32> to vector<64x128xf32>
    %cst_57 = arith.constant dense<0.000000e+00> : vector<16x128xf32>
    %73 = tpu.matmul %70, %72, %cst_57 {dimension_numbers = #tpu.dot_dimension_numbers<[1], [0], [0], [1], [0, 0, 1, 1], [], []>} : vector<16x64xf32>, vector<64x128xf32>, vector<16x128xf32> -> vector<16x128xf32>
    %c3_58 = arith.constant 3 : index
    %c0_59 = arith.constant 0 : index
    %74 = vector.load %arg8[%c3_58, %c0_59] : memref<6x128xf32, #tpu.memory_space<vmem>>, vector<1x128xf32>
    %75 = vector.broadcast %74 : vector<1x128xf32> to vector<16x128xf32>
    %76 = arith.addf %73, %75 : vector<16x128xf32>
    %cst_60 = arith.constant 0.000000e+00 : f32
    %77 = vector.broadcast %cst_60 : f32 to vector<16x128xf32>
    %78 = arith.maximumf %76, %77 : vector<16x128xf32>
    %c3_61 = arith.constant 3 : index
    %c0_62 = arith.constant 0 : index
    %c0_63 = arith.constant 0 : index
    %79 = vector.load %arg5[%c3_61, %c0_62, %c0_63] : memref<6x128x64xf32, #tpu.memory_space<vmem>>, vector<1x128x64xf32>
    %80 = vector.shape_cast %79 : vector<1x128x64xf32> to vector<128x64xf32>
    %cst_64 = arith.constant dense<0.000000e+00> : vector<16x64xf32>
    %81 = tpu.matmul %78, %80, %cst_64 {dimension_numbers = #tpu.dot_dimension_numbers<[1], [0], [0], [1], [0, 0, 1, 1], [], []>} : vector<16x128xf32>, vector<128x64xf32>, vector<16x64xf32> -> vector<16x64xf32>
    %c3_65 = arith.constant 3 : index
    %c0_66 = arith.constant 0 : index
    %82 = vector.load %arg9[%c3_65, %c0_66] : memref<6x64xf32, #tpu.memory_space<vmem>>, vector<1x64xf32>
    %83 = vector.broadcast %82 : vector<1x64xf32> to vector<16x64xf32>
    %84 = arith.addf %81, %83 : vector<16x64xf32>
    %cst_67 = arith.constant 0.000000e+00 : f32
    %85 = vector.broadcast %cst_67 : f32 to vector<16x64xf32>
    %86 = arith.maximumf %84, %85 : vector<16x64xf32>
    %c3_68 = arith.constant 3 : index
    %c0_69 = arith.constant 0 : index
    %c0_70 = arith.constant 0 : index
    %87 = vector.load %arg6[%c3_68, %c0_69, %c0_70] : memref<6x64x64xf32, #tpu.memory_space<vmem>>, vector<1x64x64xf32>
    %88 = vector.shape_cast %87 : vector<1x64x64xf32> to vector<64x64xf32>
    %cst_71 = arith.constant dense<0.000000e+00> : vector<16x64xf32>
    %89 = tpu.matmul %86, %88, %cst_71 {dimension_numbers = #tpu.dot_dimension_numbers<[1], [0], [0], [1], [0, 0, 1, 1], [], []>} : vector<16x64xf32>, vector<64x64xf32>, vector<16x64xf32> -> vector<16x64xf32>
    %c3_72 = arith.constant 3 : index
    %c0_73 = arith.constant 0 : index
    %90 = vector.load %arg10[%c3_72, %c0_73] : memref<6x64xf32, #tpu.memory_space<vmem>>, vector<1x64xf32>
    %91 = vector.broadcast %90 : vector<1x64xf32> to vector<16x64xf32>
    %92 = arith.addf %89, %91 : vector<16x64xf32>
    %cst_74 = arith.constant 0.000000e+00 : f32
    %93 = vector.broadcast %cst_74 : f32 to vector<16x64xf32>
    %94 = arith.maximumf %92, %93 : vector<16x64xf32>
    %c5 = arith.constant 5 : index
    %c0_75 = arith.constant 0 : index
    %c0_76 = arith.constant 0 : index
    %95 = vector.load %arg2[%c5, %c0_75, %c0_76] : memref<11x80x64xf32, #tpu.memory_space<vmem>>, vector<1x80x64xf32>
    %96 = vector.shape_cast %95 : vector<1x80x64xf32> to vector<80x64xf32>
    %cst_77 = arith.constant dense<0.000000e+00> : vector<16x64xf32>
    %97 = tpu.matmul %0, %96, %cst_77 {dimension_numbers = #tpu.dot_dimension_numbers<[1], [0], [0], [1], [0, 0, 1, 1], [], []>} : vector<16x80xf32>, vector<80x64xf32>, vector<16x64xf32> -> vector<16x64xf32>
    %c2_78 = arith.constant 2 : index
    %c0_79 = arith.constant 0 : index
    %c0_80 = arith.constant 0 : index
    %98 = vector.load %arg3[%c2_78, %c0_79, %c0_80] : memref<9x64x64xf32, #tpu.memory_space<vmem>>, vector<1x64x64xf32>
    %99 = vector.shape_cast %98 : vector<1x64x64xf32> to vector<64x64xf32>
    %cst_81 = arith.constant dense<0.000000e+00> : vector<16x64xf32>
    %100 = tpu.matmul %60, %99, %cst_81 {dimension_numbers = #tpu.dot_dimension_numbers<[1], [0], [0], [1], [0, 0, 1, 1], [], []>} : vector<16x64xf32>, vector<64x64xf32>, vector<16x64xf32> -> vector<16x64xf32>
    %101 = arith.addf %97, %100 : vector<16x64xf32>
    %c1_82 = arith.constant 1 : index
    %c0_83 = arith.constant 0 : index
    %102 = vector.load %arg7[%c1_82, %c0_83] : memref<6x64xf32, #tpu.memory_space<vmem>>, vector<1x64xf32>
    %103 = vector.broadcast %102 : vector<1x64xf32> to vector<16x64xf32>
    %104 = arith.addf %101, %103 : vector<16x64xf32>
    %c6 = arith.constant 6 : index
    %c0_84 = arith.constant 0 : index
    %c0_85 = arith.constant 0 : index
    %105 = vector.load %arg2[%c6, %c0_84, %c0_85] : memref<11x80x64xf32, #tpu.memory_space<vmem>>, vector<1x80x64xf32>
    %106 = vector.shape_cast %105 : vector<1x80x64xf32> to vector<80x64xf32>
    %cst_86 = arith.constant dense<0.000000e+00> : vector<16x64xf32>
    %107 = tpu.matmul %0, %106, %cst_86 {dimension_numbers = #tpu.dot_dimension_numbers<[1], [0], [0], [1], [0, 0, 1, 1], [], []>} : vector<16x80xf32>, vector<80x64xf32>, vector<16x64xf32> -> vector<16x64xf32>
    %c2_87 = arith.constant 2 : index
    %c0_88 = arith.constant 0 : index
    %c0_89 = arith.constant 0 : index
    %108 = vector.load %arg3[%c2_87, %c0_88, %c0_89] : memref<9x64x64xf32, #tpu.memory_space<vmem>>, vector<1x64x64xf32>
    %109 = vector.shape_cast %108 : vector<1x64x64xf32> to vector<64x64xf32>
    %cst_90 = arith.constant dense<0.000000e+00> : vector<16x64xf32>
    %110 = tpu.matmul %62, %109, %cst_90 {dimension_numbers = #tpu.dot_dimension_numbers<[1], [0], [0], [1], [0, 0, 1, 1], [], []>} : vector<16x64xf32>, vector<64x64xf32>, vector<16x64xf32> -> vector<16x64xf32>
    %111 = arith.addf %107, %110 : vector<16x64xf32>
    %c1_91 = arith.constant 1 : index
    %c0_92 = arith.constant 0 : index
    %112 = vector.load %arg7[%c1_91, %c0_92] : memref<6x64xf32, #tpu.memory_space<vmem>>, vector<1x64xf32>
    %113 = vector.broadcast %112 : vector<1x64xf32> to vector<16x64xf32>
    %114 = arith.addf %111, %113 : vector<16x64xf32>
    %115 = tpu.concatenate %104, %114 in 0 : vector<16x64xf32>, vector<16x64xf32> -> vector<32x64xf32>
    %cst_93 = arith.constant 0.000000e+00 : f32
    %116 = vector.broadcast %cst_93 : f32 to vector<32x64xf32>
    %117 = arith.maximumf %115, %116 : vector<32x64xf32>
    %c1_94 = arith.constant 1 : index
    %c0_95 = arith.constant 0 : index
    %c0_96 = arith.constant 0 : index
    %118 = vector.load %arg4[%c1_94, %c0_95, %c0_96] : memref<6x64x128xf32, #tpu.memory_space<vmem>>, vector<1x64x128xf32>
    %119 = vector.shape_cast %118 : vector<1x64x128xf32> to vector<64x128xf32>
    %cst_97 = arith.constant dense<0.000000e+00> : vector<32x128xf32>
    %120 = tpu.matmul %117, %119, %cst_97 {dimension_numbers = #tpu.dot_dimension_numbers<[1], [0], [0], [1], [0, 0, 1, 1], [], []>} : vector<32x64xf32>, vector<64x128xf32>, vector<32x128xf32> -> vector<32x128xf32>
    %c1_98 = arith.constant 1 : index
    %c0_99 = arith.constant 0 : index
    %121 = vector.load %arg8[%c1_98, %c0_99] : memref<6x128xf32, #tpu.memory_space<vmem>>, vector<1x128xf32>
    %122 = vector.broadcast %121 : vector<1x128xf32> to vector<32x128xf32>
    %123 = arith.addf %120, %122 : vector<32x128xf32>
    %cst_100 = arith.constant 0.000000e+00 : f32
    %124 = vector.broadcast %cst_100 : f32 to vector<32x128xf32>
    %125 = arith.maximumf %123, %124 : vector<32x128xf32>
    %c1_101 = arith.constant 1 : index
    %c0_102 = arith.constant 0 : index
    %c0_103 = arith.constant 0 : index
    %126 = vector.load %arg5[%c1_101, %c0_102, %c0_103] : memref<6x128x64xf32, #tpu.memory_space<vmem>>, vector<1x128x64xf32>
    %127 = vector.shape_cast %126 : vector<1x128x64xf32> to vector<128x64xf32>
    %cst_104 = arith.constant dense<0.000000e+00> : vector<32x64xf32>
    %128 = tpu.matmul %125, %127, %cst_104 {dimension_numbers = #tpu.dot_dimension_numbers<[1], [0], [0], [1], [0, 0, 1, 1], [], []>} : vector<32x128xf32>, vector<128x64xf32>, vector<32x64xf32> -> vector<32x64xf32>
    %c1_105 = arith.constant 1 : index
    %c0_106 = arith.constant 0 : index
    %129 = vector.load %arg9[%c1_105, %c0_106] : memref<6x64xf32, #tpu.memory_space<vmem>>, vector<1x64xf32>
    %130 = vector.broadcast %129 : vector<1x64xf32> to vector<32x64xf32>
    %131 = arith.addf %128, %130 : vector<32x64xf32>
    %cst_107 = arith.constant 0.000000e+00 : f32
    %132 = vector.broadcast %cst_107 : f32 to vector<32x64xf32>
    %133 = arith.maximumf %131, %132 : vector<32x64xf32>
    %c1_108 = arith.constant 1 : index
    %c0_109 = arith.constant 0 : index
    %c0_110 = arith.constant 0 : index
    %134 = vector.load %arg6[%c1_108, %c0_109, %c0_110] : memref<6x64x64xf32, #tpu.memory_space<vmem>>, vector<1x64x64xf32>
    %135 = vector.shape_cast %134 : vector<1x64x64xf32> to vector<64x64xf32>
    %cst_111 = arith.constant dense<0.000000e+00> : vector<32x64xf32>
    %136 = tpu.matmul %133, %135, %cst_111 {dimension_numbers = #tpu.dot_dimension_numbers<[1], [0], [0], [1], [0, 0, 1, 1], [], []>} : vector<32x64xf32>, vector<64x64xf32>, vector<32x64xf32> -> vector<32x64xf32>
    %c1_112 = arith.constant 1 : index
    %c0_113 = arith.constant 0 : index
    %137 = vector.load %arg10[%c1_112, %c0_113] : memref<6x64xf32, #tpu.memory_space<vmem>>, vector<1x64xf32>
    %138 = vector.broadcast %137 : vector<1x64xf32> to vector<32x64xf32>
    %139 = arith.addf %136, %138 : vector<32x64xf32>
    %cst_114 = arith.constant 0.000000e+00 : f32
    %140 = vector.broadcast %cst_114 : f32 to vector<32x64xf32>
    %141 = arith.maximumf %139, %140 : vector<32x64xf32>
    %142 = vector.extract_strided_slice %141 {offsets = [0, 0], sizes = [16, 64], strides = [1, 1]} : vector<32x64xf32> to vector<16x64xf32>
    %143 = vector.extract_strided_slice %141 {offsets = [16, 0], sizes = [16, 64], strides = [1, 1]} : vector<32x64xf32> to vector<16x64xf32>
    %c0_115 = arith.constant 0 : index
    %c0_116 = arith.constant 0 : index
    %c0_117 = arith.constant 0 : index
    %144 = vector.load %arg3[%c0_115, %c0_116, %c0_117] : memref<9x64x64xf32, #tpu.memory_space<vmem>>, vector<1x64x64xf32>
    %145 = vector.shape_cast %144 : vector<1x64x64xf32> to vector<64x64xf32>
    %cst_118 = arith.constant dense<0.000000e+00> : vector<16x64xf32>
    %146 = tpu.matmul %59, %145, %cst_118 {dimension_numbers = #tpu.dot_dimension_numbers<[1], [0], [0], [1], [0, 0, 1, 1], [], []>} : vector<16x64xf32>, vector<64x64xf32>, vector<16x64xf32> -> vector<16x64xf32>
    %c7 = arith.constant 7 : index
    %c0_119 = arith.constant 0 : index
    %c0_120 = arith.constant 0 : index
    %147 = vector.load %arg2[%c7, %c0_119, %c0_120] : memref<11x80x64xf32, #tpu.memory_space<vmem>>, vector<1x80x64xf32>
    %148 = vector.shape_cast %147 : vector<1x80x64xf32> to vector<80x64xf32>
    %cst_121 = arith.constant dense<0.000000e+00> : vector<16x64xf32>
    %149 = tpu.matmul %0, %148, %cst_121 {dimension_numbers = #tpu.dot_dimension_numbers<[1], [0], [0], [1], [0, 0, 1, 1], [], []>} : vector<16x80xf32>, vector<80x64xf32>, vector<16x64xf32> -> vector<16x64xf32>
    %150 = arith.addf %146, %149 : vector<16x64xf32>
    %c1_122 = arith.constant 1 : index
    %c0_123 = arith.constant 0 : index
    %c0_124 = arith.constant 0 : index
    %151 = vector.load %arg3[%c1_122, %c0_123, %c0_124] : memref<9x64x64xf32, #tpu.memory_space<vmem>>, vector<1x64x64xf32>
    %152 = vector.shape_cast %151 : vector<1x64x64xf32> to vector<64x64xf32>
    %cst_125 = arith.constant dense<0.000000e+00> : vector<16x64xf32>
    %153 = tpu.matmul %60, %152, %cst_125 {dimension_numbers = #tpu.dot_dimension_numbers<[1], [0], [0], [1], [0, 0, 1, 1], [], []>} : vector<16x64xf32>, vector<64x64xf32>, vector<16x64xf32> -> vector<16x64xf32>
    %154 = arith.addf %150, %153 : vector<16x64xf32>
    %c2_126 = arith.constant 2 : index
    %c0_127 = arith.constant 0 : index
    %155 = vector.load %arg7[%c2_126, %c0_127] : memref<6x64xf32, #tpu.memory_space<vmem>>, vector<1x64xf32>
    %156 = vector.broadcast %155 : vector<1x64xf32> to vector<16x64xf32>
    %157 = arith.addf %154, %156 : vector<16x64xf32>
    %cst_128 = arith.constant 0.000000e+00 : f32
    %158 = vector.broadcast %cst_128 : f32 to vector<16x64xf32>
    %159 = arith.maximumf %157, %158 : vector<16x64xf32>
    %c2_129 = arith.constant 2 : index
    %c0_130 = arith.constant 0 : index
    %c0_131 = arith.constant 0 : index
    %160 = vector.load %arg4[%c2_129, %c0_130, %c0_131] : memref<6x64x128xf32, #tpu.memory_space<vmem>>, vector<1x64x128xf32>
    %161 = vector.shape_cast %160 : vector<1x64x128xf32> to vector<64x128xf32>
    %cst_132 = arith.constant dense<0.000000e+00> : vector<16x128xf32>
    %162 = tpu.matmul %159, %161, %cst_132 {dimension_numbers = #tpu.dot_dimension_numbers<[1], [0], [0], [1], [0, 0, 1, 1], [], []>} : vector<16x64xf32>, vector<64x128xf32>, vector<16x128xf32> -> vector<16x128xf32>
    %c2_133 = arith.constant 2 : index
    %c0_134 = arith.constant 0 : index
    %163 = vector.load %arg8[%c2_133, %c0_134] : memref<6x128xf32, #tpu.memory_space<vmem>>, vector<1x128xf32>
    %164 = vector.broadcast %163 : vector<1x128xf32> to vector<16x128xf32>
    %165 = arith.addf %162, %164 : vector<16x128xf32>
    %cst_135 = arith.constant 0.000000e+00 : f32
    %166 = vector.broadcast %cst_135 : f32 to vector<16x128xf32>
    %167 = arith.maximumf %165, %166 : vector<16x128xf32>
    %c2_136 = arith.constant 2 : index
    %c0_137 = arith.constant 0 : index
    %c0_138 = arith.constant 0 : index
    %168 = vector.load %arg5[%c2_136, %c0_137, %c0_138] : memref<6x128x64xf32, #tpu.memory_space<vmem>>, vector<1x128x64xf32>
    %169 = vector.shape_cast %168 : vector<1x128x64xf32> to vector<128x64xf32>
    %cst_139 = arith.constant dense<0.000000e+00> : vector<16x64xf32>
    %170 = tpu.matmul %167, %169, %cst_139 {dimension_numbers = #tpu.dot_dimension_numbers<[1], [0], [0], [1], [0, 0, 1, 1], [], []>} : vector<16x128xf32>, vector<128x64xf32>, vector<16x64xf32> -> vector<16x64xf32>
    %c2_140 = arith.constant 2 : index
    %c0_141 = arith.constant 0 : index
    %171 = vector.load %arg9[%c2_140, %c0_141] : memref<6x64xf32, #tpu.memory_space<vmem>>, vector<1x64xf32>
    %172 = vector.broadcast %171 : vector<1x64xf32> to vector<16x64xf32>
    %173 = arith.addf %170, %172 : vector<16x64xf32>
    %cst_142 = arith.constant 0.000000e+00 : f32
    %174 = vector.broadcast %cst_142 : f32 to vector<16x64xf32>
    %175 = arith.maximumf %173, %174 : vector<16x64xf32>
    %c2_143 = arith.constant 2 : index
    %c0_144 = arith.constant 0 : index
    %c0_145 = arith.constant 0 : index
    %176 = vector.load %arg6[%c2_143, %c0_144, %c0_145] : memref<6x64x64xf32, #tpu.memory_space<vmem>>, vector<1x64x64xf32>
    %177 = vector.shape_cast %176 : vector<1x64x64xf32> to vector<64x64xf32>
    %cst_146 = arith.constant dense<0.000000e+00> : vector<16x64xf32>
    %178 = tpu.matmul %175, %177, %cst_146 {dimension_numbers = #tpu.dot_dimension_numbers<[1], [0], [0], [1], [0, 0, 1, 1], [], []>} : vector<16x64xf32>, vector<64x64xf32>, vector<16x64xf32> -> vector<16x64xf32>
    %c2_147 = arith.constant 2 : index
    %c0_148 = arith.constant 0 : index
    %179 = vector.load %arg10[%c2_147, %c0_148] : memref<6x64xf32, #tpu.memory_space<vmem>>, vector<1x64xf32>
    %180 = vector.broadcast %179 : vector<1x64xf32> to vector<16x64xf32>
    %181 = arith.addf %178, %180 : vector<16x64xf32>
    %cst_149 = arith.constant 0.000000e+00 : f32
    %182 = vector.broadcast %cst_149 : f32 to vector<16x64xf32>
    %183 = arith.maximumf %181, %182 : vector<16x64xf32>
    %c3_150 = arith.constant 3 : index
    %c0_151 = arith.constant 0 : index
    %c0_152 = arith.constant 0 : index
    %184 = vector.load %arg3[%c3_150, %c0_151, %c0_152] : memref<9x64x64xf32, #tpu.memory_space<vmem>>, vector<1x64x64xf32>
    %185 = vector.shape_cast %184 : vector<1x64x64xf32> to vector<64x64xf32>
    %cst_153 = arith.constant dense<0.000000e+00> : vector<16x64xf32>
    %186 = tpu.matmul %58, %185, %cst_153 {dimension_numbers = #tpu.dot_dimension_numbers<[1], [0], [0], [1], [0, 0, 1, 1], [], []>} : vector<16x64xf32>, vector<64x64xf32>, vector<16x64xf32> -> vector<16x64xf32>
    %c4_154 = arith.constant 4 : index
    %c0_155 = arith.constant 0 : index
    %c0_156 = arith.constant 0 : index
    %187 = vector.load %arg3[%c4_154, %c0_155, %c0_156] : memref<9x64x64xf32, #tpu.memory_space<vmem>>, vector<1x64x64xf32>
    %188 = vector.shape_cast %187 : vector<1x64x64xf32> to vector<64x64xf32>
    %cst_157 = arith.constant dense<0.000000e+00> : vector<16x64xf32>
    %189 = tpu.matmul %183, %188, %cst_157 {dimension_numbers = #tpu.dot_dimension_numbers<[1], [0], [0], [1], [0, 0, 1, 1], [], []>} : vector<16x64xf32>, vector<64x64xf32>, vector<16x64xf32> -> vector<16x64xf32>
    %190 = arith.addf %186, %189 : vector<16x64xf32>
    %c5_158 = arith.constant 5 : index
    %c0_159 = arith.constant 0 : index
    %c0_160 = arith.constant 0 : index
    %191 = vector.load %arg3[%c5_158, %c0_159, %c0_160] : memref<9x64x64xf32, #tpu.memory_space<vmem>>, vector<1x64x64xf32>
    %192 = vector.shape_cast %191 : vector<1x64x64xf32> to vector<64x64xf32>
    %cst_161 = arith.constant dense<0.000000e+00> : vector<16x64xf32>
    %193 = tpu.matmul %142, %192, %cst_161 {dimension_numbers = #tpu.dot_dimension_numbers<[1], [0], [0], [1], [0, 0, 1, 1], [], []>} : vector<16x64xf32>, vector<64x64xf32>, vector<16x64xf32> -> vector<16x64xf32>
    %194 = arith.addf %190, %193 : vector<16x64xf32>
    %c9 = arith.constant 9 : index
    %c0_162 = arith.constant 0 : index
    %c0_163 = arith.constant 0 : index
    %195 = vector.load %arg2[%c9, %c0_162, %c0_163] : memref<11x80x64xf32, #tpu.memory_space<vmem>>, vector<1x80x64xf32>
    %196 = vector.shape_cast %195 : vector<1x80x64xf32> to vector<80x64xf32>
    %cst_164 = arith.constant dense<0.000000e+00> : vector<16x64xf32>
    %197 = tpu.matmul %0, %196, %cst_164 {dimension_numbers = #tpu.dot_dimension_numbers<[1], [0], [0], [1], [0, 0, 1, 1], [], []>} : vector<16x80xf32>, vector<80x64xf32>, vector<16x64xf32> -> vector<16x64xf32>
    %198 = arith.addf %194, %197 : vector<16x64xf32>
    %c4_165 = arith.constant 4 : index
    %c0_166 = arith.constant 0 : index
    %199 = vector.load %arg7[%c4_165, %c0_166] : memref<6x64xf32, #tpu.memory_space<vmem>>, vector<1x64xf32>
    %200 = vector.broadcast %199 : vector<1x64xf32> to vector<16x64xf32>
    %201 = arith.addf %198, %200 : vector<16x64xf32>
    %cst_167 = arith.constant 0.000000e+00 : f32
    %202 = vector.broadcast %cst_167 : f32 to vector<16x64xf32>
    %203 = arith.maximumf %201, %202 : vector<16x64xf32>
    %c4_168 = arith.constant 4 : index
    %c0_169 = arith.constant 0 : index
    %c0_170 = arith.constant 0 : index
    %204 = vector.load %arg4[%c4_168, %c0_169, %c0_170] : memref<6x64x128xf32, #tpu.memory_space<vmem>>, vector<1x64x128xf32>
    %205 = vector.shape_cast %204 : vector<1x64x128xf32> to vector<64x128xf32>
    %cst_171 = arith.constant dense<0.000000e+00> : vector<16x128xf32>
    %206 = tpu.matmul %203, %205, %cst_171 {dimension_numbers = #tpu.dot_dimension_numbers<[1], [0], [0], [1], [0, 0, 1, 1], [], []>} : vector<16x64xf32>, vector<64x128xf32>, vector<16x128xf32> -> vector<16x128xf32>
    %c4_172 = arith.constant 4 : index
    %c0_173 = arith.constant 0 : index
    %207 = vector.load %arg8[%c4_172, %c0_173] : memref<6x128xf32, #tpu.memory_space<vmem>>, vector<1x128xf32>
    %208 = vector.broadcast %207 : vector<1x128xf32> to vector<16x128xf32>
    %209 = arith.addf %206, %208 : vector<16x128xf32>
    %cst_174 = arith.constant 0.000000e+00 : f32
    %210 = vector.broadcast %cst_174 : f32 to vector<16x128xf32>
    %211 = arith.maximumf %209, %210 : vector<16x128xf32>
    %c4_175 = arith.constant 4 : index
    %c0_176 = arith.constant 0 : index
    %c0_177 = arith.constant 0 : index
    %212 = vector.load %arg5[%c4_175, %c0_176, %c0_177] : memref<6x128x64xf32, #tpu.memory_space<vmem>>, vector<1x128x64xf32>
    %213 = vector.shape_cast %212 : vector<1x128x64xf32> to vector<128x64xf32>
    %cst_178 = arith.constant dense<0.000000e+00> : vector<16x64xf32>
    %214 = tpu.matmul %211, %213, %cst_178 {dimension_numbers = #tpu.dot_dimension_numbers<[1], [0], [0], [1], [0, 0, 1, 1], [], []>} : vector<16x128xf32>, vector<128x64xf32>, vector<16x64xf32> -> vector<16x64xf32>
    %c4_179 = arith.constant 4 : index
    %c0_180 = arith.constant 0 : index
    %215 = vector.load %arg9[%c4_179, %c0_180] : memref<6x64xf32, #tpu.memory_space<vmem>>, vector<1x64xf32>
    %216 = vector.broadcast %215 : vector<1x64xf32> to vector<16x64xf32>
    %217 = arith.addf %214, %216 : vector<16x64xf32>
    %cst_181 = arith.constant 0.000000e+00 : f32
    %218 = vector.broadcast %cst_181 : f32 to vector<16x64xf32>
    %219 = arith.maximumf %217, %218 : vector<16x64xf32>
    %c4_182 = arith.constant 4 : index
    %c0_183 = arith.constant 0 : index
    %c0_184 = arith.constant 0 : index
    %220 = vector.load %arg6[%c4_182, %c0_183, %c0_184] : memref<6x64x64xf32, #tpu.memory_space<vmem>>, vector<1x64x64xf32>
    %221 = vector.shape_cast %220 : vector<1x64x64xf32> to vector<64x64xf32>
    %cst_185 = arith.constant dense<0.000000e+00> : vector<16x64xf32>
    %222 = tpu.matmul %219, %221, %cst_185 {dimension_numbers = #tpu.dot_dimension_numbers<[1], [0], [0], [1], [0, 0, 1, 1], [], []>} : vector<16x64xf32>, vector<64x64xf32>, vector<16x64xf32> -> vector<16x64xf32>
    %c4_186 = arith.constant 4 : index
    %c0_187 = arith.constant 0 : index
    %223 = vector.load %arg10[%c4_186, %c0_187] : memref<6x64xf32, #tpu.memory_space<vmem>>, vector<1x64xf32>
    %224 = vector.broadcast %223 : vector<1x64xf32> to vector<16x64xf32>
    %225 = arith.addf %222, %224 : vector<16x64xf32>
    %cst_188 = arith.constant 0.000000e+00 : f32
    %226 = vector.broadcast %cst_188 : f32 to vector<16x64xf32>
    %227 = arith.maximumf %225, %226 : vector<16x64xf32>
    %c6_189 = arith.constant 6 : index
    %c0_190 = arith.constant 0 : index
    %c0_191 = arith.constant 0 : index
    %228 = vector.load %arg3[%c6_189, %c0_190, %c0_191] : memref<9x64x64xf32, #tpu.memory_space<vmem>>, vector<1x64x64xf32>
    %229 = vector.shape_cast %228 : vector<1x64x64xf32> to vector<64x64xf32>
    %cst_192 = arith.constant dense<0.000000e+00> : vector<16x64xf32>
    %230 = tpu.matmul %61, %229, %cst_192 {dimension_numbers = #tpu.dot_dimension_numbers<[1], [0], [0], [1], [0, 0, 1, 1], [], []>} : vector<16x64xf32>, vector<64x64xf32>, vector<16x64xf32> -> vector<16x64xf32>
    %c10 = arith.constant 10 : index
    %c0_193 = arith.constant 0 : index
    %c0_194 = arith.constant 0 : index
    %231 = vector.load %arg2[%c10, %c0_193, %c0_194] : memref<11x80x64xf32, #tpu.memory_space<vmem>>, vector<1x80x64xf32>
    %232 = vector.shape_cast %231 : vector<1x80x64xf32> to vector<80x64xf32>
    %cst_195 = arith.constant dense<0.000000e+00> : vector<16x64xf32>
    %233 = tpu.matmul %0, %232, %cst_195 {dimension_numbers = #tpu.dot_dimension_numbers<[1], [0], [0], [1], [0, 0, 1, 1], [], []>} : vector<16x80xf32>, vector<80x64xf32>, vector<16x64xf32> -> vector<16x64xf32>
    %234 = arith.addf %230, %233 : vector<16x64xf32>
    %c7_196 = arith.constant 7 : index
    %c0_197 = arith.constant 0 : index
    %c0_198 = arith.constant 0 : index
    %235 = vector.load %arg3[%c7_196, %c0_197, %c0_198] : memref<9x64x64xf32, #tpu.memory_space<vmem>>, vector<1x64x64xf32>
    %236 = vector.shape_cast %235 : vector<1x64x64xf32> to vector<64x64xf32>
    %cst_199 = arith.constant dense<0.000000e+00> : vector<16x64xf32>
    %237 = tpu.matmul %143, %236, %cst_199 {dimension_numbers = #tpu.dot_dimension_numbers<[1], [0], [0], [1], [0, 0, 1, 1], [], []>} : vector<16x64xf32>, vector<64x64xf32>, vector<16x64xf32> -> vector<16x64xf32>
    %238 = arith.addf %234, %237 : vector<16x64xf32>
    %c8_200 = arith.constant 8 : index
    %c0_201 = arith.constant 0 : index
    %c0_202 = arith.constant 0 : index
    %239 = vector.load %arg3[%c8_200, %c0_201, %c0_202] : memref<9x64x64xf32, #tpu.memory_space<vmem>>, vector<1x64x64xf32>
    %240 = vector.shape_cast %239 : vector<1x64x64xf32> to vector<64x64xf32>
    %cst_203 = arith.constant dense<0.000000e+00> : vector<16x64xf32>
    %241 = tpu.matmul %94, %240, %cst_203 {dimension_numbers = #tpu.dot_dimension_numbers<[1], [0], [0], [1], [0, 0, 1, 1], [], []>} : vector<16x64xf32>, vector<64x64xf32>, vector<16x64xf32> -> vector<16x64xf32>
    %242 = arith.addf %238, %241 : vector<16x64xf32>
    %c5_204 = arith.constant 5 : index
    %c0_205 = arith.constant 0 : index
    %243 = vector.load %arg7[%c5_204, %c0_205] : memref<6x64xf32, #tpu.memory_space<vmem>>, vector<1x64xf32>
    %244 = vector.broadcast %243 : vector<1x64xf32> to vector<16x64xf32>
    %245 = arith.addf %242, %244 : vector<16x64xf32>
    %cst_206 = arith.constant 0.000000e+00 : f32
    %246 = vector.broadcast %cst_206 : f32 to vector<16x64xf32>
    %247 = arith.maximumf %245, %246 : vector<16x64xf32>
    %c5_207 = arith.constant 5 : index
    %c0_208 = arith.constant 0 : index
    %c0_209 = arith.constant 0 : index
    %248 = vector.load %arg4[%c5_207, %c0_208, %c0_209] : memref<6x64x128xf32, #tpu.memory_space<vmem>>, vector<1x64x128xf32>
    %249 = vector.shape_cast %248 : vector<1x64x128xf32> to vector<64x128xf32>
    %cst_210 = arith.constant dense<0.000000e+00> : vector<16x128xf32>
    %250 = tpu.matmul %247, %249, %cst_210 {dimension_numbers = #tpu.dot_dimension_numbers<[1], [0], [0], [1], [0, 0, 1, 1], [], []>} : vector<16x64xf32>, vector<64x128xf32>, vector<16x128xf32> -> vector<16x128xf32>
    %c5_211 = arith.constant 5 : index
    %c0_212 = arith.constant 0 : index
    %251 = vector.load %arg8[%c5_211, %c0_212] : memref<6x128xf32, #tpu.memory_space<vmem>>, vector<1x128xf32>
    %252 = vector.broadcast %251 : vector<1x128xf32> to vector<16x128xf32>
    %253 = arith.addf %250, %252 : vector<16x128xf32>
    %cst_213 = arith.constant 0.000000e+00 : f32
    %254 = vector.broadcast %cst_213 : f32 to vector<16x128xf32>
    %255 = arith.maximumf %253, %254 : vector<16x128xf32>
    %c5_214 = arith.constant 5 : index
    %c0_215 = arith.constant 0 : index
    %c0_216 = arith.constant 0 : index
    %256 = vector.load %arg5[%c5_214, %c0_215, %c0_216] : memref<6x128x64xf32, #tpu.memory_space<vmem>>, vector<1x128x64xf32>
    %257 = vector.shape_cast %256 : vector<1x128x64xf32> to vector<128x64xf32>
    %cst_217 = arith.constant dense<0.000000e+00> : vector<16x64xf32>
    %258 = tpu.matmul %255, %257, %cst_217 {dimension_numbers = #tpu.dot_dimension_numbers<[1], [0], [0], [1], [0, 0, 1, 1], [], []>} : vector<16x128xf32>, vector<128x64xf32>, vector<16x64xf32> -> vector<16x64xf32>
    %c5_218 = arith.constant 5 : index
    %c0_219 = arith.constant 0 : index
    %259 = vector.load %arg9[%c5_218, %c0_219] : memref<6x64xf32, #tpu.memory_space<vmem>>, vector<1x64xf32>
    %260 = vector.broadcast %259 : vector<1x64xf32> to vector<16x64xf32>
    %261 = arith.addf %258, %260 : vector<16x64xf32>
    %cst_220 = arith.constant 0.000000e+00 : f32
    %262 = vector.broadcast %cst_220 : f32 to vector<16x64xf32>
    %263 = arith.maximumf %261, %262 : vector<16x64xf32>
    %c5_221 = arith.constant 5 : index
    %c0_222 = arith.constant 0 : index
    %c0_223 = arith.constant 0 : index
    %264 = vector.load %arg6[%c5_221, %c0_222, %c0_223] : memref<6x64x64xf32, #tpu.memory_space<vmem>>, vector<1x64x64xf32>
    %265 = vector.shape_cast %264 : vector<1x64x64xf32> to vector<64x64xf32>
    %cst_224 = arith.constant dense<0.000000e+00> : vector<16x64xf32>
    %266 = tpu.matmul %263, %265, %cst_224 {dimension_numbers = #tpu.dot_dimension_numbers<[1], [0], [0], [1], [0, 0, 1, 1], [], []>} : vector<16x64xf32>, vector<64x64xf32>, vector<16x64xf32> -> vector<16x64xf32>
    %c5_225 = arith.constant 5 : index
    %c0_226 = arith.constant 0 : index
    %267 = vector.load %arg10[%c5_225, %c0_226] : memref<6x64xf32, #tpu.memory_space<vmem>>, vector<1x64xf32>
    %268 = vector.broadcast %267 : vector<1x64xf32> to vector<16x64xf32>
    %269 = arith.addf %266, %268 : vector<16x64xf32>
    %cst_227 = arith.constant 0.000000e+00 : f32
    %270 = vector.broadcast %cst_227 : f32 to vector<16x64xf32>
    %271 = arith.maximumf %269, %270 : vector<16x64xf32>
    %c0_228 = arith.constant 0 : index
    %c0_229 = arith.constant 0 : index
    %272 = vector.load %arg12[%c0_228, %c0_229] : memref<64x128xf32, #tpu.memory_space<vmem>>, vector<64x128xf32>
    %cst_230 = arith.constant dense<0.000000e+00> : vector<16x128xf32>
    %273 = tpu.matmul %227, %272, %cst_230 {dimension_numbers = #tpu.dot_dimension_numbers<[1], [0], [0], [1], [0, 0, 1, 1], [], []>} : vector<16x64xf32>, vector<64x128xf32>, vector<16x128xf32> -> vector<16x128xf32>
    %c0_231 = arith.constant 0 : index
    %c0_232 = arith.constant 0 : index
    %274 = vector.load %arg13[%c0_231, %c0_232] : memref<64x128xf32, #tpu.memory_space<vmem>>, vector<64x128xf32>
    %cst_233 = arith.constant dense<0.000000e+00> : vector<16x128xf32>
    %275 = tpu.matmul %271, %274, %cst_233 {dimension_numbers = #tpu.dot_dimension_numbers<[1], [0], [0], [1], [0, 0, 1, 1], [], []>} : vector<16x64xf32>, vector<64x128xf32>, vector<16x128xf32> -> vector<16x128xf32>
    %276 = arith.addf %273, %275 : vector<16x128xf32>
    %c0_234 = arith.constant 0 : index
    %c0_235 = arith.constant 0 : index
    %277 = vector.load %arg11[%c0_234, %c0_235] : memref<80x128xf32, #tpu.memory_space<vmem>>, vector<80x128xf32>
    %cst_236 = arith.constant dense<0.000000e+00> : vector<16x128xf32>
    %278 = tpu.matmul %0, %277, %cst_236 {dimension_numbers = #tpu.dot_dimension_numbers<[1], [0], [0], [1], [0, 0, 1, 1], [], []>} : vector<16x80xf32>, vector<80x128xf32>, vector<16x128xf32> -> vector<16x128xf32>
    %279 = arith.addf %276, %278 : vector<16x128xf32>
    %c0_237 = arith.constant 0 : index
    %c0_238 = arith.constant 0 : index
    %280 = vector.load %arg14[%c0_237, %c0_238] : memref<1x128xf32, #tpu.memory_space<vmem>>, vector<1x128xf32>
    %281 = vector.broadcast %280 : vector<1x128xf32> to vector<16x128xf32>
    %282 = arith.addf %279, %281 : vector<16x128xf32>
    %c0_239 = arith.constant 0 : index
    %c0_240 = arith.constant 0 : index
    %283 = vector.load %arg15[%c0_239, %c0_240] : memref<16x128xf32, #tpu.memory_space<vmem>>, vector<16x128xf32>
    tpu.vector_store %arg15[%c0_239, %c0_240], %282 {strides = array<i32>} : memref<16x128xf32, #tpu.memory_space<vmem>>, vector<16x128xf32>,
    return
  }
  func.func @transform_0(%arg0: i32) -> (i32, i32) {
    %c0_i32 = arith.constant 0 : i32
    %c0_i32_0 = arith.constant 0 : i32
    return %arg0, %c0_i32 : i32, i32
  }
  func.func @transform_1(%arg0: i32) -> (i32, i32, i32) {
    %c0_i32 = arith.constant 0 : i32
    %c0_i32_0 = arith.constant 0 : i32
    %c0_i32_1 = arith.constant 0 : i32
    %c0_i32_2 = arith.constant 0 : i32
    return %c0_i32, %c0_i32_0, %c0_i32_1 : i32, i32, i32
  }
  func.func @transform_2(%arg0: i32) -> (i32, i32, i32) {
    %c0_i32 = arith.constant 0 : i32
    %c0_i32_0 = arith.constant 0 : i32
    %c0_i32_1 = arith.constant 0 : i32
    %c0_i32_2 = arith.constant 0 : i32
    return %c0_i32, %c0_i32_0, %c0_i32_1 : i32, i32, i32
  }
  func.func @transform_3(%arg0: i32) -> (i32, i32, i32) {
    %c0_i32 = arith.constant 0 : i32
    %c0_i32_0 = arith.constant 0 : i32
    %c0_i32_1 = arith.constant 0 : i32
    %c0_i32_2 = arith.constant 0 : i32
    return %c0_i32, %c0_i32_0, %c0_i32_1 : i32, i32, i32
  }
  func.func @transform_4(%arg0: i32) -> (i32, i32, i32) {
    %c0_i32 = arith.constant 0 : i32
    %c0_i32_0 = arith.constant 0 : i32
    %c0_i32_1 = arith.constant 0 : i32
    %c0_i32_2 = arith.constant 0 : i32
    return %c0_i32, %c0_i32_0, %c0_i32_1 : i32, i32, i32
  }
  func.func @transform_5(%arg0: i32) -> (i32, i32, i32) {
    %c0_i32 = arith.constant 0 : i32
    %c0_i32_0 = arith.constant 0 : i32
    %c0_i32_1 = arith.constant 0 : i32
    %c0_i32_2 = arith.constant 0 : i32
    return %c0_i32, %c0_i32_0, %c0_i32_1 : i32, i32, i32
  }
  func.func @transform_6(%arg0: i32) -> (i32, i32) {
    %c0_i32 = arith.constant 0 : i32
    %c0_i32_0 = arith.constant 0 : i32
    %c0_i32_1 = arith.constant 0 : i32
    return %c0_i32, %c0_i32_0 : i32, i32
  }
  func.func @transform_7(%arg0: i32) -> (i32, i32) {
    %c0_i32 = arith.constant 0 : i32
    %c0_i32_0 = arith.constant 0 : i32
    %c0_i32_1 = arith.constant 0 : i32
    return %c0_i32, %c0_i32_0 : i32, i32
  }
  func.func @transform_8(%arg0: i32) -> (i32, i32) {
    %c0_i32 = arith.constant 0 : i32
    %c0_i32_0 = arith.constant 0 : i32
    %c0_i32_1 = arith.constant 0 : i32
    return %c0_i32, %c0_i32_0 : i32, i32
  }
  func.func @transform_9(%arg0: i32) -> (i32, i32) {
    %c0_i32 = arith.constant 0 : i32
    %c0_i32_0 = arith.constant 0 : i32
    %c0_i32_1 = arith.constant 0 : i32
    return %c0_i32, %c0_i32_0 : i32, i32
  }
  func.func @transform_10(%arg0: i32) -> (i32, i32) {
    %c0_i32 = arith.constant 0 : i32
    %c0_i32_0 = arith.constant 0 : i32
    %c0_i32_1 = arith.constant 0 : i32
    return %c0_i32, %c0_i32_0 : i32, i32
  }
  func.func @transform_11(%arg0: i32) -> (i32, i32) {
    %c0_i32 = arith.constant 0 : i32
    %c0_i32_0 = arith.constant 0 : i32
    %c0_i32_1 = arith.constant 0 : i32
    return %c0_i32, %c0_i32_0 : i32, i32
  }
  func.func @transform_12(%arg0: i32) -> (i32, i32) {
    %c0_i32 = arith.constant 0 : i32
    %c0_i32_0 = arith.constant 0 : i32
    %c0_i32_1 = arith.constant 0 : i32
    return %c0_i32, %c0_i32_0 : i32, i32
  }
  func.func @transform_13(%arg0: i32) -> (i32, i32) {
    %c0_i32 = arith.constant 0 : i32
    %c0_i32_0 = arith.constant 0 : i32
    %c0_i32_1 = arith.constant 0 : i32
    return %c0_i32, %c0_i32_0 : i32, i32
  }
  func.func @transform_14(%arg0: i32) -> (i32, i32) {
    %c0_i32 = arith.constant 0 : i32
    %c0_i32_0 = arith.constant 0 : i32
    return %arg0, %c0_i32 : i32, i32
  }
}

</mosaic_0001>

<bundles_post_ra>
// kernel: tpu_custom_call.1
= control target key start
LH: loop header
LB: loop body
LE: loop exit
PB: predicated region body
PF: predicated region fallthrough
CT: control target
= control target key end

     0   :  { %19 = vsyncpa [#allocation3], 0  ;;  %s9334_s0 = inlined_call_operand.vmem [shape: f32[32,80], index: 0, kind: input, shape index: {}]   ;;  %s9335_s1 = inlined_call_operand.vmem [shape: f32[11,80,64], index: 1, kind: input, shape index: {}]   ;;  %s9336_s2 = inlined_call_operand.vmem [shape: f32[9,64,64], index: 2, kind: input, shape index: {}]   ;;  %s9337_s3 = inlined_call_operand.vmem [shape: f32[6,64,128], index: 3, kind: input, shape index: {}]   ;;  %s9338_s4 = inlined_call_operand.vmem [shape: f32[6,128,64], index: 4, kind: input, shape index: {}]   ;;  %s9339_s5 = inlined_call_operand.vmem [shape: f32[6,64,64], index: 5, kind: input, shape index: {}]   ;;  %s9340_s6 = inlined_call_operand.vmem [shape: f32[6,64], index: 6, kind: input, shape index: {}]   ;;  %s9341_s7 = inlined_call_operand.vmem [shape: f32[6,128], index: 7, kind: input, shape index: {}]   ;;  %s9342_s8 = inlined_call_operand.vmem [shape: f32[6,64], index: 8, kind: input, shape index: {}]   ;;  %s9343_s9 = inlined_call_operand.vmem [shape: f32[6,64], index: 9, kind: input, shape index: {}]   ;;  %s9344_s10 = inlined_call_operand.vmem [shape: f32[80,128], index: 10, kind: input, shape index: {}]   ;;  %s9345_s11 = inlined_call_operand.vmem [shape: f32[64,128], index: 11, kind: input, shape index: {}]   ;;  %s9346_s12 = inlined_call_operand.vmem [shape: f32[64,128], index: 12, kind: input, shape index: {}]   ;;  %s9347_s13 = inlined_call_operand.vmem [shape: f32[1,128], index: 13, kind: input, shape index: {}]   ;;  %s9348_s14 = inlined_call_operand.hbm [shape: f32[32,128], index: 14, kind: output, shape index: {}]  }
   0x1   :  { %21 = vsyncpa [#allocation3 + $0x1], 0  ;;  %s7717_s29 = smov 0   ;;  %s7719_s30 = smov 0  }
   0x2   :  { %s7721_s15 = smov 0   ;;  %s7723_s16 = smov 0  }
   0x3 LB: > { %9353 = sst [smem:[#allocation5_spill]] %s7633_s15  ;;  %s7738_s17 = sadd.s32 4294967295, %s7637_s16   ;;  %s7637_s16 = sphi %s7723_s16, %s9360_s16   ;;  %s7633_s15 = sphi %s7721_s15, %s9362_s15   ;;  %s7629_s30 = sphi %s7719_s30, %s9364_s30   ;;  %s7625_s29 = sphi %s7717_s29, %s9363_s29  }
   0x4   : > { %s4727_s18 = sadd.s32 4294967294, %s7637_s16   ;;  %s7742_s19 = sadd.s32 1, %s7637_s16  }
   0x5   : > { %9354 = sst [smem:[#allocation6_spill]] %s7742_s19  ;;  %s333_s20 = sadd.s32 1, %s7633_s15 }
   0x6   : > { %s330_s21 = ssub.s32 %s7637_s16, %s7742_s19  ;;  %p343_p0 = scmp.ne.s32.totalorder %s7633_s15, %s7629_s30 }
   0x7   : > { %p331_p1 = scmp.eq.s32.totalorder %s330_s21, 0  ;;  %p344_p2 = scmp.eq.s32.totalorder %s7738_s17, 1 }
   0x8   : > { %p349_p3 = scmp.ne.s32.totalorder %s7629_s30, %s7625_s29  ;;  %p350_p4 = scmp.eq.s32.totalorder %s4727_s18, 1 }
   0x9   : > { %s7753_s22 = scalar_select %p331_p1, %s7633_s15, %s333_s20  }
   0xa   : > { %p7755_p5 = por %p344_p2, %p343_p0  ;;  %p7759_p6 = por %p350_p4, %p349_p3 }
   0xb   : > { %9355 = sst [smem:[#allocation7_spill]] %s7753_s22  ;;  %p4730_p7 = scmp.ge.s32.totalorder %s7637_s16, 1 }
   0xc   : > { %s9357_s24 = scalar_select %p7759_p6, 1, 0 }
   0xd   : > { %p416_p8 = scmp.lt.s32.totalorder %s7637_s16, 3 }
   0xe   : > { %9358 = sst [smem:[#allocation8_spill]] %s9357_s24 }
   0xf   : > { %p417_p9 = pnand %p4730_p7, %p416_p8 }
  0x10   : > { %v471_v0 = vld [vmem:[%s9335_s1] sm:$0xff] (!%p417_p9)  ;;  %v472_v1 = vld [vmem:[%s9335_s1 + $0x8] sm:$0xff] (!%p417_p9)  ;;  %v473_v2 = vld [vmem:[%s9335_s1 + $0x10] sm:$0xff] (!%p417_p9)  ;;  %s4732_s21 = sshll.u32 (!%p417_p9), %s7738_s17, 1  ;;  %vm486_vm0 = vcmask (!%p417_p9), 654336   ;;  %vm935_vm1 = vcmask (!%p417_p9), 523264  }
  0x11   : > { %420 = sbr.rel (%p417_p9) target bundleno = 4668 (0x123c), region = 76  ;;  %v6690_v3 = vpack.c.bf16 (!%p417_p9), %v472_v1, %v471_v0  ;;  %v474_v4 = vld [vmem:[%s9335_s1 + $0x18] sm:$0xff] (!%p417_p9)  ;;  %p463_p10 = scmp.lt.s32.totalorder (!%p417_p9), %s4732_s21, 3  ;;  %v475_v6 = vld [vmem:[%s9335_s1 + $0x20] sm:$0xff] (!%p417_p9)  ;;  %v476_v7 = vld [vmem:[%s9335_s1 + $0x28] sm:$0xff] (!%p417_p9) }
  0x12   : > { %v6694_v5 = vpack.c.bf16 (!%p417_p9), %v474_v4, %v473_v2  ;;  %v6698_v8 = vpack.c.bf16 (!%p417_p9), %v476_v7, %v475_v6  ;;  %v477_v9 = vld [vmem:[%s9335_s1 + $0x30] sm:$0xff] (!%p417_p9)  ;;  %v478_v10 = vld [vmem:[%s9335_s1 + $0x38] sm:$0xff] (!%p417_p9)  ;;  %v479_v15 = vld [vmem:[%s9335_s1 + $0x40] sm:$0xff] (!%p417_p9)  ;;  %s459_s26 = sand.u32 (!%p417_p9), 1, %s7629_s30   ;;  %s5180_s19 = sshll.u32 (!%p417_p9), %s7738_s17, 8 }
  0x13   : > { %6691 = vmatprep.subr.bf16.mxu0 (!%p417_p9), %v6690_v3  ;;  %v6702_v12 = vpack.c.bf16 (!%p417_p9), %v478_v10, %v477_v9  ;;  %v4761_v13 = vld [vmem:[%s9335_s1 + $0xf0] sm:$0xff] (!%p417_p9)  ;;  %v4762_v14 = vld [vmem:[%s9335_s1 + $0xf8] sm:$0xff] (!%p417_p9)  ;;  %v480_v16 = vld [vmem:[%s9335_s1 + $0x48] sm:$0xff] (!%p417_p9)  ;;  %s4731_s28 = sshll.u32 (!%p417_p9), %s459_s26, 4  ;;  %s9293_s25 = scalar_lea.sflag (!%p417_p9), [#allocation3], %s459_s26 }
  0x14   : > { %6693 = vmatpush3.bf16.msra.mxu0 (!%p417_p9), %v6690_v3  ;;  %v6750_v17 = vpack.c.bf16 (!%p417_p9), %v4762_v14, %v4761_v13  ;;  %v4763_v18 = vld [vmem:[%s9335_s1 + $0x100] sm:$0xff] (!%p417_p9)  ;;  %v4764_v19 = vld [vmem:[%s9335_s1 + $0x108] sm:$0xff] (!%p417_p9)  ;;  %v4765_v21 = vld [vmem:[%s9335_s1 + $0x110] sm:$0xff] (!%p417_p9)  ;;  %v6706_v23 = vpack.c.bf16 (!%p417_p9), %v480_v16, %v479_v15  ;;  %s461_s22 = scalar_lea.vmem (!%p417_p9), [#allocation2], %s4731_s28  ;;  %s7639_s17 = smov (!%p417_p9), [#allocation2]  }
  0x15   : > { %6695 = vmatprep.subr.bf16.mxu0 (!%p417_p9), %v6694_v5  ;;  %v6754_v20 = vpack.c.bf16 (!%p417_p9), %v4764_v19, %v4763_v18  ;;  %v4766_v22 = vld [vmem:[%s9335_s1 + $0x118] sm:$0xff] (!%p417_p9)  ;;  %v4737_v24 = vld [vmem:[%s9335_s1 + $0x50] sm:$0xff] (!%p417_p9)  ;;  %v4767_v27 = vld [vmem:[%s9335_s1 + $0x120] sm:$0xff] (!%p417_p9)  ;;  %s4665_s18 = sshll.u32 (!%p417_p9), %s461_s22, 4  ;;  %s9286_s18 = int_to_ptr.vmem [resolvable:$true] %s4665_s18 }
  0x16   : > { %6751 = vmatprep.subr.bf16.mxu1 (!%p417_p9), %v6750_v17  ;;  %v4738_v25 = vld [vmem:[%s9335_s1 + $0x58] sm:$0xff] (!%p417_p9)  ;;  %v6758_v26 = vpack.c.bf16 (!%p417_p9), %v4766_v22, %v4765_v21  ;;  %v4768_v28 = vld [vmem:[%s9335_s1 + $0x128] sm:$0xff] (!%p417_p9)  ;;  %v4739_v30 = vld [vmem:[%s9335_s1 + $0x60] sm:$0xff] (!%p417_p9)  ;;  %s7575_s28 = scalar_lea.vmem (!%p417_p9), %s9286_s18, 256 }
  0x17   : > { %6753 = vmatpush3.bf16.msra.mxu1 (!%p417_p9), %v6750_v17  ;;  %v6710_v29 = vpack.c.bf16 (!%p417_p9), %v4738_v25, %v4737_v24  ;;  %v4740_v31 = vld [vmem:[%s9335_s1 + $0x68] sm:$0xff] (!%p417_p9)  ;;  %v6762_v32 = vpack.c.bf16 (!%p417_p9), %v4768_v28, %v4767_v27  ;;  %v4769_v33 = vld [vmem:[%s9335_s1 + $0x130] sm:$0xff] (!%p417_p9)  ;;  %v4770_v34 = vld [vmem:[%s9335_s1 + $0x138] sm:$0xff] (!%p417_p9)  ;;  %p7576_p11 = scmp.ne.s32.totalorder (!%p417_p9), %s9286_s18, %s7575_s28 }
  0x18   : > { %s9366_s21 = smov (!%p463_p10, %s4732_s21), 3  ;;  %6697 = vmatpush3.bf16.msra.mxu0 %v6694_v5  ;;  %6755 = vmatprep.subr.bf16.mxu1 %v6754_v20  ;;  %v6714_v36 = vpack.c.bf16 %v4740_v31, %v4739_v30  ;;  %v4741_v37 = vld [vmem:[%s9335_s1 + $0x70] sm:$0xff]  ;;  %v4742_v38 = vld [vmem:[%s9335_s1 + $0x78] sm:$0xff]  ;;  %v6766_v39 = vpack.c.bf16 %v4770_v34, %v4769_v33  ;;  %v922_v40 = vld [vmem:[%s9337_s3] sm:$0xff] }
  0x19   : > { %s4733_s27 = sshll.u32 %s9366_s21, 3  ;;  %6699 = vmatprep.subr.bf16.mxu0 %v6698_v8  ;;  %v923_v41 = vld [vmem:[%s9337_s3 + $0x8] sm:$0xff]  ;;  %v6718_v42 = vpack.c.bf16 %v4742_v38, %v4741_v37  ;;  %v4743_v43 = vld [vmem:[%s9335_s1 + $0x80] sm:$0xff]  ;;  %v924_v46 = vld [vmem:[%s9337_s3 + $0x10] sm:$0xff]  ;;  %s9291_s21 = scalar_lea.hbm %s9348_s14, %s5180_s19 }
  0x1a   : > { %s7793_s24 = scalar_lea.vmem %s9334_s0, %s4733_s27  ;;  %v4744_v44 = vld [vmem:[%s9335_s1 + $0x88] sm:$0xff]  ;;  %v6790_v45 = vpack.c.bf16 %v923_v41, %v922_v40  ;;  %v925_v47 = vld [vmem:[%s9337_s3 + $0x18] sm:$0xff]  ;;  %v4745_v49 = vld [vmem:[%s9335_s1 + $0x90] sm:$0xff]  ;;  %p7577_p12 = pnand %p7576_p11, %p7755_p5 }
  0x1b   : > { %v7796_v11 = vld [vmem:[%s7793_s24] sm:$0xff]  ;;  %6757 = vmatpush3.bf16.msra.mxu1 %v6754_v20  ;;  %v7851_v35 = vld [vmem:[%s7793_s24 + $0x8] sm:$0xff]  ;;  %v6722_v48 = vpack.c.bf16 %v4744_v44, %v4743_v43  ;;  %v4746_v50 = vld [vmem:[%s9335_s1 + $0x98] sm:$0xff]  ;;  %v6794_v51 = vpack.c.bf16 %v925_v47, %v924_v46  ;;  %s7579_s27 = sshll.u32 %s7639_s17, 4  ;;  %s7580_s27 = int_to_ptr.vmem [resolvable:$false] %s7579_s27 }
  0x1c   : > { %5723 = vmatprep.mubr.msk.f32.mxu0 %vm486_vm0, %v7796_v11  ;;  %5792 = vmatprep.mubr.msk.f32.mxu1 %vm486_vm0, %v7796_v11  ;;  %v926_v52 = vld [vmem:[%s9337_s3 + $0x20] sm:$0xff]  ;;  %v927_v53 = vld [vmem:[%s9337_s3 + $0x28] sm:$0xff]  ;;  %v6726_v54 = vpack.c.bf16 %v4746_v50, %v4745_v49  ;;  %v4751_v59 = vld [vmem:[%s9335_s1 + $0xb0] sm:$0xff]  ;;  %p7578_p13 = pneg %p7577_p12  ;;  %s7581_s15 = scalar_lea.vmem %s7580_s27, 512 }
  0x1d   : > { %6701 = vmatpush3.bf16.msra.mxu0 %v6698_v8  ;;  %6759 = vmatprep.subr.bf16.mxu1 %v6758_v26  ;;  %v4749_v55 = vld [vmem:[%s9335_s1 + $0xa0] sm:$0xff]  ;;  %v4750_v56 = vld [vmem:[%s9335_s1 + $0xa8] sm:$0xff]  ;;  %v6798_v57 = vpack.c.bf16 %v927_v53, %v926_v52  ;;  %v4752_v60 = vld [vmem:[%s9335_s1 + $0xb8] sm:$0xff]  ;;  %p7582_p0 = scmp.lt.s32.totalorder %s9286_s18, %s7580_s27  ;;  %p7583_p1 = scmp.lt.s32.totalorder %s7581_s15, %s7575_s28 }
  0x1e   : > { %6703 = vmatprep.subr.bf16.mxu0 %v6702_v12  ;;  %v6730_v58 = vpack.c.bf16 %v4750_v56, %v4749_v55  ;;  %v6734_v61 = vpack.c.bf16 %v4752_v60, %v4751_v59  ;;  %v4753_v62 = vld [vmem:[%s9335_s1 + $0xc0] sm:$0xff]  ;;  %v4754_v63 = vld [vmem:[%s9335_s1 + $0xc8] sm:$0xff]  ;;  %v4755_v1 = vld [vmem:[%s9335_s1 + $0xd0] sm:$0xff] }
  0x1f   : > { %6761 = vmatpush3.bf16.msra.mxu1 %v6758_v26  ;;  %v6738_v0 = vpack.c.bf16 %v4754_v63, %v4753_v62  ;;  %v4756_v2 = vld [vmem:[%s9335_s1 + $0xd8] sm:$0xff]  ;;  %v4757_v4 = vld [vmem:[%s9335_s1 + $0xe0] sm:$0xff]  ;;  %v4758_v5 = vld [vmem:[%s9335_s1 + $0xe8] sm:$0xff]  ;;  %p7584_p2 = por %p7583_p1, %p7582_p0 }
  0x20   : > { %6763 = vmatprep.subr.bf16.mxu1 %v6762_v32  ;;  %v6742_v3 = vpack.c.bf16 %v4756_v2, %v4755_v1  ;;  %v6746_v6 = vpack.c.bf16 %v4758_v5, %v4757_v4  ;;  %v4773_v7 = vld [vmem:[%s9335_s1 + $0x140] sm:$0xff]  ;;  %v4774_v8 = vld [vmem:[%s9335_s1 + $0x148] sm:$0xff]  ;;  %v4775_v10 = vld [vmem:[%s9335_s1 + $0x150] sm:$0xff] }
  0x21   : > { %6705 = vmatpush3.bf16.msra.mxu0 %v6702_v12  ;;  %v6770_v9 = vpack.c.bf16 %v4774_v8, %v4773_v7  ;;  %v4776_v12 = vld [vmem:[%s9335_s1 + $0x158] sm:$0xff]  ;;  %v4777_v14 = vld [vmem:[%s9335_s1 + $0x160] sm:$0xff]  ;;  %v4778_v15 = vld [vmem:[%s9335_s1 + $0x168] sm:$0xff]  ;;  %p7585_p3 = pnand %p7584_p2, %p7578_p13 }
  0x22   : > { %6707 = vmatprep.subr.bf16.mxu0 %v6706_v23  ;;  %v6774_v13 = vpack.c.bf16 %v4776_v12, %v4775_v10  ;;  %v6778_v16 = vpack.c.bf16 %v4778_v15, %v4777_v14  ;;  %v4779_v17 = vld [vmem:[%s9335_s1 + $0x170] sm:$0xff]  ;;  %v4780_v18 = vld [vmem:[%s9335_s1 + $0x178] sm:$0xff]  ;;  %v4781_v20 = vld [vmem:[%s9335_s1 + $0x180] sm:$0xff] }
  0x23   : > { %6765 = vmatpush3.bf16.msra.mxu1 %v6762_v32  ;;  %v6782_v19 = vpack.c.bf16 %v4780_v18, %v4779_v17  ;;  %v4782_v21 = vld [vmem:[%s9335_s1 + $0x188] sm:$0xff]  ;;  %v929_v24 = vld [vmem:[%s9337_s3 + $0x38] sm:$0xff]  ;;  %v1091_v26 = vld [vmem:[%s9338_s4] sm:$0xff] }
  0x24   : > { %6767 = vmatprep.subr.bf16.mxu1 %v6766_v39  ;;  %v6786_v22 = vpack.c.bf16 %v4782_v21, %v4781_v20  ;;  %v1092_v27 = vld [vmem:[%s9338_s4 + $0x8] sm:$0xff]  ;;  %v1093_v34 = vld [vmem:[%s9338_s4 + $0x10] sm:$0xff]  ;;  %v1095_v40 = vld [vmem:[%s9338_s4 + $0x20] sm:$0xff] }
  0x25   : > { %6709 = vmatpush3.bf16.msra.mxu0 %v6706_v23  ;;  %v928_v23 = vld [vmem:[%s9337_s3 + $0x30] sm:$0xff]  ;;  %v6806_v28 = vpack.c.bf16 %v1092_v27, %v1091_v26  ;;  %v1096_v41 = vld [vmem:[%s9338_s4 + $0x28] sm:$0xff]  ;;  %v1098_v46 = vld [vmem:[%s9338_s4 + $0x38] sm:$0xff] }
  0x26   : > { %6711 = vmatprep.subr.bf16.mxu0 %v6710_v29  ;;  %v6802_v25 = vpack.c.bf16 %v929_v24, %v928_v23  ;;  %v6814_v43 = vpack.c.bf16 %v1096_v41, %v1095_v40  ;;  %v1100_v49 = vld [vmem:[%s9338_s4 + $0x48] sm:$0xff]  ;;  %v1102_v52 = vld [vmem:[%s9338_s4 + $0x58] sm:$0xff]  ;;  %v1239_v21 = vld [vmem:[%s9339_s5 + $0x10] sm:$0xff] }
  0x27   : > { %6769 = vmatpush3.bf16.msra.mxu1 %v6766_v39  ;;  %v1104_v59 = vld [vmem:[%s9338_s4 + $0x68] sm:$0xff]  ;;  %v1106_v17 = vld [vmem:[%s9338_s4 + $0x78] sm:$0xff] }
  0x28   : > { %5724 = vmatmul.mubr.msk.f32.vlgmr.msra.gmra.mrb[0].mxu0 %vm486_vm0, %v7851_v35  ;;  %6791 = vmatprep.subr.bf16.mxu1 %v6790_v45  ;;  %v1238_v20 = vld [vmem:[%s9339_s5 + $0x8] sm:$0xff]  ;;  %v1240_v23 = vld [vmem:[%s9339_s5 + $0x18] sm:$0xff] }
  0x29   : > { %6713 = vmatpush3.bf16.msra.mxu0 %v6710_v29  ;;  %5746 = vmatprep.mubr.msk.f32.mxu0 %vm486_vm0, %v7796_v11  ;;  %v7980_v29 = vld [vmem:[%s9340_s6] ss:$0 sm:$0xff]  ;;  %v6842_v24 = vpack.c.bf16 %v1240_v23, %v1239_v21  ;;  %v1242_v26 = vld [vmem:[%s9339_s5 + $0x28] sm:$0xff] }
  0x2a   : > { %6715 = vmatprep.subr.bf16.mxu0 %v6714_v36  ;;  %5793 = vmatmul.mubr.msk.f32.vlgmr.msra.gmra.mrb[0].mxu1 %vm486_vm0, %v7851_v35 }
  0x2b   : > { %6793 = vmatpush3.bf16.msra.mxu1 %v6790_v45  ;;  %v1097_v45 = vld [vmem:[%s9338_s4 + $0x30] sm:$0xff] }
  0x2c   : > { %6795 = vmatprep.subr.bf16.mxu1 %v6794_v51  ;;  %v6818_v47 = vpack.c.bf16 %v1098_v46, %v1097_v45 }
  0x2d   : > { %6717 = vmatpush3.bf16.msra.mxu0 %v6714_v36  ;;  %v1094_v36 = vld [vmem:[%s9338_s4 + $0x18] sm:$0xff] }
  0x2e   : > { %6719 = vmatprep.subr.bf16.mxu0 %v6718_v42  ;;  %v6810_v39 = vpack.c.bf16 %v1094_v36, %v1093_v34 }
  0x2f   : > { %6797 = vmatpush3.bf16.msra.mxu1 %v6794_v51  ;;  %v1101_v51 = vld [vmem:[%s9338_s4 + $0x50] sm:$0xff] }
  0x30   : > { %6799 = vmatprep.subr.bf16.mxu1 %v6798_v57  ;;  %v6826_v56 = vpack.c.bf16 %v1102_v52, %v1101_v51 }
  0x31   : > { %6721 = vmatpush3.bf16.msra.mxu0 %v6718_v42 }
  0x32   : > { %6723 = vmatprep.subr.bf16.mxu0 %v6722_v48 }
  0x33   : > { %6801 = vmatpush3.bf16.msra.mxu1 %v6798_v57 }
  0x34   : > { %6803 = vmatprep.subr.bf16.mxu1 %v6802_v25 }
  0x35   : > { %6725 = vmatpush3.bf16.msra.mxu0 %v6722_v48  ;;  %v1099_v48 = vld [vmem:[%s9338_s4 + $0x40] sm:$0xff] }
  0x36   : > { %6727 = vmatprep.subr.bf16.mxu0 %v6726_v54  ;;  %v6822_v50 = vpack.c.bf16 %v1100_v49, %v1099_v48 }
  0x37   : > { %6805 = vmatpush3.bf16.msra.mxu1 %v6802_v25  ;;  %v1241_v25 = vld [vmem:[%s9339_s5 + $0x20] sm:$0xff] }
  0x38   : > { %6807 = vmatprep.subr.bf16.mxu1 %v6806_v28  ;;  %v6846_v27 = vpack.c.bf16 %v1242_v26, %v1241_v25 }
  0x39   : > { %6729 = vmatpush3.bf16.msra.mxu0 %v6726_v54 }
  0x3a   : > { %6731 = vmatprep.subr.bf16.mxu0 %v6730_v58 }
  0x3c   : > { %5747 = vmatmul.mubr.msk.f32.vlgmr.msra.gmra.mrb[2].mxu0 %vm486_vm0, %v7851_v35 }
  0x3d   : > { %6733 = vmatpush3.bf16.msra.mxu0 %v6730_v58  ;;  %5769 = vmatprep.mubr.msk.f32.mxu0 %vm486_vm0, %v7796_v11  ;;  %v1103_v58 = vld [vmem:[%s9338_s4 + $0x60] sm:$0xff] }
  0x3e   : > { %6735 = vmatprep.subr.bf16.mxu0 %v6734_v61  ;;  %v6830_v62 = vpack.c.bf16 %v1104_v59, %v1103_v58 }
  0x41   : > { %6737 = vmatpush3.bf16.msra.mxu0 %v6734_v61 }
  0x42   : > { %6739 = vmatprep.subr.bf16.mxu0 %v6738_v0 }
  0x45   : > { %6741 = vmatpush3.bf16.msra.mxu0 %v6738_v0 }
  0x46   : > { %6743 = vmatprep.subr.bf16.mxu0 %v6742_v3 }
  0x49   : > { %6745 = vmatpush3.bf16.msra.mxu0 %v6742_v3 }
  0x4a   : > { %6747 = vmatprep.subr.bf16.mxu0 %v6746_v6 }
  0x4d   : > { %6749 = vmatpush3.bf16.msra.mxu0 %v6746_v6 }
  0x4e   : > { %6771 = vmatprep.subr.bf16.mxu0 %v6770_v9 }
  0x50   : > { %5770 = vmatmul.mubr.msk.f32.vlgmr.msra.gmra.mrb[4].mxu0 %vm486_vm0, %v7851_v35 }
  0x51   : > { %6773 = vmatpush3.bf16.msra.mxu0 %v6770_v9  ;;  %5815 = vmatprep.mubr.msk.f32.mxu0 %vm486_vm0, %v7796_v11 }
  0x52   : > { %6775 = vmatprep.subr.bf16.mxu0 %v6774_v13 }
  0x55   : > { %6777 = vmatpush3.bf16.msra.mxu0 %v6774_v13 }
  0x56   : > { %6779 = vmatprep.subr.bf16.mxu0 %v6778_v16 }
  0x59   : > { %6781 = vmatpush3.bf16.msra.mxu0 %v6778_v16  ;;  %v1105_v16 = vld [vmem:[%s9338_s4 + $0x70] sm:$0xff] }
  0x5a   : > { %6783 = vmatprep.subr.bf16.mxu0 %v6782_v19  ;;  %v6834_v18 = vpack.c.bf16 %v1106_v17, %v1105_v16  ;;  %v4814_v16 = vld [vmem:[%s9335_s1 + $0x2b0] sm:$0xff]  ;;  %v4815_v17 = vld [vmem:[%s9335_s1 + $0x2b8] sm:$0xff] }
  0x5d   : > { %6785 = vmatpush3.bf16.msra.mxu0 %v6782_v19  ;;  %v1237_v19 = vld [vmem:[%s9339_s5] sm:$0xff] }
  0x5e   : > { %6787 = vmatprep.subr.bf16.mxu0 %v6786_v22 }
  0x61   : > { %6789 = vmatpush3.bf16.msra.mxu0 %v6786_v22  ;;  %v6838_v22 = vpack.c.bf16 %v1238_v20, %v1237_v19  ;;  %v4816_v19 = vld [vmem:[%s9335_s1 + $0x2c0] sm:$0xff]  ;;  %v4817_v20 = vld [vmem:[%s9335_s1 + $0x2c8] sm:$0xff] }
  0x62   : > { %v6870_v21 = vpack.c.bf16 %v4817_v20, %v4816_v19 }
  0x63   : > { %6839 = vmatprep.subr.bf16.mxu0 %v6838_v22 }
  0x64   : > { %5816 = vmatmul.mubr.msk.f32.vlgmr.msra.gmra.mrb[6].mxu0 %vm486_vm0, %v7851_v35 }
  0x65   : > { %6841 = vmatpush3.bf16.msra.mxu0 %v6838_v22 }
  0x66   : > { %6843 = vmatprep.subr.bf16.mxu0 %v6842_v24 }
  0x69   : > { %6845 = vmatpush3.bf16.msra.mxu0 %v6842_v24 }
  0x6a   : > { %6847 = vmatprep.subr.bf16.mxu0 %v6846_v27 }
  0x6d   : > { %6849 = vmatpush3.bf16.msra.mxu0 %v6846_v27 }
  0xfb   : > { %v5725_v30 = vpop.f32.mrb[0].mxu0 }
  0xfc   : > { %v565_v31 = vadd.f32 %v5725_v30, %v7980_v29  ;;  %v559_v32 = vpop.f32.mrb[1].mxu0 }
  0xfd   : > { %v560_v33 = vadd.f32 %v7980_v29, %v559_v32  ;;  %v5794_v42 = vpop.f32.mrb[0].mxu1 }
  0xfe   : > { %v913_v37 = vmax.f32 %v565_v31, 0.0  ;;  %v817_v44 = vpop.f32.mrb[1].mxu1  ;;  %v823_v5 = vadd.f32 %v5794_v42, %v7980_v29 }
  0xff   : > { %v912_v38 = vmax.f32 %v560_v33, 0.0  ;;  %v818_v0 = vadd.f32 %v7980_v29, %v817_v44 }
 0x100   : > { %v919_v8 = vmax.f32 %v823_v5, 0.0 }
 0x101   : > { %5834 = vmatprep.mubr.msk.f32.mxu1 %vm935_vm1, %v912_v38  ;;  %v918_v7 = vmax.f32 %v818_v0, 0.0  ;;  %v4809_v0 = vld [vmem:[%s9335_s1 + $0x288] sm:$0xff] }
 0x102   : > { %5835 = vmatmul.mubr.msk.f32.vlgmr.msra.gmra.mrb[2].mxu1 %vm935_vm1, %v913_v37 }
 0x103   : > { %6809 = vmatpush3.bf16.msra.mxu1 %v6806_v28  ;;  %v4785_v28 = vld [vmem:[%s9341_s7] ss:$0 sm:$0xff] }
 0x104   : > { %6811 = vmatprep.subr.bf16.mxu1 %v6810_v39 }
 0x107   : > { %6813 = vmatpush3.bf16.msra.mxu1 %v6810_v39 }
 0x108   : > { %6815 = vmatprep.subr.bf16.mxu1 %v6814_v43 }
 0x10b   : > { %6817 = vmatpush3.bf16.msra.mxu1 %v6814_v43 }
 0x10c   : > { %6819 = vmatprep.subr.bf16.mxu1 %v6818_v47 }
 0x10f   : > { %v5748_v53 = vpop.f32.mrb[2].mxu0  ;;  %6821 = vmatpush3.bf16.msra.mxu1 %v6818_v47 }
 0x110   : > { %v651_v54 = vadd.f32 %v5748_v53, %v7980_v29  ;;  %v645_v55 = vpop.f32.mrb[3].mxu0  ;;  %6823 = vmatprep.subr.bf16.mxu1 %v6822_v50 }
 0x111   : > { %v646_v57 = vadd.f32 %v7980_v29, %v645_v55 }
 0x112   : > { %v915_v60 = vmax.f32 %v651_v54, 0.0 }
 0x113   : > { %v914_v61 = vmax.f32 %v646_v57, 0.0  ;;  %6825 = vmatpush3.bf16.msra.mxu1 %v6822_v50 }
 0x114   : > { %6827 = vmatprep.subr.bf16.mxu1 %v6826_v56 }
 0x115   : > { %5837 = vmatprep.mubr.msk.f32.mxu1 %vm935_vm1, %v914_v61  ;;  %v1244_v61 = vld [vmem:[%s9339_s5 + $0x38] sm:$0xff] }
 0x116   : > { %5838 = vmatmul.mubr.msk.f32.gmra.mrb[4].mxu1 %vm935_vm1, %v915_v60  ;;  %v1243_v60 = vld [vmem:[%s9339_s5 + $0x30] sm:$0xff] }
 0x117   : > { %6829 = vmatpush3.bf16.msra.mxu1 %v6826_v56 }
 0x118   : > { %6831 = vmatprep.subr.bf16.mxu1 %v6830_v62 }
 0x11b   : > { %6833 = vmatpush3.bf16.msra.mxu1 %v6830_v62  ;;  %v6850_v62 = vpack.c.bf16 %v1244_v61, %v1243_v60  ;;  %v4833_v60 = vld [vmem:[%s9338_s4 + $0x188] sm:$0xff]  ;;  %v4834_v61 = vld [vmem:[%s9338_s4 + $0x190] sm:$0xff] }
 0x11c   : > { %6835 = vmatprep.subr.bf16.mxu1 %v6834_v18 }
 0x11d   : > { %6851 = vmatprep.subr.bf16.mxu0 %v6850_v62 }
 0x11e   : > { %6853 = vmatpush3.bf16.msra.mxu0 %v6850_v62 }
 0x11f   : > { %6837 = vmatpush3.bf16.msra.mxu1 %v6834_v18  ;;  %v6866_v18 = vpack.c.bf16 %v4815_v17, %v4814_v16  ;;  %v8187_v17 = vld [vmem:[%s9343_s9] ss:$0 sm:$0xff] }
 0x123   : > { %v5771_v63 = vpop.f32.mrb[4].mxu0 }
 0x124   : > { %v737_v1 = vadd.f32 %v5771_v63, %v7980_v29  ;;  %v731_v2 = vpop.f32.mrb[5].mxu0  ;;  %v4808_v63 = vld [vmem:[%s9335_s1 + $0x280] sm:$0xff] }
 0x125   : > { %v732_v3 = vadd.f32 %v7980_v29, %v731_v2  ;;  %v4796_v2 = vld [vmem:[%s9342_s8] ss:$0 sm:$0xff] }
 0x126   : > { %v917_v4 = vmax.f32 %v737_v1, 0.0  ;;  %v6854_v1 = vpack.c.bf16 %v4809_v0, %v4808_v63  ;;  %v4835_v63 = vld [vmem:[%s9338_s4 + $0x198] sm:$0xff] }
 0x127   : > { %v916_v6 = vmax.f32 %v732_v3, 0.0  ;;  %v6894_v0 = vpack.c.bf16 %v4835_v63, %v4834_v61 }
 0x128   : > { %6855 = vmatprep.subr.bf16.mxu0 %v6854_v1 }
 0x129   : > { %5840 = vmatprep.mubr.msk.f32.mxu1 %vm935_vm1, %v916_v6 }
 0x12a   : > { %5841 = vmatmul.mubr.msk.f32.gmra.mrb[6].mxu1 %vm935_vm1, %v917_v4 }
 0x12b   : > { %5843 = vmatprep.mubr.msk.f32.mxu1 %vm935_vm1, %v918_v7  ;;  %v4810_v7 = vld [vmem:[%s9335_s1 + $0x290] sm:$0xff] }
 0x12e   : > { %5844 = vmatmul.mubr.msk.f32.gmra.mrb[8].mxu1 %vm935_vm1, %v919_v8  ;;  %v4811_v8 = vld [vmem:[%s9335_s1 + $0x298] sm:$0xff] }
 0x137   : > { %v5817_v9 = vpop.f32.mrb[6].mxu0 }
 0x138   : > { %v909_v10 = vadd.f32 %v5817_v9, %v7980_v29  ;;  %v903_v12 = vpop.f32.mrb[7].mxu0 }
 0x139   : > { %v904_v13 = vadd.f32 %v7980_v29, %v903_v12  ;;  %v6858_v12 = vpack.c.bf16 %v4811_v8, %v4810_v7  ;;  %v4840_v7 = vld [vmem:[%s9338_s4 + $0x1c0] sm:$0xff]  ;;  %v4841_v8 = vld [vmem:[%s9338_s4 + $0x1c8] sm:$0xff] }
 0x13a   : > { %v921_v15 = vmax.f32 %v909_v10, 0.0 }
 0x13b   : > { %v920_v14 = vmax.f32 %v904_v13, 0.0  ;;  %v4812_v13 = vld [vmem:[%s9335_s1 + $0x2a0] sm:$0xff] }
 0x13d   : > { %5846 = vmatprep.mubr.msk.f32.mxu1 %vm935_vm1, %v920_v14  ;;  %v4813_v14 = vld [vmem:[%s9335_s1 + $0x2a8] sm:$0xff] }
 0x13e   : > { %5847 = vmatmul.mubr.msk.f32.gmra.mrb[10].mxu1 %vm935_vm1, %v921_v15  ;;  %v6862_v15 = vpack.c.bf16 %v4813_v14, %v4812_v13  ;;  %v4844_v14 = vld [vmem:[%s9338_s4 + $0x1e0] sm:$0xff] }
 0x1d5   : > { %v5836_v29 = vpop.f32.mrb[2].mxu1 }
 0x1d6   : > { %v1038_v30 = vadd.f32 %v5836_v29, %v4785_v28  ;;  %v1032_v31 = vpop.f32.mrb[3].mxu1 }
 0x1d7   : > { %v1033_v32 = vadd.f32 %v4785_v28, %v1032_v31 }
 0x1d8   : > { %v1082_v34 = vmax.f32 %v1038_v30, 0.0 }
 0x1d9   : > { %v1081_v33 = vmax.f32 %v1033_v32, 0.0 }
 0x1db   : > { %5881 = vmatprep.mubr.f32.mxu1 %v1081_v33 }
 0x1dc   : > { %5882 = vmatmul.mubr.f32.vlgmr.msra.gmra.mrb[12].mxu1 %v1082_v34 }
 0x1e9   : > { %v5839_v36 = vpop.f32.mrb[4].mxu1 }
 0x1ea   : > { %v1048_v37 = vadd.f32 %v5839_v36, %v4785_v28  ;;  %v1042_v38 = vpop.f32.mrb[5].mxu1 }
 0x1eb   : > { %v1043_v39 = vadd.f32 %v4785_v28, %v1042_v38 }
 0x1ec   : > { %v1084_v41 = vmax.f32 %v1048_v37, 0.0 }
 0x1ed   : > { %v1083_v40 = vmax.f32 %v1043_v39, 0.0 }
 0x1ef   : > { %5884 = vmatprep.mubr.f32.mxu1 %v1083_v40 }
 0x1f0   : > { %5885 = vmatmul.mubr.f32.gmra.mrb[14].mxu1 %v1084_v41 }
 0x1fd   : > { %v5842_v42 = vpop.f32.mrb[6].mxu1 }
 0x1fe   : > { %v1058_v43 = vadd.f32 %v5842_v42, %v4785_v28  ;;  %v1052_v44 = vpop.f32.mrb[7].mxu1 }
 0x1ff   : > { %v1053_v45 = vadd.f32 %v4785_v28, %v1052_v44 }
 0x200   : > { %v1086_v48 = vmax.f32 %v1058_v43, 0.0 }
 0x201   : > { %v1085_v46 = vmax.f32 %v1053_v45, 0.0  ;;  %v5845_v47 = vpop.f32.mrb[8].mxu1 }
 0x202   : > { %v1068_v49 = vadd.f32 %v5845_v47, %v4785_v28  ;;  %v1062_v50 = vpop.f32.mrb[9].mxu1  ;;  %v4821_v47 = vld [vmem:[%s9337_s3 + $0xc0] sm:$0xff] }
 0x203   : > { %5887 = vmatprep.mubr.f32.mxu1 %v1085_v46  ;;  %v1063_v51 = vadd.f32 %v4785_v28, %v1062_v50 }
 0x204   : > { %5888 = vmatmul.mubr.f32.gmra.mrb[16].mxu1 %v1086_v48  ;;  %v1088_v52 = vmax.f32 %v1068_v49, 0.0  ;;  %v4822_v48 = vld [vmem:[%s9337_s3 + $0xc8] sm:$0xff]  ;;  %v4823_v49 = vld [vmem:[%s9337_s3 + $0xd0] sm:$0xff] }
 0x205   : > { %v1087_v53 = vmax.f32 %v1063_v51, 0.0  ;;  %v6874_v50 = vpack.c.bf16 %v4822_v48, %v4821_v47  ;;  %v4824_v51 = vld [vmem:[%s9337_s3 + $0xd8] sm:$0xff]  ;;  %v4870_v47 = vld [vmem:[%s9336_s2 + $0x80] sm:$0xff]  ;;  %v4871_v48 = vld [vmem:[%s9336_s2 + $0x88] sm:$0xff] }
 0x207   : > { %5890 = vmatprep.mubr.f32.mxu1 %v1087_v53  ;;  %6875 = vmatprep.subr.bf16.mxu1 %v6874_v50  ;;  %v4825_v53 = vld [vmem:[%s9337_s3 + $0xe0] sm:$0xff] }
 0x208   : > { %5891 = vmatmul.mubr.f32.gmra.mrb[18].mxu1 %v1088_v52  ;;  %v6878_v52 = vpack.c.bf16 %v4824_v51, %v4823_v49  ;;  %v8232_v49 = vpack.c.bf16 %v4871_v48, %v4870_v47  ;;  %v4850_v51 = vld [vmem:[%s9339_s5 + $0xc8] sm:$0xff] }
 0x209   : > { %6877 = vmatpush3.bf16.msra.mxu1 %v6874_v50  ;;  %v4849_v50 = vld [vmem:[%s9339_s5 + $0xc0] sm:$0xff] }
 0x20a   : > { %6879 = vmatprep.subr.bf16.mxu1 %v6878_v52 }
 0x20d   : > { %6881 = vmatpush3.bf16.msra.mxu1 %v6878_v52  ;;  %v4851_v52 = vld [vmem:[%s9339_s5 + $0xd0] sm:$0xff] }
 0x211   : > { %v5848_v54 = vpop.f32.mrb[10].mxu1 }
 0x212   : > { %v1078_v55 = vadd.f32 %v5848_v54, %v4785_v28  ;;  %v1072_v56 = vpop.f32.mrb[11].mxu1  ;;  %v4826_v54 = vld [vmem:[%s9337_s3 + $0xe8] sm:$0xff] }
 0x213   : > { %v1073_v57 = vadd.f32 %v4785_v28, %v1072_v56  ;;  %v4827_v56 = vld [vmem:[%s9337_s3 + $0xf0] sm:$0xff] }
 0x214   : > { %v1090_v59 = vmax.f32 %v1078_v55, 0.0  ;;  %v6882_v55 = vpack.c.bf16 %v4826_v54, %v4825_v53  ;;  %v6922_v53 = vpack.c.bf16 %v4850_v51, %v4849_v50  ;;  %v4852_v54 = vld [vmem:[%s9339_s5 + $0xd8] sm:$0xff]  ;;  %v4860_v50 = vld [vmem:[%s9335_s1 + $0x190] sm:$0xff] }
 0x215   : > { %v1089_v58 = vmax.f32 %v1073_v57, 0.0  ;;  %v4828_v57 = vld [vmem:[%s9337_s3 + $0xf8] sm:$0xff] }
 0x216   : > { %6883 = vmatprep.subr.bf16.mxu1 %v6882_v55  ;;  %v4861_v51 = vld [vmem:[%s9335_s1 + $0x198] sm:$0xff] }
 0x217   : > { %5893 = vmatprep.mubr.f32.mxu1 %v1089_v58  ;;  %6885 = vmatpush3.bf16.msra.mxu1 %v6882_v55  ;;  %v6886_v58 = vpack.c.bf16 %v4828_v57, %v4827_v56  ;;  %v6926_v55 = vpack.c.bf16 %v4852_v54, %v4851_v52  ;;  %v4853_v56 = vld [vmem:[%s9339_s5 + $0xe0] sm:$0xff]  ;;  %v4854_v57 = vld [vmem:[%s9339_s5 + $0xe8] sm:$0xff] }
 0x218   : > { %5894 = vmatmul.mubr.f32.gmra.mrb[20].mxu1 %v1090_v59  ;;  %v4832_v59 = vld [vmem:[%s9338_s4 + $0x180] sm:$0xff] }
 0x219   : > { %6887 = vmatprep.subr.bf16.mxu1 %v6886_v58  ;;  %v6890_v62 = vpack.c.bf16 %v4833_v60, %v4832_v59  ;;  %v4829_v59 = vld [vmem:[%s9341_s7 + $0x3] ss:$0 sm:$0xff] }
 0x21a   : > { %v4862_v52 = vld [vmem:[%s9335_s1 + $0x1a0] sm:$0xff] }
 0x21b   : > { %6889 = vmatpush3.bf16.msra.mxu1 %v6886_v58  ;;  %v6930_v58 = vpack.c.bf16 %v4854_v57, %v4853_v56  ;;  %v4864_v56 = vld [vmem:[%s9335_s1 + $0x1b0] sm:$0xff]  ;;  %v4865_v57 = vld [vmem:[%s9335_s1 + $0x1b8] sm:$0xff] }
 0x21c   : > { %6923 = vmatprep.subr.bf16.mxu1 %v6922_v53 }
 0x2af   : > { %v5883_v3 = vpop.f32.mrb[12].mxu1 }
 0x2b0   : > { %v1184_v4 = vadd.f32 %v5883_v3, %v4796_v2  ;;  %v1178_v5 = vpop.f32.mrb[13].mxu1 }
 0x2b1   : > { %v1179_v6 = vadd.f32 %v4796_v2, %v1178_v5  ;;  %v4839_v5 = vld [vmem:[%s9338_s4 + $0x1b8] sm:$0xff] }
 0x2b2   : > { %v1228_v10 = vmax.f32 %v1184_v4, 0.0  ;;  %v4838_v4 = vld [vmem:[%s9338_s4 + $0x1b0] sm:$0xff] }
 0x2b3   : > { %v1227_v9 = vmax.f32 %v1179_v6, 0.0  ;;  %v6902_v6 = vpack.c.bf16 %v4839_v5, %v4838_v4 }
 0x2b5   : > { %5912 = vmatprep.mubr.msk.f32.mxu0 %vm935_vm1, %v1227_v9  ;;  %v6906_v9 = vpack.c.bf16 %v4841_v8, %v4840_v7  ;;  %v4874_v7 = vld [vmem:[%s9336_s2 + $0xa0] sm:$0xff]  ;;  %v4875_v8 = vld [vmem:[%s9336_s2 + $0xa8] sm:$0xff] }
 0x2b6   : > { %5913 = vmatmul.mubr.msk.f32.vlgmr.msra.gmra.mrb[8].mxu0 %vm935_vm1, %v1228_v10  ;;  %v4842_v10 = vld [vmem:[%s9338_s4 + $0x1d0] sm:$0xff] }
 0x2b7   : > { %6857 = vmatpush3.bf16.msra.mxu0 %v6854_v1  ;;  %v4836_v1 = vld [vmem:[%s9338_s4 + $0x1a0] sm:$0xff] }
 0x2b8   : > { %6859 = vmatprep.subr.bf16.mxu0 %v6858_v12 }
 0x2bb   : > { %6861 = vmatpush3.bf16.msra.mxu0 %v6858_v12  ;;  %v4843_v12 = vld [vmem:[%s9338_s4 + $0x1d8] sm:$0xff] }
 0x2bc   : > { %6863 = vmatprep.subr.bf16.mxu0 %v6862_v15  ;;  %v6910_v13 = vpack.c.bf16 %v4843_v12, %v4842_v10  ;;  %v4876_v10 = vld [vmem:[%s9336_s2 + $0xb0] sm:$0xff]  ;;  %v4877_v12 = vld [vmem:[%s9336_s2 + $0xb8] sm:$0xff] }
 0x2bf   : > { %6865 = vmatpush3.bf16.msra.mxu0 %v6862_v15  ;;  %v4845_v15 = vld [vmem:[%s9338_s4 + $0x1e8] sm:$0xff] }
 0x2c0   : > { %6867 = vmatprep.subr.bf16.mxu0 %v6866_v18  ;;  %v6914_v16 = vpack.c.bf16 %v4845_v15, %v4844_v14  ;;  %v4883_v14 = vld [vmem:[%s9335_s1 + $0x1e0] sm:$0xff]  ;;  %v4884_v15 = vld [vmem:[%s9335_s1 + $0x1e8] sm:$0xff] }
 0x2c3   : > { %v5886_v22 = vpop.f32.mrb[14].mxu1  ;;  %6869 = vmatpush3.bf16.msra.mxu0 %v6866_v18 }
 0x2c4   : > { %v1194_v23 = vadd.f32 %v5886_v22, %v4796_v2  ;;  %v1188_v24 = vpop.f32.mrb[15].mxu1  ;;  %6871 = vmatprep.subr.bf16.mxu0 %v6870_v21 }
 0x2c5   : > { %v1189_v25 = vadd.f32 %v4796_v2, %v1188_v24 }
 0x2c6   : > { %v1230_v27 = vmax.f32 %v1194_v23, 0.0 }
 0x2c7   : > { %v1229_v26 = vmax.f32 %v1189_v25, 0.0  ;;  %6873 = vmatpush3.bf16.msra.mxu0 %v6870_v21 }
 0x2c8   : > { %6891 = vmatprep.subr.bf16.mxu0 %v6890_v62 }
 0x2c9   : > { %5915 = vmatprep.mubr.msk.f32.mxu0 %vm935_vm1, %v1229_v26 }
 0x2ca   : > { %5916 = vmatmul.mubr.msk.f32.gmra.mrb[10].mxu0 %vm935_vm1, %v1230_v27 }
 0x2d7   : > { %v5889_v28 = vpop.f32.mrb[16].mxu1 }
 0x2d8   : > { %v1204_v29 = vadd.f32 %v5889_v28, %v4796_v2  ;;  %v1198_v30 = vpop.f32.mrb[17].mxu1 }
 0x2d9   : > { %v1199_v31 = vadd.f32 %v4796_v2, %v1198_v30 }
 0x2da   : > { %v1232_v34 = vmax.f32 %v1204_v29, 0.0 }
 0x2db   : > { %v1231_v32 = vmax.f32 %v1199_v31, 0.0  ;;  %v5892_v33 = vpop.f32.mrb[18].mxu1 }
 0x2dc   : > { %v1214_v36 = vadd.f32 %v5892_v33, %v4796_v2  ;;  %v1208_v37 = vpop.f32.mrb[19].mxu1 }
 0x2dd   : > { %5918 = vmatprep.mubr.msk.f32.mxu0 %vm935_vm1, %v1231_v32  ;;  %v1209_v38 = vadd.f32 %v4796_v2, %v1208_v37  ;;  %v4818_v37 = vld [vmem:[%s9340_s6 + $0x3] ss:$0 sm:$0xff] }
 0x2de   : > { %5919 = vmatmul.mubr.msk.f32.gmra.mrb[12].mxu0 %vm935_vm1, %v1232_v34  ;;  %v1234_v39 = vmax.f32 %v1214_v36, 0.0 }
 0x2df   : > { %v1233_v40 = vmax.f32 %v1209_v38, 0.0 }
 0x2e1   : > { %5921 = vmatprep.mubr.msk.f32.mxu0 %vm935_vm1, %v1233_v40 }
 0x2e2   : > { %5922 = vmatmul.mubr.msk.f32.gmra.mrb[14].mxu0 %vm935_vm1, %v1234_v39 }
 0x2eb   : > { %v5895_v41 = vpop.f32.mrb[20].mxu1 }
 0x2ec   : > { %v1224_v42 = vadd.f32 %v5895_v41, %v4796_v2  ;;  %v1218_v43 = vpop.f32.mrb[21].mxu1 }
 0x2ed   : > { %v1219_v44 = vadd.f32 %v4796_v2, %v1218_v43  ;;  %v4837_v2 = vld [vmem:[%s9338_s4 + $0x1a8] sm:$0xff] }
 0x2ee   : > { %v1236_v46 = vmax.f32 %v1224_v42, 0.0  ;;  %v6898_v3 = vpack.c.bf16 %v4837_v2, %v4836_v1  ;;  %v4872_v1 = vld [vmem:[%s9336_s2 + $0x90] sm:$0xff]  ;;  %v4873_v2 = vld [vmem:[%s9336_s2 + $0x98] sm:$0xff] }
 0x2ef   : > { %v1235_v45 = vmax.f32 %v1219_v44, 0.0  ;;  %v4846_v44 = vld [vmem:[%s9338_s4 + $0x1f0] sm:$0xff]  ;;  %v8263_v5 = vpack.c.bf16 %v4873_v2, %v4872_v1 }
 0x2f1   : > { %5924 = vmatprep.mubr.msk.f32.mxu0 %vm935_vm1, %v1235_v45  ;;  %v4847_v45 = vld [vmem:[%s9338_s4 + $0x1f8] sm:$0xff] }
 0x2f2   : > { %5925 = vmatmul.mubr.msk.f32.gmra.mrb[16].mxu0 %vm935_vm1, %v1236_v46  ;;  %v6918_v46 = vpack.c.bf16 %v4847_v45, %v4846_v44 }
 0x2f3   : > { %5947 = vmatprep.mubr.msk.f32.mxu0 %vm486_vm0, %v7796_v11 }
 0x2f6   : > { %5948 = vmatmul.mubr.msk.f32.vlgmr.msra.gmra.mrb[18].mxu0 %vm486_vm0, %v7851_v35 }
 0x2f7   : > { %6893 = vmatpush3.bf16.msra.mxu0 %v6890_v62 }
 0x2f8   : > { %6895 = vmatprep.subr.bf16.mxu0 %v6894_v0 }
 0x2fb   : > { %6897 = vmatpush3.bf16.msra.mxu0 %v6894_v0 }
 0x2fc   : > { %6899 = vmatprep.subr.bf16.mxu0 %v6898_v3 }
 0x2ff   : > { %6901 = vmatpush3.bf16.msra.mxu0 %v6898_v3 }
 0x300   : > { %6903 = vmatprep.subr.bf16.mxu0 %v6902_v6 }
 0x303   : > { %6905 = vmatpush3.bf16.msra.mxu0 %v6902_v6 }
 0x304   : > { %6907 = vmatprep.subr.bf16.mxu0 %v6906_v9 }
 0x307   : > { %6909 = vmatpush3.bf16.msra.mxu0 %v6906_v9  ;;  %v6946_v9 = vpack.c.bf16 %v4875_v8, %v4874_v7  ;;  %v4899_v7 = vld [vmem:[%s9337_s3 + $0x50] sm:$0xff] }
 0x308   : > { %6911 = vmatprep.subr.bf16.mxu0 %v6910_v13 }
 0x30b   : > { %6913 = vmatpush3.bf16.msra.mxu0 %v6910_v13  ;;  %v6950_v13 = vpack.c.bf16 %v4877_v12, %v4876_v10  ;;  %v4901_v12 = vld [vmem:[%s9337_s3 + $0x60] sm:$0xff] }
 0x30c   : > { %6915 = vmatprep.subr.bf16.mxu0 %v6914_v16 }
 0x30f   : > { %6917 = vmatpush3.bf16.msra.mxu0 %v6914_v16 }
 0x310   : > { %6919 = vmatprep.subr.bf16.mxu0 %v6918_v46 }
 0x313   : > { %6921 = vmatpush3.bf16.msra.mxu0 %v6918_v46 }
 0x314   : > { %6975 = vmatprep.subr.bf16.mxu0 %v8232_v49 }
 0x389   : > { %v5914_v18 = vpop.f32.mrb[8].mxu0 }
 0x38a   : > { %v8190_v19 = vadd.f32 %v5914_v18, %v8187_v17  ;;  %v1346_v20 = vpop.f32.mrb[9].mxu0  ;;  %v6990_v18 = vpack.c.bf16 %v4884_v15, %v4883_v14  ;;  %v4903_v15 = vld [vmem:[%s9337_s3 + $0x70] sm:$0xff] }
 0x38b   : > { %v8193_v21 = vadd.f32 %v8187_v17, %v1346_v20  ;;  %v4885_v20 = vld [vmem:[%s9335_s1 + $0x1f0] sm:$0xff] }
 0x39d   : > { %v5917_v22 = vpop.f32.mrb[10].mxu0 }
 0x39e   : > { %v8196_v23 = vadd.f32 %v5917_v22, %v8187_v17  ;;  %v1356_v24 = vpop.f32.mrb[11].mxu0  ;;  %v4886_v22 = vld [vmem:[%s9335_s1 + $0x1f8] sm:$0xff] }
 0x39f   : > { %v8199_v25 = vadd.f32 %v8187_v17, %v1356_v24 }
 0x3b1   : > { %v5920_v26 = vpop.f32.mrb[12].mxu0 }
 0x3b2   : > { %v8202_v27 = vadd.f32 %v5920_v26, %v8187_v17  ;;  %v1366_v28 = vpop.f32.mrb[13].mxu0  ;;  %v6994_v26 = vpack.c.bf16 %v4886_v22, %v4885_v20  ;;  %v4910_v20 = vld [vmem:[%s9338_s4 + $0x80] sm:$0xff]  ;;  %v4911_v22 = vld [vmem:[%s9338_s4 + $0x88] sm:$0xff] }
 0x3b3   : > { %v8205_v29 = vadd.f32 %v8187_v17, %v1366_v28  ;;  %v4887_v28 = vld [vmem:[%s9335_s1 + $0x200] sm:$0xff] }
 0x3b4   : > { %v1400_v54 = vmax.f32 %v8202_v27, 0.0 }
 0x3b5   : > { %v5923_v30 = vpop.f32.mrb[14].mxu0  ;;  %v1399_v48 = vmax.f32 %v8205_v29, 0.0  ;;  %v4965_v29 = vld [vmem:[%s9337_s3 + $0x80] sm:$0xff] }
 0x3b6   : > { %v8208_v31 = vadd.f32 %v5923_v30, %v8187_v17  ;;  %v1376_v32 = vpop.f32.mrb[15].mxu0 }
 0x3b7   : > { %v8211_v33 = vadd.f32 %v8187_v17, %v1376_v32  ;;  %v4889_v32 = vld [vmem:[%s9335_s1 + $0x210] sm:$0xff] }
 0x3c5   : > { %v8213_v34 = vpop.f32.mrb[16].mxu0 }
 0x3c6   : > { %v1386_v36 = vpop.f32.mrb[17].mxu0  ;;  %v1392_v16 = vadd.f32 %v8213_v34, %v8187_v17  ;;  %v4890_v34 = vld [vmem:[%s9335_s1 + $0x218] sm:$0xff] }
 0x3c7   : > { %v1387_v63 = vadd.f32 %v8187_v17, %v1386_v36  ;;  %v4888_v17 = vld [vmem:[%s9335_s1 + $0x208] sm:$0xff]  ;;  %v7002_v36 = vpack.c.bf16 %v4890_v34, %v4889_v32 }
 0x3c8   : > { %v1404_v24 = vmax.f32 %v1392_v16, 0.0  ;;  %v6998_v30 = vpack.c.bf16 %v4888_v17, %v4887_v28  ;;  %v4904_v16 = vld [vmem:[%s9337_s3 + $0x78] sm:$0xff]  ;;  %v4915_v32 = vld [vmem:[%s9338_s4 + $0xa8] sm:$0xff] }
 0x3c9   : > { %v5949_v38 = vpop.f32.mrb[18].mxu0  ;;  %v1403_v6 = vmax.f32 %v1387_v63, 0.0  ;;  %v4868_v63 = vld [vmem:[%s9335_s1 + $0x1d0] sm:$0xff]  ;;  %v4913_v28 = vld [vmem:[%s9338_s4 + $0x98] sm:$0xff] }
 0x3ca   : > { %v1493_v39 = vadd.f32 %v5949_v38, %v4818_v37  ;;  %v1487_v40 = vpop.f32.mrb[19].mxu0 }
 0x3cb   : > { %v1488_v41 = vadd.f32 %v4818_v37, %v1487_v40  ;;  %v4891_v37 = vld [vmem:[%s9335_s1 + $0x220] sm:$0xff]  ;;  %v4856_v40 = vld [vmem:[%s9339_s5 + $0xf8] sm:$0xff] }
 0x3cc   : > { %v1497_v43 = vmax.f32 %v1493_v39, 0.0  ;;  %v4855_v39 = vld [vmem:[%s9339_s5 + $0xf0] sm:$0xff] }
 0x3cd   : > { %v1496_v42 = vmax.f32 %v1488_v41, 0.0  ;;  %v6934_v41 = vpack.c.bf16 %v4856_v40, %v4855_v39  ;;  %v4919_v39 = vld [vmem:[%s9338_s4 + $0xc8] sm:$0xff] }
 0x3cf   : > { %5966 = vmatprep.mubr.msk.f32.mxu1 %vm935_vm1, %v1496_v42  ;;  %v4848_v42 = vld [vmem:[%s9342_s8 + $0x3] ss:$0 sm:$0xff] }
 0x3d0   : > { %5967 = vmatmul.mubr.msk.f32.vlgmr.msra.gmra.mrb[22].mxu1 %vm935_vm1, %v1497_v43 }
 0x3d1   : > { %6925 = vmatpush3.bf16.msra.mxu1 %v6922_v53  ;;  %v4863_v53 = vld [vmem:[%s9335_s1 + $0x1a8] sm:$0xff] }
 0x3d2   : > { %6927 = vmatprep.subr.bf16.mxu1 %v6926_v55 }
 0x3d5   : > { %6929 = vmatpush3.bf16.msra.mxu1 %v6926_v55  ;;  %v6958_v55 = vpack.c.bf16 %v4863_v53, %v4862_v52 }
 0x3d6   : > { %6931 = vmatprep.subr.bf16.mxu1 %v6930_v58 }
 0x3d9   : > { %6933 = vmatpush3.bf16.msra.mxu1 %v6930_v58  ;;  %v8360_v58 = vld [vmem:[%s7793_s24] sm:$0xff] }
 0x3da   : > { %6935 = vmatprep.subr.bf16.mxu1 %v6934_v41 }
 0x3dd   : > { %6937 = vmatpush3.bf16.msra.mxu1 %v6934_v41  ;;  %v4920_v41 = vld [vmem:[%s9338_s4 + $0xd0] sm:$0xff] }
 0x3de   : > { %6939 = vmatprep.subr.bf16.mxu1 %v8232_v49 }
 0x4a3   : > { %v5968_v60 = vpop.f32.mrb[22].mxu1 }
 0x4a4   : > { %v1590_v61 = vadd.f32 %v5968_v60, %v4829_v59  ;;  %v1584_v62 = vpop.f32.mrb[23].mxu1  ;;  %v4866_v60 = vld [vmem:[%s9335_s1 + $0x1c0] sm:$0xff] }
 0x4a5   : > { %v1585_v0 = vadd.f32 %v4829_v59, %v1584_v62  ;;  %v6962_v59 = vpack.c.bf16 %v4865_v57, %v4864_v56 }
 0x4a6   : > { %v1594_v4 = vmax.f32 %v1590_v61, 0.0  ;;  %v4867_v61 = vld [vmem:[%s9335_s1 + $0x1c8] sm:$0xff] }
 0x4a7   : > { %v1593_v3 = vmax.f32 %v1585_v0, 0.0  ;;  %v6966_v62 = vpack.c.bf16 %v4867_v61, %v4866_v60  ;;  %v4869_v0 = vld [vmem:[%s9335_s1 + $0x1d8] sm:$0xff] }
 0x4a8   : > { %v6970_v1 = vpack.c.bf16 %v4869_v0, %v4868_v63  ;;  %v4925_v63 = vld [vmem:[%s9338_s4 + $0xf8] sm:$0xff] }
 0x4a9   : > { %6001 = vmatprep.mubr.f32.mxu0 %v1593_v3 }
 0x4aa   : > { %6002 = vmatmul.mubr.f32.vlgmr.msra.gmra.mrb[20].mxu0 %v1594_v4  ;;  %v8381_v4 = vld [vmem:[%s7793_s24 + $0x8] sm:$0xff] }
 0x4ab   : > { %6977 = vmatpush3.bf16.msra.mxu0 %v8232_v49  ;;  %6081 = vmatprep.mubr.msk.f32.mxu0 %vm935_vm1, %v1403_v6  ;;  %v4898_v6 = vld [vmem:[%s9337_s3 + $0x48] sm:$0xff] }
 0x4ac   : > { %6979 = vmatprep.subr.bf16.mxu0 %v8263_v5 }
 0x4af   : > { %6981 = vmatpush3.bf16.msra.mxu0 %v8263_v5 }
 0x4b0   : > { %6983 = vmatprep.subr.bf16.mxu0 %v6946_v9 }
 0x4b3   : > { %6985 = vmatpush3.bf16.msra.mxu0 %v6946_v9 }
 0x4b4   : > { %6987 = vmatprep.subr.bf16.mxu0 %v6950_v13 }
 0x4b7   : > { %6989 = vmatpush3.bf16.msra.mxu0 %v6950_v13 }
 0x4b8   : > { %6991 = vmatprep.subr.bf16.mxu0 %v6990_v18 }
 0x4ba   : > { %6082 = vmatmul.mubr.msk.f32.vlgmr.msra.gmra.mrb[22].mxu0 %vm935_vm1, %v1404_v24  ;;  %v4912_v24 = vld [vmem:[%s9338_s4 + $0x90] sm:$0xff] }
 0x4bb   : > { %6993 = vmatpush3.bf16.msra.mxu0 %v6990_v18  ;;  %6104 = vmatprep.mubr.msk.f32.mxu0 %vm486_vm0, %v7796_v11  ;;  %v4892_v11 = vld [vmem:[%s9335_s1 + $0x228] sm:$0xff]  ;;  %v7022_v18 = vpack.c.bf16 %v4904_v16, %v4903_v15  ;;  %v7030_v17 = vpack.c.bf16 %v4913_v28, %v4912_v24 }
 0x4bc   : > { %6995 = vmatprep.subr.bf16.mxu0 %v6994_v26  ;;  %v7006_v38 = vpack.c.bf16 %v4892_v11, %v4891_v37  ;;  %v4917_v37 = vld [vmem:[%s9338_s4 + $0xb8] sm:$0xff] }
 0x4bf   : > { %6997 = vmatpush3.bf16.msra.mxu0 %v6994_v26  ;;  %v7026_v26 = vpack.c.bf16 %v4911_v22, %v4910_v20 }
 0x4c0   : > { %6999 = vmatprep.subr.bf16.mxu0 %v6998_v30 }
 0x4c3   : > { %7001 = vmatpush3.bf16.msra.mxu0 %v6998_v30  ;;  %v4914_v30 = vld [vmem:[%s9338_s4 + $0xa0] sm:$0xff] }
 0x4c4   : > { %7003 = vmatprep.subr.bf16.mxu0 %v7002_v36  ;;  %v7034_v34 = vpack.c.bf16 %v4915_v32, %v4914_v30  ;;  %v4933_v32 = vld [vmem:[%s9339_s5 + $0x70] sm:$0xff] }
 0x4c7   : > { %7005 = vmatpush3.bf16.msra.mxu0 %v7002_v36  ;;  %v4916_v36 = vld [vmem:[%s9338_s4 + $0xb0] sm:$0xff] }
 0x4c8   : > { %7007 = vmatprep.subr.bf16.mxu0 %v7006_v38  ;;  %v7038_v11 = vpack.c.bf16 %v4917_v37, %v4916_v36  ;;  %v4940_v37 = vld [vmem:[%s9335_s1 + $0x230] sm:$0xff] }
 0x4cb   : > { %7009 = vmatpush3.bf16.msra.mxu0 %v7006_v38  ;;  %v4918_v38 = vld [vmem:[%s9338_s4 + $0xc0] sm:$0xff] }
 0x4cc   : > { %7027 = vmatprep.subr.bf16.mxu0 %v7026_v26  ;;  %v7042_v40 = vpack.c.bf16 %v4919_v39, %v4918_v38  ;;  %v4926_v39 = vld [vmem:[%s9342_s8 + $0x1] ss:$0 sm:$0xff] }
 0x4ce   : > { %6105 = vmatmul.mubr.msk.f32.vlgmr.msra.gmra.mrb[22].mxu0 %vm486_vm0, %v7851_v35 }
 0x4cf   : > { %7029 = vmatpush3.bf16.msra.mxu0 %v7026_v26 }
 0x4d0   : > { %7031 = vmatprep.subr.bf16.mxu0 %v7030_v17 }
 0x4d3   : > { %7033 = vmatpush3.bf16.msra.mxu0 %v7030_v17 }
 0x4d4   : > { %7035 = vmatprep.subr.bf16.mxu0 %v7034_v34 }
 0x4d7   : > { %7037 = vmatpush3.bf16.msra.mxu0 %v7034_v34  ;;  %v4934_v34 = vld [vmem:[%s9339_s5 + $0x78] sm:$0xff] }
 0x4d8   : > { %7039 = vmatprep.subr.bf16.mxu0 %v7038_v11  ;;  %v7070_v36 = vpack.c.bf16 %v4934_v34, %v4933_v32  ;;  %v4958_v32 = vld [vmem:[%s9336_s2 + $0x60] sm:$0xff]  ;;  %v4959_v34 = vld [vmem:[%s9336_s2 + $0x68] sm:$0xff] }
 0x4db   : > { %7041 = vmatpush3.bf16.msra.mxu0 %v7038_v11  ;;  %v4941_v11 = vld [vmem:[%s9335_s1 + $0x238] sm:$0xff] }
 0x4dc   : > { %7043 = vmatprep.subr.bf16.mxu0 %v7042_v40  ;;  %v7074_v38 = vpack.c.bf16 %v4941_v11, %v4940_v37  ;;  %v4961_v37 = vld [vmem:[%s9336_s2 + $0x78] sm:$0xff] }
 0x4df   : > { %7045 = vmatpush3.bf16.msra.mxu0 %v7042_v40 }
 0x57d   : > { %v6003_v43 = vpop.f32.mrb[20].mxu0 }
 0x57e   : > { %v1689_v44 = vadd.f32 %v6003_v43, %v4848_v42  ;;  %v1683_v35 = vpop.f32.mrb[21].mxu0 }
 0x57f   : > { %v1684_v45 = vadd.f32 %v4848_v42, %v1683_v35  ;;  %v4921_v42 = vld [vmem:[%s9338_s4 + $0xd8] sm:$0xff]  ;;  %v4923_v35 = vld [vmem:[%s9338_s4 + $0xe8] sm:$0xff] }
 0x580   : > { %v1693_v47 = vmax.f32 %v1689_v44, 0.0  ;;  %v7046_v43 = vpack.c.bf16 %v4921_v42, %v4920_v41  ;;  %v4922_v44 = vld [vmem:[%s9338_s4 + $0xe0] sm:$0xff] }
 0x581   : > { %v1692_v46 = vmax.f32 %v1684_v45, 0.0  ;;  %v7050_v45 = vpack.c.bf16 %v4923_v35, %v4922_v44  ;;  %v4942_v44 = vld [vmem:[%s9335_s1 + $0x240] sm:$0xff]  ;;  %v4943_v35 = vld [vmem:[%s9335_s1 + $0x248] sm:$0xff] }
 0x582   : > { %7047 = vmatprep.subr.bf16.mxu0 %v7046_v43 }
 0x583   : > { %6020 = vmatprep.mubr.msk.f32.mxu1 %vm935_vm1, %v1692_v46  ;;  %7049 = vmatpush3.bf16.msra.mxu0 %v7046_v43 }
 0x584   : > { %6021 = vmatmul.mubr.msk.f32.vlgmr.msra.gmra.mrb[24].mxu1 %vm935_vm1, %v1693_v47  ;;  %7051 = vmatprep.subr.bf16.mxu0 %v7050_v45 }
 0x585   : > { %6941 = vmatpush3.bf16.msra.mxu1 %v8232_v49  ;;  %6039 = vmatprep.mubr.msk.f32.mxu1 %vm935_vm1, %v1399_v48  ;;  %v6954_v49 = vpack.c.bf16 %v4861_v51, %v4860_v50  ;;  %v4882_v50 = vld [vmem:[%s9340_s6 + $0x1] ss:$0 sm:$0xff] }
 0x586   : > { %6943 = vmatprep.subr.bf16.mxu1 %v8263_v5 }
 0x587   : > { %7053 = vmatpush3.bf16.msra.mxu0 %v7050_v45 }
 0x589   : > { %6945 = vmatpush3.bf16.msra.mxu1 %v8263_v5  ;;  %v4897_v5 = vld [vmem:[%s9337_s3 + $0x40] sm:$0xff] }
 0x58a   : > { %6947 = vmatprep.subr.bf16.mxu1 %v6946_v9  ;;  %v7010_v8 = vpack.c.bf16 %v4898_v6, %v4897_v5  ;;  %v4930_v6 = vld [vmem:[%s9339_s5 + $0x58] sm:$0xff] }
 0x58d   : > { %6949 = vmatpush3.bf16.msra.mxu1 %v6946_v9  ;;  %v4900_v9 = vld [vmem:[%s9337_s3 + $0x58] sm:$0xff] }
 0x58e   : > { %6951 = vmatprep.subr.bf16.mxu1 %v6950_v13  ;;  %v7014_v10 = vpack.c.bf16 %v4900_v9, %v4899_v7  ;;  %v4932_v9 = vld [vmem:[%s9339_s5 + $0x68] sm:$0xff] }
 0x591   : > { %6953 = vmatpush3.bf16.msra.mxu1 %v6950_v13  ;;  %v4902_v13 = vld [vmem:[%s9337_s3 + $0x68] sm:$0xff] }
 0x592   : > { %6955 = vmatprep.subr.bf16.mxu1 %v6954_v49  ;;  %v7018_v14 = vpack.c.bf16 %v4902_v13, %v4901_v12  ;;  %v4905_v12 = vld [vmem:[%s9341_s7 + $0x1] ss:$0 sm:$0xff] }
 0x594   : > { %6040 = vmatmul.mubr.msk.f32.vlgmr.msra.gmra.mrb[26].mxu1 %vm935_vm1, %v1400_v54 }
 0x595   : > { %6957 = vmatpush3.bf16.msra.mxu1 %v6954_v49  ;;  %6062 = vmatprep.mubr.msk.f32.mxu1 %vm486_vm0, %v8360_v58 }
 0x596   : > { %6959 = vmatprep.subr.bf16.mxu1 %v6958_v55 }
 0x599   : > { %6961 = vmatpush3.bf16.msra.mxu1 %v6958_v55 }
 0x59a   : > { %6963 = vmatprep.subr.bf16.mxu1 %v6962_v59 }
 0x59d   : > { %6965 = vmatpush3.bf16.msra.mxu1 %v6962_v59 }
 0x59e   : > { %6967 = vmatprep.subr.bf16.mxu1 %v6966_v62 }
 0x5a1   : > { %6969 = vmatpush3.bf16.msra.mxu1 %v6966_v62  ;;  %v8376_v2 = vpop.f32.mrb[22].mxu0  ;;  %v4924_v62 = vld [vmem:[%s9338_s4 + $0xf0] sm:$0xff] }
 0x5a2   : > { %v8378_v3 = vpop.f32.mrb[23].mxu0  ;;  %6971 = vmatprep.subr.bf16.mxu1 %v6970_v1  ;;  %v2142_v57 = vadd.f32 %v8376_v2, %v4882_v50  ;;  %v7054_v0 = vpack.c.bf16 %v4925_v63, %v4924_v62  ;;  %v4928_v2 = vld [vmem:[%s9339_s5 + $0x48] sm:$0xff]  ;;  %v4946_v62 = vld [vmem:[%s9335_s1 + $0x260] sm:$0xff] }
 0x5a3   : > { %v2141_v53 = vadd.f32 %v4882_v50, %v8378_v3  ;;  %v4929_v3 = vld [vmem:[%s9339_s5 + $0x50] sm:$0xff]  ;;  %v4947_v63 = vld [vmem:[%s9335_s1 + $0x268] sm:$0xff] }
 0x5a4   : > { %v2146_v61 = vmax.f32 %v2142_v57, 0.0  ;;  %7055 = vmatprep.subr.bf16.mxu0 %v7054_v0  ;;  %v7062_v7 = vpack.c.bf16 %v4930_v6, %v4929_v3  ;;  %v4945_v57 = vld [vmem:[%s9335_s1 + $0x258] sm:$0xff]  ;;  %v2489_v6 = vld [vmem:[%s9336_s2 + $0x8] sm:$0xff] }
 0x5a5   : > { %6973 = vmatpush3.bf16.msra.mxu1 %v6970_v1  ;;  %v2145_v60 = vmax.f32 %v2141_v53, 0.0  ;;  %7057 = vmatpush3.bf16.msra.mxu0 %v7054_v0  ;;  %v4927_v1 = vld [vmem:[%s9339_s5 + $0x40] sm:$0xff]  ;;  %v7078_v53 = vpack.c.bf16 %v4943_v35, %v4942_v44  ;;  %v7086_v0 = vpack.c.bf16 %v4947_v63, %v4946_v62  ;;  %v4972_v44 = vld [vmem:[%s9337_s3 + $0xb8] sm:$0xff] }
 0x5a6   : > { %7011 = vmatprep.subr.bf16.mxu1 %v7010_v8  ;;  %v7058_v5 = vpack.c.bf16 %v4928_v2, %v4927_v1  ;;  %v4948_v1 = vld [vmem:[%s9335_s1 + $0x270] sm:$0xff]  ;;  %v4949_v2 = vld [vmem:[%s9335_s1 + $0x278] sm:$0xff] }
 0x5a7   : > { %v7090_v3 = vpack.c.bf16 %v4949_v2, %v4948_v1  ;;  %v4978_v1 = vld [vmem:[%s9338_s4 + $0x110] sm:$0xff]  ;;  %v4979_v2 = vld [vmem:[%s9338_s4 + $0x118] sm:$0xff] }
 0x5a8   : > { %6063 = vmatmul.mubr.msk.f32.vlgmr.msra.gmra.mrb[26].mxu1 %vm486_vm0, %v8381_v4 }
 0x5a9   : > { %7013 = vmatpush3.bf16.msra.mxu1 %v7010_v8  ;;  %v4931_v8 = vld [vmem:[%s9339_s5 + $0x60] sm:$0xff] }
 0x5aa   : > { %7015 = vmatprep.subr.bf16.mxu1 %v7014_v10 }
 0x5ad   : > { %7017 = vmatpush3.bf16.msra.mxu1 %v7014_v10  ;;  %v7066_v10 = vpack.c.bf16 %v4932_v9, %v4931_v8  ;;  %v2490_v8 = vld [vmem:[%s9336_s2 + $0x10] sm:$0xff]  ;;  %v2491_v9 = vld [vmem:[%s9336_s2 + $0x18] sm:$0xff] }
 0x5ae   : > { %7019 = vmatprep.subr.bf16.mxu1 %v7018_v14 }
 0x5b1   : > { %7021 = vmatpush3.bf16.msra.mxu1 %v7018_v14 }
 0x5b2   : > { %7023 = vmatprep.subr.bf16.mxu1 %v7022_v18 }
 0x5b5   : > { %7025 = vmatpush3.bf16.msra.mxu1 %v7022_v18 }
 0x5b6   : > { %7059 = vmatprep.subr.bf16.mxu1 %v7058_v5 }
 0x657   : > { %v8451_v46 = vpop.f32.mrb[24].mxu1 }
 0x658   : > { %v8453_v47 = vpop.f32.mrb[25].mxu1 }
 0x67b   : > { %v6064_v51 = vpop.f32.mrb[26].mxu1 }
 0x67c   : > { %v1973_v49 = vadd.f32 %v6064_v51, %v4882_v50  ;;  %v1958_v52 = vpop.f32.mrb[27].mxu1 }
 0x67d   : > { %v1972_v55 = vadd.f32 %v4882_v50, %v1958_v52 }
 0x67e   : > { %v2144_v59 = vmax.f32 %v1973_v49, 0.0 }
 0x67f   : > { %v2143_v56 = vmax.f32 %v1972_v55, 0.0 }
 0x681   : > { %6123 = vmatprep.mubr.msk.f32.mxu1 %vm935_vm1, %v2143_v56  ;;  %v4944_v56 = vld [vmem:[%s9335_s1 + $0x250] sm:$0xff] }
 0x682   : > { %6124 = vmatmul.mubr.msk.f32.vlgmr.msra.gmra.mrb[28].mxu1 %vm935_vm1, %v2144_v59 }
 0x683   : > { %6126 = vmatprep.mubr.msk.f32.mxu1 %vm935_vm1, %v2145_v60  ;;  %7061 = vmatpush3.bf16.msra.mxu1 %v7058_v5  ;;  %v2488_v5 = vld [vmem:[%s9336_s2] sm:$0xff] }
 0x684   : > { %7063 = vmatprep.subr.bf16.mxu1 %v7062_v7 }
 0x686   : > { %6127 = vmatmul.mubr.msk.f32.gmra.mrb[30].mxu1 %vm935_vm1, %v2146_v61  ;;  %v7082_v61 = vpack.c.bf16 %v4945_v57, %v4944_v56 }
 0x687   : > { %7065 = vmatpush3.bf16.msra.mxu1 %v7062_v7  ;;  %v7094_v7 = vpack.c.bf16 %v2489_v6, %v2488_v5  ;;  %v7146_v6 = vpack.c.bf16 %v4979_v2, %v4978_v1  ;;  %v4992_v1 = vld [vmem:[%s9342_s8 + $0x2] ss:$0 sm:$0xff] }
 0x688   : > { %7067 = vmatprep.subr.bf16.mxu1 %v7066_v10 }
 0x68b   : > { %7069 = vmatpush3.bf16.msra.mxu1 %v7066_v10  ;;  %v7098_v10 = vpack.c.bf16 %v2491_v9, %v2490_v8  ;;  %v4981_v8 = vld [vmem:[%s9338_s4 + $0x128] sm:$0xff] }
 0x68c   : > { %7071 = vmatprep.subr.bf16.mxu1 %v7070_v36 }
 0x68f   : > { %7073 = vmatpush3.bf16.msra.mxu1 %v7070_v36  ;;  %v7118_v36 = vpack.c.bf16 %v4959_v34, %v4958_v32  ;;  %v4993_v32 = vld [vmem:[%s9339_s5 + $0x80] sm:$0xff]  ;;  %v4994_v34 = vld [vmem:[%s9339_s5 + $0x88] sm:$0xff] }
 0x690   : > { %7075 = vmatprep.subr.bf16.mxu1 %v7074_v38 }
 0x755   : > { %v6125_v13 = vpop.f32.mrb[28].mxu1 }
 0x756   : > { %v2245_v14 = vadd.f32 %v6125_v13, %v4905_v12  ;;  %v2239_v15 = vpop.f32.mrb[29].mxu1  ;;  %v2492_v13 = vld [vmem:[%s9336_s2 + $0x20] sm:$0xff] }
 0x757   : > { %v2240_v16 = vadd.f32 %v4905_v12, %v2239_v15 }
 0x758   : > { %v2259_v22 = vmax.f32 %v2245_v14, 0.0  ;;  %v2493_v14 = vld [vmem:[%s9336_s2 + $0x28] sm:$0xff] }
 0x759   : > { %v2258_v18 = vmax.f32 %v2240_v16, 0.0  ;;  %v6128_v20 = vpop.f32.mrb[30].mxu1  ;;  %v7102_v15 = vpack.c.bf16 %v2493_v14, %v2492_v13  ;;  %v2495_v16 = vld [vmem:[%s9336_s2 + $0x38] sm:$0xff]  ;;  %v4984_v14 = vld [vmem:[%s9338_s4 + $0x140] sm:$0xff] }
 0x75a   : > { %v2255_v24 = vadd.f32 %v6128_v20, %v4905_v12  ;;  %v2249_v26 = vpop.f32.mrb[31].mxu1  ;;  %v4954_v20 = vld [vmem:[%s9336_s2 + $0x40] sm:$0xff] }
 0x75b   : > { %v2250_v28 = vadd.f32 %v4905_v12, %v2249_v26  ;;  %6161 = vmatprep.mubr.f32.mxu0 %v2258_v18  ;;  %v1397_v12 = vmax.f32 %v8199_v25, 0.0  ;;  %v2494_v25 = vld [vmem:[%s9336_s2 + $0x30] sm:$0xff] }
 0x75c   : > { %6162 = vmatmul.mubr.f32.vlgmr.msra.gmra.mrb[24].mxu0 %v2259_v22  ;;  %v2261_v30 = vmax.f32 %v2255_v24, 0.0  ;;  %v7106_v18 = vpack.c.bf16 %v2495_v16, %v2494_v25  ;;  %v4955_v22 = vld [vmem:[%s9336_s2 + $0x48] sm:$0xff]  ;;  %v4956_v26 = vld [vmem:[%s9336_s2 + $0x50] sm:$0xff] }
 0x75d   : > { %v2260_v17 = vmax.f32 %v2250_v28, 0.0  ;;  %v7110_v24 = vpack.c.bf16 %v4955_v22, %v4954_v20  ;;  %v4957_v28 = vld [vmem:[%s9336_s2 + $0x58] sm:$0xff]  ;;  %v4986_v16 = vld [vmem:[%s9338_s4 + $0x150] sm:$0xff]  ;;  %v4988_v22 = vld [vmem:[%s9338_s4 + $0x160] sm:$0xff] }
 0x75f   : > { %6164 = vmatprep.mubr.f32.mxu0 %v2260_v17  ;;  %v1398_v17 = vmax.f32 %v8196_v23, 0.0  ;;  %v4960_v23 = vld [vmem:[%s9336_s2 + $0x70] sm:$0xff] }
 0x760   : > { %6165 = vmatmul.mubr.f32.gmra.mrb[26].mxu0 %v2261_v30  ;;  %v7114_v30 = vpack.c.bf16 %v4957_v28, %v4956_v26  ;;  %v7122_v11 = vpack.c.bf16 %v4961_v37, %v4960_v23  ;;  %v4990_v28 = vld [vmem:[%s9338_s4 + $0x170] sm:$0xff]  ;;  %v4973_v23 = vld [vmem:[%s9341_s7 + $0x2] ss:$0 sm:$0xff] }
 0x82f   : > { %v6163_v40 = vpop.f32.mrb[24].mxu0 }
 0x830   : > { %v2356_v41 = vadd.f32 %v6163_v40, %v4926_v39  ;;  %v2350_v42 = vpop.f32.mrb[25].mxu0  ;;  %v4968_v40 = vld [vmem:[%s9337_s3 + $0x98] sm:$0xff] }
 0x831   : > { %v2351_v43 = vadd.f32 %v4926_v39, %v2350_v42 }
 0x832   : > { %v2370_v51 = vmax.f32 %v2356_v41, 0.0  ;;  %v4970_v41 = vld [vmem:[%s9337_s3 + $0xa8] sm:$0xff] }
 0x833   : > { %v2369_v45 = vmax.f32 %v2351_v43, 0.0  ;;  %v6166_v50 = vpop.f32.mrb[26].mxu0  ;;  %v4971_v43 = vld [vmem:[%s9337_s3 + $0xb0] sm:$0xff] }
 0x834   : > { %v2366_v49 = vadd.f32 %v6166_v50, %v4926_v39  ;;  %v2360_v52 = vpop.f32.mrb[27].mxu0  ;;  %v7138_v35 = vpack.c.bf16 %v4972_v44, %v4971_v43  ;;  %v4977_v50 = vld [vmem:[%s9338_s4 + $0x108] sm:$0xff]  ;;  %v4999_v44 = vld [vmem:[%s9339_s5 + $0xb0] sm:$0xff] }
 0x835   : > { %v2361_v55 = vadd.f32 %v4926_v39, %v2360_v52  ;;  %6183 = vmatprep.mubr.msk.f32.mxu1 %vm935_vm1, %v2369_v45  ;;  %v4976_v45 = vld [vmem:[%s9338_s4 + $0x100] sm:$0xff] }
 0x836   : > { %6184 = vmatmul.mubr.msk.f32.vlgmr.msra.gmra.mrb[32].mxu1 %vm935_vm1, %v2370_v51  ;;  %v2372_v60 = vmax.f32 %v2366_v49, 0.0  ;;  %v7142_v51 = vpack.c.bf16 %v4977_v50, %v4976_v45  ;;  %v5012_v50 = vld [vmem:[%s9336_s2 + $0x100] sm:$0xff] }
 0x837   : > { %v2371_v59 = vmax.f32 %v2361_v55, 0.0  ;;  %7077 = vmatpush3.bf16.msra.mxu1 %v7074_v38  ;;  %v4967_v38 = vld [vmem:[%s9337_s3 + $0x90] sm:$0xff] }
 0x838   : > { %7079 = vmatprep.subr.bf16.mxu1 %v7078_v53  ;;  %v7130_v27 = vpack.c.bf16 %v4968_v40, %v4967_v38  ;;  %v4995_v38 = vld [vmem:[%s9339_s5 + $0x90] sm:$0xff] }
 0x839   : > { %6186 = vmatprep.mubr.msk.f32.mxu1 %vm935_vm1, %v2371_v59 }
 0x83a   : > { %6187 = vmatmul.mubr.msk.f32.gmra.mrb[34].mxu1 %vm935_vm1, %v2372_v60  ;;  %v4964_v60 = vld [vmem:[%s9340_s6 + $0x2] ss:$0 sm:$0xff] }
 0x83b   : > { %7081 = vmatpush3.bf16.msra.mxu1 %v7078_v53  ;;  %6209 = vmatprep.mubr.msk.f32.mxu1 %vm486_vm0, %v8360_v58  ;;  %v8633_v53 = vld [vmem:[%s9343_s9 + $0x1] ss:$0 sm:$0xff] }
 0x83c   : > { %7083 = vmatprep.subr.bf16.mxu1 %v7082_v61 }
 0x83f   : > { %7085 = vmatpush3.bf16.msra.mxu1 %v7082_v61 }
 0x840   : > { %7087 = vmatprep.subr.bf16.mxu1 %v7086_v0 }
 0x843   : > { %7089 = vmatpush3.bf16.msra.mxu1 %v7086_v0 }
 0x844   : > { %7091 = vmatprep.subr.bf16.mxu1 %v7090_v3 }
 0x847   : > { %7093 = vmatpush3.bf16.msra.mxu1 %v7090_v3 }
 0x848   : > { %7095 = vmatprep.subr.bf16.mxu1 %v7094_v7 }
 0x84a   : > { %6210 = vmatmul.mubr.msk.f32.vlgmr.msra.gmra.mrb[36].mxu1 %vm486_vm0, %v8381_v4 }
 0x84b   : > { %7097 = vmatpush3.bf16.msra.mxu1 %v7094_v7  ;;  %6228 = vmatprep.mubr.msk.f32.mxu1 %vm935_vm1, %v1397_v12  ;;  %v4980_v7 = vld [vmem:[%s9338_s4 + $0x120] sm:$0xff]  ;;  %v4983_v12 = vld [vmem:[%s9338_s4 + $0x138] sm:$0xff] }
 0x84c   : > { %7099 = vmatprep.subr.bf16.mxu1 %v7098_v10  ;;  %v7150_v9 = vpack.c.bf16 %v4981_v8, %v4980_v7 }
 0x84f   : > { %7101 = vmatpush3.bf16.msra.mxu1 %v7098_v10  ;;  %v4982_v10 = vld [vmem:[%s9338_s4 + $0x130] sm:$0xff] }
 0x850   : > { %7103 = vmatprep.subr.bf16.mxu1 %v7102_v15  ;;  %v7154_v13 = vpack.c.bf16 %v4983_v12, %v4982_v10  ;;  %v5019_v10 = vld [vmem:[%s9336_s2 + $0x138] sm:$0xff] }
 0x853   : > { %7105 = vmatpush3.bf16.msra.mxu1 %v7102_v15  ;;  %v4985_v15 = vld [vmem:[%s9338_s4 + $0x148] sm:$0xff] }
 0x854   : > { %7107 = vmatprep.subr.bf16.mxu1 %v7106_v18  ;;  %v7158_v25 = vpack.c.bf16 %v4985_v15, %v4984_v14  ;;  %v5005_v14 = vld [vmem:[%s9336_s2 + $0xc8] sm:$0xff] }
 0x857   : > { %7109 = vmatpush3.bf16.msra.mxu1 %v7106_v18  ;;  %v4987_v18 = vld [vmem:[%s9338_s4 + $0x158] sm:$0xff] }
 0x858   : > { %7111 = vmatprep.subr.bf16.mxu1 %v7110_v24  ;;  %v7162_v20 = vpack.c.bf16 %v4987_v18, %v4986_v16  ;;  %v5047_v16 = vld [vmem:[%s9337_s3 + $0x100] sm:$0xff]  ;;  %v5048_v18 = vld [vmem:[%s9337_s3 + $0x108] sm:$0xff] }
 0x85a   : > { %6229 = vmatmul.mubr.msk.f32.vlgmr.msra.gmra.mrb[36].mxu1 %vm935_vm1, %v1398_v17  ;;  %v4991_v17 = vld [vmem:[%s9338_s4 + $0x178] sm:$0xff] }
 0x85b   : > { %7113 = vmatpush3.bf16.msra.mxu1 %v7110_v24  ;;  %6247 = vmatprep.mubr.msk.f32.mxu1 %vm935_vm1, %v1399_v48  ;;  %v4966_v48 = vld [vmem:[%s9337_s3 + $0x88] sm:$0xff] }
 0x85c   : > { %7115 = vmatprep.subr.bf16.mxu1 %v7114_v30  ;;  %v7126_v39 = vpack.c.bf16 %v4966_v48, %v4965_v29  ;;  %v4989_v24 = vld [vmem:[%s9338_s4 + $0x168] sm:$0xff] }
 0x85d   : > { %v7166_v26 = vpack.c.bf16 %v4989_v24, %v4988_v22  ;;  %v7258_v24 = vpack.c.bf16 %v5048_v18, %v5047_v16  ;;  %v5094_v18 = vld [vmem:[%s9335_s1 + $0x320] sm:$0xff] }
 0x85e   : > { %7127 = vmatprep.subr.bf16.mxu0 %v7126_v39 }
 0x85f   : > { %7117 = vmatpush3.bf16.msra.mxu1 %v7114_v30  ;;  %7129 = vmatpush3.bf16.msra.mxu0 %v7126_v39  ;;  %v7170_v30 = vpack.c.bf16 %v4991_v17, %v4990_v28  ;;  %v4996_v39 = vld [vmem:[%s9339_s5 + $0x98] sm:$0xff] }
 0x860   : > { %7119 = vmatprep.subr.bf16.mxu1 %v7118_v36  ;;  %7131 = vmatprep.subr.bf16.mxu0 %v7130_v27 }
 0x863   : > { %7121 = vmatpush3.bf16.msra.mxu1 %v7118_v36  ;;  %7133 = vmatpush3.bf16.msra.mxu0 %v7130_v27  ;;  %v7174_v36 = vpack.c.bf16 %v4994_v34, %v4993_v32 }
 0x864   : > { %7123 = vmatprep.subr.bf16.mxu1 %v7122_v11 }
 0x867   : > { %7125 = vmatpush3.bf16.msra.mxu1 %v7122_v11 }
 0x86a   : > { %6248 = vmatmul.mubr.msk.f32.vlgmr.msra.gmra.mrb[36].mxu1 %vm935_vm1, %v1400_v54  ;;  %v4969_v54 = vld [vmem:[%s9337_s3 + $0xa0] sm:$0xff] }
 0x86b   : > { %v7134_v42 = vpack.c.bf16 %v4970_v41, %v4969_v54  ;;  %v7178_v54 = vpack.c.bf16 %v4996_v39, %v4995_v38  ;;  %v4997_v41 = vld [vmem:[%s9339_s5 + $0xa0] sm:$0xff]  ;;  %v1395_v39 = vmax.f32 %v8193_v21, 0.0  ;;  %v5010_v21 = vld [vmem:[%s9336_s2 + $0xf0] sm:$0xff] }
 0x86d   : > { %7135 = vmatprep.subr.bf16.mxu0 %v7134_v42 }
 0x86e   : > { %7137 = vmatpush3.bf16.msra.mxu0 %v7134_v42  ;;  %v4998_v42 = vld [vmem:[%s9339_s5 + $0xa8] sm:$0xff] }
 0x86f   : > { %7139 = vmatprep.subr.bf16.mxu0 %v7138_v35  ;;  %v7182_v43 = vpack.c.bf16 %v4998_v42, %v4997_v41  ;;  %v5011_v41 = vld [vmem:[%s9336_s2 + $0xf8] sm:$0xff] }
 0x870   : > { %v7218_v42 = vpack.c.bf16 %v5011_v41, %v5010_v21  ;;  %v5090_v21 = vld [vmem:[%s9336_s2 + $0x1a0] sm:$0xff]  ;;  %v5091_v41 = vld [vmem:[%s9336_s2 + $0x1a8] sm:$0xff] }
 0x872   : > { %7141 = vmatpush3.bf16.msra.mxu0 %v7138_v35  ;;  %v5000_v35 = vld [vmem:[%s9339_s5 + $0xb8] sm:$0xff] }
 0x873   : > { %7143 = vmatprep.subr.bf16.mxu0 %v7142_v51  ;;  %v7186_v45 = vpack.c.bf16 %v5000_v35, %v4999_v44  ;;  %v5025_v44 = vld [vmem:[%s9336_s2 + $0x148] sm:$0xff] }
 0x909   : > { %v8626_v49 = vpop.f32.mrb[32].mxu1 }
 0x90a   : > { %v8628_v52 = vpop.f32.mrb[33].mxu1 }
 0x90d   : > { %v6188_v55 = vpop.f32.mrb[34].mxu1 }
 0x90e   : > { %v8636_v56 = vadd.f32 %v6188_v55, %v8633_v53  ;;  %v2475_v57 = vpop.f32.mrb[35].mxu1  ;;  %v5014_v55 = vld [vmem:[%s9336_s2 + $0x110] sm:$0xff] }
 0x90f   : > { %v8639_v59 = vadd.f32 %v8633_v53, %v2475_v57 }
 0x93d   : > { %v6249_v61 = vpop.f32.mrb[36].mxu1 }
 0x93e   : > { %v2755_v62 = vadd.f32 %v6249_v61, %v4964_v60  ;;  %v2738_v63 = vpop.f32.mrb[37].mxu1 }
 0x93f   : > { %v2754_v0 = vadd.f32 %v4964_v60, %v2738_v63  ;;  %v5015_v60 = vld [vmem:[%s9336_s2 + $0x118] sm:$0xff]  ;;  %v5017_v63 = vld [vmem:[%s9336_s2 + $0x128] sm:$0xff] }
 0x940   : > { %v2757_v5 = vmax.f32 %v2755_v62, 0.0  ;;  %v7194_v61 = vpack.c.bf16 %v5015_v60, %v5014_v55  ;;  %v5016_v62 = vld [vmem:[%s9336_s2 + $0x120] sm:$0xff]  ;;  %v1396_v55 = vmax.f32 %v8190_v19, 0.0  ;;  %v5030_v19 = vld [vmem:[%s9336_s2 + $0x170] sm:$0xff] }
 0x941   : > { %v2756_v3 = vmax.f32 %v2754_v0, 0.0  ;;  %v7198_v0 = vpack.c.bf16 %v5017_v63, %v5016_v62  ;;  %v5031_v63 = vld [vmem:[%s9336_s2 + $0x178] sm:$0xff] }
 0x943   : > { %6266 = vmatprep.mubr.msk.f32.mxu0 %vm935_vm1, %v2756_v3 }
 0x944   : > { %6267 = vmatmul.mubr.msk.f32.vlgmr.msra.gmra.mrb[28].mxu0 %vm935_vm1, %v2757_v5 }
 0x945   : > { %7145 = vmatpush3.bf16.msra.mxu0 %v7142_v51  ;;  %v5013_v51 = vld [vmem:[%s9336_s2 + $0x108] sm:$0xff] }
 0x946   : > { %7147 = vmatprep.subr.bf16.mxu0 %v7146_v6  ;;  %v7190_v57 = vpack.c.bf16 %v5013_v51, %v5012_v50  ;;  %v5026_v50 = vld [vmem:[%s9336_s2 + $0x150] sm:$0xff]  ;;  %v5027_v51 = vld [vmem:[%s9336_s2 + $0x158] sm:$0xff] }
 0x948   : > { %7191 = vmatprep.subr.bf16.mxu1 %v7190_v57 }
 0x949   : > { %7149 = vmatpush3.bf16.msra.mxu0 %v7146_v6  ;;  %7193 = vmatpush3.bf16.msra.mxu1 %v7190_v57  ;;  %v7226_v57 = vpack.c.bf16 %v5027_v51, %v5026_v50  ;;  %v5110_v50 = vld [vmem:[%s9336_s2 + $0x1d0] sm:$0xff]  ;;  %v5111_v51 = vld [vmem:[%s9336_s2 + $0x1d8] sm:$0xff] }
 0x94a   : > { %7151 = vmatprep.subr.bf16.mxu0 %v7150_v9  ;;  %7195 = vmatprep.subr.bf16.mxu1 %v7194_v61 }
 0x94d   : > { %7153 = vmatpush3.bf16.msra.mxu0 %v7150_v9  ;;  %7197 = vmatpush3.bf16.msra.mxu1 %v7194_v61  ;;  %v5018_v9 = vld [vmem:[%s9336_s2 + $0x130] sm:$0xff]  ;;  %v5028_v61 = vld [vmem:[%s9336_s2 + $0x160] sm:$0xff] }
 0x94e   : > { %7155 = vmatprep.subr.bf16.mxu0 %v7154_v13  ;;  %7199 = vmatprep.subr.bf16.mxu1 %v7198_v0  ;;  %v7202_v12 = vpack.c.bf16 %v5019_v10, %v5018_v9  ;;  %v5038_v10 = vld [vmem:[%s9335_s1 + $0x2f0] sm:$0xff] }
 0x951   : > { %7157 = vmatpush3.bf16.msra.mxu0 %v7154_v13  ;;  %7201 = vmatpush3.bf16.msra.mxu1 %v7198_v0  ;;  %v5004_v13 = vld [vmem:[%s9336_s2 + $0xc0] sm:$0xff]  ;;  %v7234_v0 = vpack.c.bf16 %v5031_v63, %v5030_v19 }
 0x952   : > { %7159 = vmatprep.subr.bf16.mxu0 %v7158_v25  ;;  %7203 = vmatprep.subr.bf16.mxu1 %v7202_v12  ;;  %v7206_v15 = vpack.c.bf16 %v5005_v14, %v5004_v13  ;;  %v5041_v13 = vld [vmem:[%s9335_s1 + $0x308] sm:$0xff]  ;;  %v5118_v63 = vld [vmem:[%s9336_s2 + $0x200] sm:$0xff] }
 0x955   : > { %7161 = vmatpush3.bf16.msra.mxu0 %v7158_v25  ;;  %7205 = vmatpush3.bf16.msra.mxu1 %v7202_v12  ;;  %v5001_v25 = vld [vmem:[%s9343_s9 + $0x2] ss:$0 sm:$0xff] }
 0x956   : > { %7163 = vmatprep.subr.bf16.mxu0 %v7162_v20  ;;  %7207 = vmatprep.subr.bf16.mxu1 %v7206_v15  ;;  %v5040_v12 = vld [vmem:[%s9335_s1 + $0x300] sm:$0xff] }
 0x957   : > { %v7250_v14 = vpack.c.bf16 %v5041_v13, %v5040_v12 }
 0x959   : > { %7165 = vmatpush3.bf16.msra.mxu0 %v7162_v20  ;;  %v5049_v20 = vld [vmem:[%s9337_s3 + $0x110] sm:$0xff] }
 0x95a   : > { %7167 = vmatprep.subr.bf16.mxu0 %v7166_v26 }
 0x95d   : > { %7169 = vmatpush3.bf16.msra.mxu0 %v7166_v26  ;;  %v5050_v26 = vld [vmem:[%s9337_s3 + $0x118] sm:$0xff] }
 0x95e   : > { %7171 = vmatprep.subr.bf16.mxu0 %v7170_v30  ;;  %v7262_v32 = vpack.c.bf16 %v5050_v26, %v5049_v20  ;;  %v5095_v20 = vld [vmem:[%s9335_s1 + $0x328] sm:$0xff]  ;;  %v5097_v26 = vld [vmem:[%s9335_s1 + $0x338] sm:$0xff] }
 0x961   : > { %7173 = vmatpush3.bf16.msra.mxu0 %v7170_v30  ;;  %v5006_v30 = vld [vmem:[%s9336_s2 + $0xd0] sm:$0xff] }
 0x962   : > { %7175 = vmatprep.subr.bf16.mxu0 %v7174_v36 }
 0xa17   : > { %v6268_v37 = vpop.f32.mrb[28].mxu0 }
 0xa18   : > { %v2850_v11 = vadd.f32 %v6268_v37, %v4973_v23  ;;  %v2844_v29 = vpop.f32.mrb[29].mxu0  ;;  %v5052_v37 = vld [vmem:[%s9337_s3 + $0x128] sm:$0xff] }
 0xa19   : > { %v2845_v48 = vadd.f32 %v4973_v23, %v2844_v29  ;;  %v5051_v23 = vld [vmem:[%s9337_s3 + $0x120] sm:$0xff] }
 0xa1a   : > { %v2854_v27 = vmax.f32 %v2850_v11, 0.0  ;;  %v7266_v38 = vpack.c.bf16 %v5052_v37, %v5051_v23  ;;  %v5102_v37 = vld [vmem:[%s9335_s1 + $0x360] sm:$0xff] }
 0xa1b   : > { %v2853_v40 = vmax.f32 %v2845_v48, 0.0 }
 0xa1d   : > { %6301 = vmatprep.mubr.f32.mxu0 %v2853_v40  ;;  %v5008_v40 = vld [vmem:[%s9336_s2 + $0xe0] sm:$0xff] }
 0xa1e   : > { %6302 = vmatmul.mubr.f32.vlgmr.msra.gmra.mrb[30].mxu0 %v2854_v27  ;;  %v5009_v27 = vld [vmem:[%s9336_s2 + $0xe8] sm:$0xff] }
 0xa1f   : > { %7177 = vmatpush3.bf16.msra.mxu0 %v7174_v36  ;;  %v5007_v36 = vld [vmem:[%s9336_s2 + $0xd8] sm:$0xff] }
 0xa20   : > { %7179 = vmatprep.subr.bf16.mxu0 %v7178_v54  ;;  %v7210_v48 = vpack.c.bf16 %v5007_v36, %v5006_v30  ;;  %v5099_v30 = vld [vmem:[%s9335_s1 + $0x348] sm:$0xff]  ;;  %v5101_v36 = vld [vmem:[%s9335_s1 + $0x358] sm:$0xff] }
 0xa23   : > { %7181 = vmatpush3.bf16.msra.mxu0 %v7178_v54  ;;  %v7214_v54 = vpack.c.bf16 %v5009_v27, %v5008_v40  ;;  %v5089_v40 = vld [vmem:[%s9336_s2 + $0x198] sm:$0xff] }
 0xa24   : > { %7183 = vmatprep.subr.bf16.mxu0 %v7182_v43 }
 0xa27   : > { %7185 = vmatpush3.bf16.msra.mxu0 %v7182_v43  ;;  %v5024_v43 = vld [vmem:[%s9336_s2 + $0x140] sm:$0xff] }
 0xa28   : > { %7187 = vmatprep.subr.bf16.mxu0 %v7186_v45  ;;  %v7222_v35 = vpack.c.bf16 %v5025_v44, %v5024_v43  ;;  %v5093_v43 = vld [vmem:[%s9336_s2 + $0x1b8] sm:$0xff] }
 0xa2b   : > { %7189 = vmatpush3.bf16.msra.mxu0 %v7186_v45  ;;  %v2466_v45 = vadd.f32 %v8633_v53, %v8628_v52  ;;  %v5029_v52 = vld [vmem:[%s9336_s2 + $0x168] sm:$0xff] }
 0xa2c   : > { %7259 = vmatprep.subr.bf16.mxu0 %v7258_v24  ;;  %v7230_v62 = vpack.c.bf16 %v5029_v52, %v5028_v61  ;;  %v5112_v61 = vld [vmem:[%s9336_s2 + $0x1e0] sm:$0xff]  ;;  %v5113_v52 = vld [vmem:[%s9336_s2 + $0x1e8] sm:$0xff] }
 0xa2d   : > { %v2484_v60 = vmax.f32 %v2466_v45, 0.0 }
 0xaf1   : > { %v6303_v2 = vpop.f32.mrb[30].mxu0 }
 0xaf2   : > { %v2949_v3 = vadd.f32 %v6303_v2, %v4992_v1  ;;  %v2943_v5 = vpop.f32.mrb[31].mxu0  ;;  %v5035_v2 = vld [vmem:[%s9335_s1 + $0x2d8] sm:$0xff] }
 0xaf3   : > { %v2944_v6 = vadd.f32 %v4992_v1, %v2943_v5  ;;  %v5034_v1 = vld [vmem:[%s9335_s1 + $0x2d0] sm:$0xff] }
 0xaf4   : > { %v2953_v8 = vmax.f32 %v2949_v3, 0.0  ;;  %v2471_v3 = vadd.f32 %v8626_v49, %v8633_v53  ;;  %v7238_v5 = vpack.c.bf16 %v5035_v2, %v5034_v1  ;;  %v5039_v49 = vld [vmem:[%s9335_s1 + $0x2f8] sm:$0xff]  ;;  %v4857_v1 = vld [vmem:[%s9343_s9 + $0x3] ss:$0 sm:$0xff] }
 0xaf5   : > { %v2952_v7 = vmax.f32 %v2944_v6, 0.0  ;;  %v5036_v6 = vld [vmem:[%s9335_s1 + $0x2e0] sm:$0xff]  ;;  %v7246_v53 = vpack.c.bf16 %v5039_v49, %v5038_v10  ;;  %v1786_v13 = vadd.f32 %v8451_v46, %v4857_v1 }
 0xaf6   : > { %v5122_v10 = vld [vmem:[%s9336_s2 + $0x220] sm:$0xff] }
 0xaf7   : > { %6320 = vmatprep.mubr.msk.f32.mxu0 %vm935_vm1, %v2952_v7  ;;  %v5037_v7 = vld [vmem:[%s9335_s1 + $0x2e8] sm:$0xff]  ;;  %v5058_v46 = vld [vmem:[%s9338_s4 + $0x200] sm:$0xff] }
 0xaf8   : > { %6321 = vmatmul.mubr.msk.f32.vlgmr.msra.gmra.mrb[32].mxu0 %vm935_vm1, %v2953_v8  ;;  %v2485_v8 = vmax.f32 %v2471_v3, 0.0  ;;  %v7242_v9 = vpack.c.bf16 %v5037_v7, %v5036_v6  ;;  %v1781_v3 = vadd.f32 %v4857_v1, %v8453_v47  ;;  %v5121_v6 = vld [vmem:[%s9336_s2 + $0x218] sm:$0xff]  ;;  %v2487_v7 = vmax.f32 %v8636_v56, 0.0  ;;  %v5123_v47 = vld [vmem:[%s9336_s2 + $0x228] sm:$0xff]  ;;  %v5124_v56 = vld [vmem:[%s9336_s2 + $0x230] sm:$0xff] }
 0xaf9   : > { %7261 = vmatpush3.bf16.msra.mxu0 %v7258_v24  ;;  %v5096_v24 = vld [vmem:[%s9335_s1 + $0x330] sm:$0xff]  ;;  %v7382_v49 = vpack.c.bf16 %v5123_v47, %v5122_v10  ;;  %v5130_v10 = vld [vmem:[%s9337_s3 + $0x148] sm:$0xff] }
 0xafa   : > { %7263 = vmatprep.subr.bf16.mxu0 %v7262_v32 }
 0xafd   : > { %7265 = vmatpush3.bf16.msra.mxu0 %v7262_v32 }
 0xafe   : > { %7267 = vmatprep.subr.bf16.mxu0 %v7266_v38 }
 0xb01   : > { %7269 = vmatpush3.bf16.msra.mxu0 %v7266_v38 }
 0xbcb   : > { %v6322_v22 = vpop.f32.mrb[32].mxu0 }
 0xbcc   : > { %v3046_v28 = vadd.f32 %v6322_v22, %v5001_v25  ;;  %v3040_v17 = vpop.f32.mrb[33].mxu0  ;;  %v7322_v22 = vpack.c.bf16 %v5095_v20, %v5094_v18  ;;  %v5059_v18 = vld [vmem:[%s9338_s4 + $0x208] sm:$0xff] }
 0xbcd   : > { %v3041_v34 = vadd.f32 %v5001_v25, %v3040_v17  ;;  %v5043_v25 = vld [vmem:[%s9335_s1 + $0x318] sm:$0xff]  ;;  %v5098_v17 = vld [vmem:[%s9335_s1 + $0x340] sm:$0xff]  ;;  %v7274_v20 = vpack.c.bf16 %v5059_v18, %v5058_v46 }
 0xbce   : > { %v3050_v29 = vmax.f32 %v3046_v28, 0.0  ;;  %v7326_v28 = vpack.c.bf16 %v5097_v26, %v5096_v24  ;;  %v7330_v32 = vpack.c.bf16 %v5099_v30, %v5098_v17  ;;  %v5060_v30 = vld [vmem:[%s9338_s4 + $0x210] sm:$0xff] }
 0xbcf   : > { %v3049_v11 = vmax.f32 %v3041_v34, 0.0  ;;  %v5100_v34 = vld [vmem:[%s9335_s1 + $0x350] sm:$0xff] }
 0xbd0   : > { %v7334_v23 = vpack.c.bf16 %v5101_v36, %v5100_v34 }
 0xbd1   : > { %6339 = vmatprep.mubr.msk.f32.mxu1 %vm935_vm1, %v3049_v11 }
 0xbd2   : > { %6340 = vmatmul.mubr.msk.f32.vlgmr.msra.gmra.mrb[38].mxu1 %vm935_vm1, %v3050_v29  ;;  %v5086_v29 = vld [vmem:[%s9336_s2 + $0x180] sm:$0xff] }
 0xbd3   : > { %7209 = vmatpush3.bf16.msra.mxu1 %v7206_v15  ;;  %6358 = vmatprep.mubr.msk.f32.mxu1 %vm935_vm1, %v1395_v39  ;;  %v5042_v15 = vld [vmem:[%s9335_s1 + $0x310] sm:$0xff] }
 0xbd4   : > { %7211 = vmatprep.subr.bf16.mxu1 %v7210_v48  ;;  %v7254_v16 = vpack.c.bf16 %v5043_v25, %v5042_v15  ;;  %v5088_v39 = vld [vmem:[%s9336_s2 + $0x190] sm:$0xff]  ;;  %v5054_v25 = vld [vmem:[%s9337_s3 + $0x138] sm:$0xff] }
 0xbd5   : > { %v7346_v27 = vpack.c.bf16 %v5089_v40, %v5088_v39  ;;  %v5053_v15 = vld [vmem:[%s9337_s3 + $0x130] sm:$0xff]  ;;  %v5066_v39 = vld [vmem:[%s9338_s4 + $0x240] sm:$0xff]  ;;  %v5067_v40 = vld [vmem:[%s9338_s4 + $0x248] sm:$0xff] }
 0xbd7   : > { %7213 = vmatpush3.bf16.msra.mxu1 %v7210_v48  ;;  %v5087_v48 = vld [vmem:[%s9336_s2 + $0x188] sm:$0xff] }
 0xbd8   : > { %7215 = vmatprep.subr.bf16.mxu1 %v7214_v54  ;;  %v7342_v38 = vpack.c.bf16 %v5087_v48, %v5086_v29  ;;  %v5064_v29 = vld [vmem:[%s9338_s4 + $0x230] sm:$0xff]  ;;  %v5065_v48 = vld [vmem:[%s9338_s4 + $0x238] sm:$0xff] }
 0xbdb   : > { %7217 = vmatpush3.bf16.msra.mxu1 %v7214_v54  ;;  %v1401_v54 = vmax.f32 %v8211_v33, 0.0  ;;  %v5092_v33 = vld [vmem:[%s9336_s2 + $0x1b0] sm:$0xff] }
 0xbdc   : > { %7219 = vmatprep.subr.bf16.mxu1 %v7218_v42  ;;  %v7354_v44 = vpack.c.bf16 %v5093_v43, %v5092_v33  ;;  %v5071_v33 = vld [vmem:[%s9338_s4 + $0x268] sm:$0xff] }
 0xbdf   : > { %7221 = vmatpush3.bf16.msra.mxu1 %v7218_v42  ;;  %v7350_v42 = vpack.c.bf16 %v5091_v41, %v5090_v21  ;;  %v5069_v21 = vld [vmem:[%s9338_s4 + $0x258] sm:$0xff] }
 0xbe0   : > { %7223 = vmatprep.subr.bf16.mxu1 %v7222_v35 }
 0xbe2   : > { %6359 = vmatmul.mubr.msk.f32.vlgmr.msra.gmra.mrb[38].mxu1 %vm935_vm1, %v1396_v55  ;;  %v1402_v55 = vmax.f32 %v8208_v31, 0.0  ;;  %v5114_v31 = vld [vmem:[%s9336_s2 + $0x1f0] sm:$0xff] }
 0xbe3   : > { %7225 = vmatpush3.bf16.msra.mxu1 %v7222_v35  ;;  %6377 = vmatprep.mubr.msk.f32.mxu1 %vm935_vm1, %v2484_v60  ;;  %v5109_v35 = vld [vmem:[%s9336_s2 + $0x1c8] sm:$0xff]  ;;  %v2486_v60 = vmax.f32 %v8639_v59, 0.0  ;;  %v5115_v59 = vld [vmem:[%s9336_s2 + $0x1f8] sm:$0xff] }
 0xbe4   : > { %7227 = vmatprep.subr.bf16.mxu1 %v7226_v57  ;;  %v7370_v19 = vpack.c.bf16 %v5115_v59, %v5114_v31  ;;  %v5077_v59 = vld [vmem:[%s9339_s5 + $0x110] sm:$0xff] }
 0xbe7   : > { %7229 = vmatpush3.bf16.msra.mxu1 %v7226_v57  ;;  %v7362_v57 = vpack.c.bf16 %v5111_v51, %v5110_v50  ;;  %v5075_v51 = vld [vmem:[%s9339_s5 + $0x100] sm:$0xff] }
 0xbe8   : > { %7231 = vmatprep.subr.bf16.mxu1 %v7230_v62 }
 0xbeb   : > { %7233 = vmatpush3.bf16.msra.mxu1 %v7230_v62  ;;  %v7366_v62 = vpack.c.bf16 %v5113_v52, %v5112_v61 }
 0xbec   : > { %7235 = vmatprep.subr.bf16.mxu1 %v7234_v0 }
 0xbef   : > { %7237 = vmatpush3.bf16.msra.mxu1 %v7234_v0  ;;  %v5119_v0 = vld [vmem:[%s9336_s2 + $0x208] sm:$0xff] }
 0xbf0   : > { %7239 = vmatprep.subr.bf16.mxu1 %v7238_v5  ;;  %v7374_v2 = vpack.c.bf16 %v5119_v0, %v5118_v63 }
 0xbf2   : > { %6378 = vmatmul.mubr.msk.f32.vlgmr.msra.gmra.mrb[38].mxu1 %vm935_vm1, %v2485_v8 }
 0xbf3   : > { %7241 = vmatpush3.bf16.msra.mxu1 %v7238_v5  ;;  %6400 = vmatprep.mubr.msk.f32.mxu1 %vm486_vm0, %v8360_v58  ;;  %v5120_v5 = vld [vmem:[%s9336_s2 + $0x210] sm:$0xff] }
 0xbf4   : > { %7243 = vmatprep.subr.bf16.mxu1 %v7242_v9  ;;  %v7378_v8 = vpack.c.bf16 %v5121_v6, %v5120_v5  ;;  %v5081_v6 = vld [vmem:[%s9339_s5 + $0x130] sm:$0xff] }
 0xbf7   : > { %7245 = vmatpush3.bf16.msra.mxu1 %v7242_v9  ;;  %v1789_v9 = vmax.f32 %v1781_v3, 0.0  ;;  %v5080_v3 = vld [vmem:[%s9339_s5 + $0x128] sm:$0xff] }
 0xbf8   : > { %7247 = vmatprep.subr.bf16.mxu1 %v7246_v53 }
 0xbfb   : > { %7249 = vmatpush3.bf16.msra.mxu1 %v7246_v53  ;;  %v5125_v53 = vld [vmem:[%s9336_s2 + $0x238] sm:$0xff] }
 0xbfc   : > { %7251 = vmatprep.subr.bf16.mxu1 %v7250_v14  ;;  %v7386_v12 = vpack.c.bf16 %v5125_v53, %v5124_v56  ;;  %v5128_v56 = vld [vmem:[%s9340_s6 + $0x5] ss:$0 sm:$0xff] }
 0xbff   : > { %7253 = vmatpush3.bf16.msra.mxu1 %v7250_v14  ;;  %v1790_v14 = vmax.f32 %v1786_v13, 0.0 }
 0xc00   : > { %7255 = vmatprep.subr.bf16.mxu1 %v7254_v16 }
 0xc03   : > { %7257 = vmatpush3.bf16.msra.mxu1 %v7254_v16  ;;  %v7270_v16 = vpack.c.bf16 %v5054_v25, %v5053_v15  ;;  %v5131_v25 = vld [vmem:[%s9337_s3 + $0x150] sm:$0xff] }
 0xc04   : > { %7323 = vmatprep.subr.bf16.mxu1 %v7322_v22 }
 0xc05   : > { %7271 = vmatprep.subr.bf16.mxu0 %v7270_v16 }
 0xc06   : > { %6401 = vmatmul.mubr.msk.f32.vlgmr.msra.gmra.mrb[38].mxu1 %vm486_vm0, %v8381_v4  ;;  %7273 = vmatpush3.bf16.msra.mxu0 %v7270_v16  ;;  %v5132_v16 = vld [vmem:[%s9337_s3 + $0x158] sm:$0xff] }
 0xc07   : > { %7325 = vmatpush3.bf16.msra.mxu1 %v7322_v22  ;;  %6496 = vmatprep.mubr.msk.f32.mxu1 %vm486_vm0, %v8360_v58  ;;  %v5103_v58 = vld [vmem:[%s9335_s1 + $0x368] sm:$0xff]  ;;  %v5046_v22 = vld [vmem:[%s9340_s6 + $0x4] ss:$0 sm:$0xff] }
 0xc08   : > { %7327 = vmatprep.subr.bf16.mxu1 %v7326_v28  ;;  %v7338_v11 = vpack.c.bf16 %v5103_v58, %v5102_v37  ;;  %7275 = vmatprep.subr.bf16.mxu0 %v7274_v20  ;;  %v5062_v37 = vld [vmem:[%s9338_s4 + $0x220] sm:$0xff]  ;;  %v5063_v58 = vld [vmem:[%s9338_s4 + $0x228] sm:$0xff] }
 0xc0b   : > { %7329 = vmatpush3.bf16.msra.mxu1 %v7326_v28 }
 0xc0c   : > { %7331 = vmatprep.subr.bf16.mxu1 %v7330_v32 }
 0xc0f   : > { %7333 = vmatpush3.bf16.msra.mxu1 %v7330_v32  ;;  %v5061_v32 = vld [vmem:[%s9338_s4 + $0x218] sm:$0xff] }
 0xc10   : > { %7335 = vmatprep.subr.bf16.mxu1 %v7334_v23 }
 0xc13   : > { %7337 = vmatpush3.bf16.msra.mxu1 %v7334_v23  ;;  %v7278_v23 = vpack.c.bf16 %v5061_v32, %v5060_v30  ;;  %v5136_v30 = vld [vmem:[%s9337_s3 + $0x178] sm:$0xff] }
 0xc14   : > { %7339 = vmatprep.subr.bf16.mxu1 %v7338_v11 }
 0xc17   : > { %7341 = vmatpush3.bf16.msra.mxu1 %v7338_v11  ;;  %v7282_v11 = vpack.c.bf16 %v5063_v58, %v5062_v37  ;;  %v5142_v58 = vld [vmem:[%s9338_s4 + $0x290] sm:$0xff] }
 0xc18   : > { %7343 = vmatprep.subr.bf16.mxu1 %v7342_v38 }
 0xc1a   : > { %6497 = vmatmul.mubr.msk.f32.vlgmr.msra.gmra.mrb[40].mxu1 %vm486_vm0, %v8381_v4  ;;  %v5108_v4 = vld [vmem:[%s9336_s2 + $0x1c0] sm:$0xff] }
 0xc1b   : > { %7345 = vmatpush3.bf16.msra.mxu1 %v7342_v38  ;;  %6515 = vmatprep.mubr.msk.f32.mxu1 %vm935_vm1, %v1401_v54  ;;  %v7358_v45 = vpack.c.bf16 %v5109_v35, %v5108_v4  ;;  %v7286_v38 = vpack.c.bf16 %v5065_v48, %v5064_v29  ;;  %v5068_v54 = vld [vmem:[%s9338_s4 + $0x250] sm:$0xff] }
 0xc1c   : > { %7347 = vmatprep.subr.bf16.mxu1 %v7346_v27  ;;  %v7294_v41 = vpack.c.bf16 %v5069_v21, %v5068_v54  ;;  %v5072_v35 = vld [vmem:[%s9338_s4 + $0x270] sm:$0xff]  ;;  %v5147_v54 = vld [vmem:[%s9338_s4 + $0x2b8] sm:$0xff] }
 0xc1f   : > { %7349 = vmatpush3.bf16.msra.mxu1 %v7346_v27  ;;  %v7290_v27 = vpack.c.bf16 %v5067_v40, %v5066_v39  ;;  %v5145_v39 = vld [vmem:[%s9338_s4 + $0x2a8] sm:$0xff] }
 0xc20   : > { %7351 = vmatprep.subr.bf16.mxu1 %v7350_v42 }
 0xc23   : > { %7353 = vmatpush3.bf16.msra.mxu1 %v7350_v42  ;;  %v5070_v42 = vld [vmem:[%s9338_s4 + $0x260] sm:$0xff] }
 0xc24   : > { %7355 = vmatprep.subr.bf16.mxu1 %v7354_v44  ;;  %v7298_v43 = vpack.c.bf16 %v5071_v33, %v5070_v42  ;;  %v5149_v42 = vld [vmem:[%s9338_s4 + $0x2c8] sm:$0xff]  ;;  %v5150_v33 = vld [vmem:[%s9338_s4 + $0x2d0] sm:$0xff] }
 0xc27   : > { %7357 = vmatpush3.bf16.msra.mxu1 %v7354_v44 }
 0xc28   : > { %7359 = vmatprep.subr.bf16.mxu1 %v7358_v45 }
 0xc2a   : > { %6516 = vmatmul.mubr.msk.f32.vlgmr.msra.gmra.mrb[40].mxu1 %vm935_vm1, %v1402_v55  ;;  %v5076_v55 = vld [vmem:[%s9339_s5 + $0x108] sm:$0xff] }
 0xc2b   : > { %7361 = vmatpush3.bf16.msra.mxu1 %v7358_v45  ;;  %6534 = vmatprep.mubr.msk.f32.mxu1 %vm935_vm1, %v2486_v60  ;;  %v5073_v45 = vld [vmem:[%s9338_s4 + $0x278] sm:$0xff]  ;;  %v5055_v60 = vld [vmem:[%s9341_s7 + $0x4] ss:$0 sm:$0xff] }
 0xc2c   : > { %7363 = vmatprep.subr.bf16.mxu1 %v7362_v57  ;;  %v7302_v50 = vpack.c.bf16 %v5073_v45, %v5072_v35  ;;  %v5152_v35 = vld [vmem:[%s9338_s4 + $0x2e0] sm:$0xff]  ;;  %v5153_v45 = vld [vmem:[%s9338_s4 + $0x2e8] sm:$0xff] }
 0xc2f   : > { %7365 = vmatpush3.bf16.msra.mxu1 %v7362_v57  ;;  %v7306_v57 = vpack.c.bf16 %v5076_v55, %v5075_v51  ;;  %v5154_v51 = vld [vmem:[%s9338_s4 + $0x2f0] sm:$0xff]  ;;  %v5155_v55 = vld [vmem:[%s9338_s4 + $0x2f8] sm:$0xff] }
 0xc30   : > { %7367 = vmatprep.subr.bf16.mxu1 %v7366_v62 }
 0xc33   : > { %7369 = vmatpush3.bf16.msra.mxu1 %v7366_v62 }
 0xc34   : > { %7371 = vmatprep.subr.bf16.mxu1 %v7370_v19 }
 0xc37   : > { %7373 = vmatpush3.bf16.msra.mxu1 %v7370_v19  ;;  %v5078_v19 = vld [vmem:[%s9339_s5 + $0x118] sm:$0xff] }
 0xc38   : > { %7375 = vmatprep.subr.bf16.mxu1 %v7374_v2  ;;  %v7310_v1 = vpack.c.bf16 %v5078_v19, %v5077_v59  ;;  %v5137_v59 = vld [vmem:[%s9341_s7 + $0x5] ss:$0 sm:$0xff] }
 0xc3a   : > { %6535 = vmatmul.mubr.msk.f32.vlgmr.msra.gmra.mrb[40].mxu1 %vm935_vm1, %v2487_v7  ;;  %v5082_v7 = vld [vmem:[%s9339_s5 + $0x138] sm:$0xff] }
 0xc3b   : > { %7377 = vmatpush3.bf16.msra.mxu1 %v7374_v2  ;;  %6553 = vmatprep.mubr.msk.f32.mxu1 %vm935_vm1, %v1789_v9  ;;  %v5079_v2 = vld [vmem:[%s9339_s5 + $0x120] sm:$0xff] }
 0xc3c   : > { %7379 = vmatprep.subr.bf16.mxu1 %v7378_v8  ;;  %v7314_v5 = vpack.c.bf16 %v5080_v3, %v5079_v2  ;;  %v5129_v9 = vld [vmem:[%s9337_s3 + $0x140] sm:$0xff]  ;;  %v5159_v2 = vld [vmem:[%s9339_s5 + $0x150] sm:$0xff]  ;;  %v5160_v3 = vld [vmem:[%s9339_s5 + $0x158] sm:$0xff] }
 0xc3d   : > { %v7390_v47 = vpack.c.bf16 %v5130_v10, %v5129_v9  ;;  %v5162_v9 = vld [vmem:[%s9339_s5 + $0x168] sm:$0xff] }
 0xc3f   : > { %7381 = vmatpush3.bf16.msra.mxu1 %v7378_v8  ;;  %v7318_v8 = vpack.c.bf16 %v5082_v7, %v5081_v6  ;;  %v7442_v7 = vpack.c.bf16 %v5160_v3, %v5159_v2  ;;  %v4559_v2 = vld [vmem:[%s9344_s10 + $0x30] sm:$0xff]  ;;  %v4560_v3 = vld [vmem:[%s9344_s10 + $0x38] sm:$0xff] }
 0xc40   : > { %7383 = vmatprep.subr.bf16.mxu1 %v7382_v49 }
 0xc43   : > { %7385 = vmatpush3.bf16.msra.mxu1 %v7382_v49  ;;  %v5074_v49 = vld [vmem:[%s9342_s8 + $0x4] ss:$0 sm:$0xff] }
 0xc44   : > { %7387 = vmatprep.subr.bf16.mxu1 %v7386_v12 }
 0xc47   : > { %7389 = vmatpush3.bf16.msra.mxu1 %v7386_v12 }
 0xc4a   : > { %6554 = vmatmul.mubr.msk.f32.vlgmr.msra.gmra.mrb[40].mxu1 %vm935_vm1, %v1790_v14 }
 0xcd9   : > { %v6402_v24 = vpop.f32.mrb[38].mxu1 }
 0xcda   : > { %v3417_v26 = vadd.f32 %v6402_v24, %v5046_v22  ;;  %v3400_v28 = vpop.f32.mrb[39].mxu1  ;;  %v5133_v24 = vld [vmem:[%s9337_s3 + $0x160] sm:$0xff] }
 0xcdb   : > { %v3416_v17 = vadd.f32 %v5046_v22, %v3400_v28 }
 0xcdc   : > { %v3419_v36 = vmax.f32 %v3417_v26, 0.0  ;;  %v5134_v26 = vld [vmem:[%s9337_s3 + $0x168] sm:$0xff] }
 0xcdd   : > { %v3418_v34 = vmax.f32 %v3416_v17, 0.0  ;;  %v7398_v28 = vpack.c.bf16 %v5134_v26, %v5133_v24  ;;  %v5135_v17 = vld [vmem:[%s9337_s3 + $0x170] sm:$0xff] }
 0xcde   : > { %v7402_v32 = vpack.c.bf16 %v5136_v30, %v5135_v17 }
 0xcdf   : > { %6419 = vmatprep.mubr.msk.f32.mxu0 %vm935_vm1, %v3418_v34  ;;  %v5140_v34 = vld [vmem:[%s9338_s4 + $0x280] sm:$0xff] }
 0xce0   : > { %6420 = vmatmul.mubr.msk.f32.vlgmr.msra.gmra.mrb[34].mxu0 %vm935_vm1, %v3419_v36  ;;  %v5141_v36 = vld [vmem:[%s9338_s4 + $0x288] sm:$0xff] }
 0xce1   : > { %7277 = vmatpush3.bf16.msra.mxu0 %v7274_v20  ;;  %v7394_v20 = vpack.c.bf16 %v5132_v16, %v5131_v25  ;;  %v7406_v37 = vpack.c.bf16 %v5141_v36, %v5140_v34  ;;  %v4387_v16 = vld [vmem:[%s9346_s12 + $0x20] sm:$0xff]  ;;  %v4390_v34 = vld [vmem:[%s9346_s12 + $0x38] sm:$0xff] }
 0xce2   : > { %7279 = vmatprep.subr.bf16.mxu0 %v7278_v23 }
 0xce5   : > { %7281 = vmatpush3.bf16.msra.mxu0 %v7278_v23 }
 0xce6   : > { %7283 = vmatprep.subr.bf16.mxu0 %v7282_v11 }
 0xce9   : > { %7285 = vmatpush3.bf16.msra.mxu0 %v7282_v11  ;;  %v5143_v11 = vld [vmem:[%s9338_s4 + $0x298] sm:$0xff] }
 0xcea   : > { %7287 = vmatprep.subr.bf16.mxu0 %v7286_v38  ;;  %v7410_v48 = vpack.c.bf16 %v5143_v11, %v5142_v58  ;;  %v5165_v11 = vld [vmem:[%s9343_s9 + $0x5] ss:$0 sm:$0xff] }
 0xced   : > { %7289 = vmatpush3.bf16.msra.mxu0 %v7286_v38  ;;  %v5144_v38 = vld [vmem:[%s9338_s4 + $0x2a0] sm:$0xff] }
 0xcee   : > { %7291 = vmatprep.subr.bf16.mxu0 %v7290_v27  ;;  %v7414_v40 = vpack.c.bf16 %v5145_v39, %v5144_v38 }
 0xcf1   : > { %7293 = vmatpush3.bf16.msra.mxu0 %v7290_v27  ;;  %v5146_v27 = vld [vmem:[%s9338_s4 + $0x2b0] sm:$0xff] }
 0xcf2   : > { %7295 = vmatprep.subr.bf16.mxu0 %v7294_v41  ;;  %v7418_v21 = vpack.c.bf16 %v5147_v54, %v5146_v27  ;;  %v4377_v54 = vld [vmem:[%s9345_s11 + $0x10] sm:$0xff] }
 0xcf5   : > { %7297 = vmatpush3.bf16.msra.mxu0 %v7294_v41  ;;  %v5148_v41 = vld [vmem:[%s9338_s4 + $0x2c0] sm:$0xff] }
 0xcf6   : > { %7299 = vmatprep.subr.bf16.mxu0 %v7298_v43 }
 0xcf9   : > { %7301 = vmatpush3.bf16.msra.mxu0 %v7298_v43  ;;  %v7422_v43 = vpack.c.bf16 %v5149_v42, %v5148_v41 }
 0xcfa   : > { %7303 = vmatprep.subr.bf16.mxu0 %v7302_v50 }
 0xcfd   : > { %7305 = vmatpush3.bf16.msra.mxu0 %v7302_v50  ;;  %v7430_v50 = vpack.c.bf16 %v5153_v45, %v5152_v35  ;;  %v4381_v45 = vld [vmem:[%s9345_s11 + $0x30] sm:$0xff] }
 0xcfe   : > { %7307 = vmatprep.subr.bf16.mxu0 %v7306_v57 }
 0xd1d   : > { %v9033_v44 = vpop.f32.mrb[40].mxu1 }
 0xd1e   : > { %v4062_v4 = vpop.f32.mrb[41].mxu1  ;;  %v4079_v23 = vadd.f32 %v9033_v44, %v5128_v56  ;;  %v5151_v44 = vld [vmem:[%s9338_s4 + $0x2d8] sm:$0xff] }
 0xd1f   : > { %v4078_v14 = vadd.f32 %v5128_v56, %v4062_v4  ;;  %v7426_v4 = vpack.c.bf16 %v5151_v44, %v5150_v33  ;;  %v4379_v44 = vld [vmem:[%s9345_s11 + $0x20] sm:$0xff] }
 0xd20   : > { %v4081_v29 = vmax.f32 %v4079_v23, 0.0  ;;  %v4375_v23 = vld [vmem:[%s9345_s11] sm:$0xff] }
 0xd21   : > { %v4080_v22 = vmax.f32 %v4078_v14, 0.0 }
 0xdb3   : > { %v6421_v61 = vpop.f32.mrb[34].mxu0 }
 0xdb4   : > { %v3512_v52 = vadd.f32 %v6421_v61, %v5055_v60  ;;  %v3506_v62 = vpop.f32.mrb[35].mxu0  ;;  %v5158_v61 = vld [vmem:[%s9339_s5 + $0x148] sm:$0xff] }
 0xdb5   : > { %v3507_v31 = vadd.f32 %v5055_v60, %v3506_v62  ;;  %v5157_v60 = vld [vmem:[%s9339_s5 + $0x140] sm:$0xff] }
 0xdb6   : > { %v3516_v0 = vmax.f32 %v3512_v52, 0.0  ;;  %v7438_v52 = vpack.c.bf16 %v5158_v61, %v5157_v60 }
 0xdb7   : > { %v3515_v63 = vmax.f32 %v3507_v31, 0.0 }
 0xdb9   : > { %6454 = vmatprep.mubr.f32.mxu0 %v3515_v63 }
 0xdba   : > { %6455 = vmatmul.mubr.f32.vlgmr.msra.gmra.mrb[36].mxu0 %v3516_v0 }
 0xdbb   : > { %7309 = vmatpush3.bf16.msra.mxu0 %v7306_v57  ;;  %v7434_v57 = vpack.c.bf16 %v5155_v55, %v5154_v51  ;;  %v4553_v55 = vld [vmem:[%s9344_s10] sm:$0xff] }
 0xdbc   : > { %7311 = vmatprep.subr.bf16.mxu0 %v7310_v1 }
 0xdbf   : > { %7313 = vmatpush3.bf16.msra.mxu0 %v7310_v1 }
 0xdc0   : > { %7315 = vmatprep.subr.bf16.mxu0 %v7314_v5 }
 0xdc3   : > { %7317 = vmatpush3.bf16.msra.mxu0 %v7314_v5 }
 0xdc4   : > { %7319 = vmatprep.subr.bf16.mxu0 %v7318_v8 }
 0xdc7   : > { %7321 = vmatpush3.bf16.msra.mxu0 %v7318_v8  ;;  %v5161_v8 = vld [vmem:[%s9339_s5 + $0x160] sm:$0xff] }
 0xdc8   : > { %7391 = vmatprep.subr.bf16.mxu0 %v7390_v47  ;;  %v7446_v10 = vpack.c.bf16 %v5162_v9, %v5161_v8  ;;  %v7574_v9 = vld [vmem:[%s7793_s24 + $0x8] sm:$0xff] }
 0xe8d   : > { %v6456_v53 = vpop.f32.mrb[36].mxu0 }
 0xe8e   : > { %v3611_v12 = vadd.f32 %v6456_v53, %v5074_v49  ;;  %v3605_v13 = vpop.f32.mrb[37].mxu0  ;;  %v4383_v53 = vld [vmem:[%s9346_s12] sm:$0xff] }
 0xe8f   : > { %v3606_v15 = vadd.f32 %v5074_v49, %v3605_v13  ;;  %v5164_v49 = vld [vmem:[%s9339_s5 + $0x178] sm:$0xff]  ;;  %v4385_v13 = vld [vmem:[%s9346_s12 + $0x10] sm:$0xff] }
 0xe90   : > { %v3615_v18 = vmax.f32 %v3611_v12, 0.0  ;;  %v4384_v12 = vld [vmem:[%s9346_s12 + $0x8] sm:$0xff] }
 0xe91   : > { %v3614_v46 = vmax.f32 %v3606_v15, 0.0  ;;  %v7454_v14 = vpack.c.bf16 %v4384_v12, %v4383_v53  ;;  %v4386_v15 = vld [vmem:[%s9346_s12 + $0x18] sm:$0xff] }
 0xe92   : > { %v7458_v25 = vpack.c.bf16 %v4386_v15, %v4385_v13 }
 0xe93   : > { %6473 = vmatprep.mubr.msk.f32.mxu0 %vm935_vm1, %v3614_v46  ;;  %v4388_v46 = vld [vmem:[%s9346_s12 + $0x28] sm:$0xff]  ;;  %7455 = vmatprep.subr.bf16.mxu1 %v7454_v14 }
 0xe94   : > { %6474 = vmatmul.mubr.msk.f32.vlgmr.msra.gmra.mrb[38].mxu0 %vm935_vm1, %v3615_v18  ;;  %7457 = vmatpush3.bf16.msra.mxu1 %v7454_v14  ;;  %v7462_v18 = vpack.c.bf16 %v4388_v46, %v4387_v16 }
 0xe95   : > { %7393 = vmatpush3.bf16.msra.mxu0 %v7390_v47  ;;  %6572 = vmatprep.mubr.msk.f32.mxu0 %vm935_vm1, %v4080_v22  ;;  %v5163_v47 = vld [vmem:[%s9339_s5 + $0x170] sm:$0xff] }
 0xe96   : > { %7395 = vmatprep.subr.bf16.mxu0 %v7394_v20  ;;  %v7450_v56 = vpack.c.bf16 %v5164_v49, %v5163_v47  ;;  %7459 = vmatprep.subr.bf16.mxu1 %v7458_v25 }
 0xe98   : > { %7461 = vmatpush3.bf16.msra.mxu1 %v7458_v25 }
 0xe99   : > { %7397 = vmatpush3.bf16.msra.mxu0 %v7394_v20  ;;  %7463 = vmatprep.subr.bf16.mxu1 %v7462_v18  ;;  %v5156_v20 = vld [vmem:[%s9342_s8 + $0x5] ss:$0 sm:$0xff] }
 0xe9a   : > { %7399 = vmatprep.subr.bf16.mxu0 %v7398_v28 }
 0xe9c   : > { %7465 = vmatpush3.bf16.msra.mxu1 %v7462_v18 }
 0xe9d   : > { %7401 = vmatpush3.bf16.msra.mxu0 %v7398_v28 }
 0xe9e   : > { %7403 = vmatprep.subr.bf16.mxu0 %v7402_v32 }
 0xea1   : > { %7405 = vmatpush3.bf16.msra.mxu0 %v7402_v32  ;;  %v4389_v32 = vld [vmem:[%s9346_s12 + $0x30] sm:$0xff] }
 0xea2   : > { %7407 = vmatprep.subr.bf16.mxu0 %v7406_v37  ;;  %v7466_v36 = vpack.c.bf16 %v4390_v34, %v4389_v32 }
 0xea4   : > { %6573 = vmatmul.mubr.msk.f32.vlgmr.msra.gmra.mrb[40].mxu0 %vm935_vm1, %v4081_v29  ;;  %7467 = vmatprep.subr.bf16.mxu1 %v7466_v36  ;;  %v5083_v29 = vld [vmem:[%s9343_s9 + $0x4] ss:$0 sm:$0xff] }
 0xea5   : > { %7409 = vmatpush3.bf16.msra.mxu0 %v7406_v37  ;;  %7469 = vmatpush3.bf16.msra.mxu1 %v7466_v36  ;;  %v4376_v37 = vld [vmem:[%s9345_s11 + $0x8] sm:$0xff] }
 0xea6   : > { %7411 = vmatprep.subr.bf16.mxu0 %v7410_v48  ;;  %v7470_v58 = vpack.c.bf16 %v4376_v37, %v4375_v23 }
 0xea8   : > { %7471 = vmatprep.subr.bf16.mxu1 %v7470_v58 }
 0xea9   : > { %7413 = vmatpush3.bf16.msra.mxu0 %v7410_v48 }
 0xeaa   : > { %7415 = vmatprep.subr.bf16.mxu0 %v7414_v40 }
 0xead   : > { %7417 = vmatpush3.bf16.msra.mxu0 %v7414_v40 }
 0xeae   : > { %7419 = vmatprep.subr.bf16.mxu0 %v7418_v21 }
 0xeb1   : > { %7421 = vmatpush3.bf16.msra.mxu0 %v7418_v21  ;;  %v4378_v21 = vld [vmem:[%s9345_s11 + $0x18] sm:$0xff] }
 0xeb2   : > { %7423 = vmatprep.subr.bf16.mxu0 %v7422_v43  ;;  %v7474_v33 = vpack.c.bf16 %v4378_v21, %v4377_v54 }
 0xeb5   : > { %7425 = vmatpush3.bf16.msra.mxu0 %v7422_v43 }
 0xeb6   : > { %7427 = vmatprep.subr.bf16.mxu0 %v7426_v4 }
 0xeb9   : > { %7429 = vmatpush3.bf16.msra.mxu0 %v7426_v4  ;;  %v4380_v4 = vld [vmem:[%s9345_s11 + $0x28] sm:$0xff] }
 0xeba   : > { %7431 = vmatprep.subr.bf16.mxu0 %v7430_v50  ;;  %v7478_v35 = vpack.c.bf16 %v4380_v4, %v4379_v44 }
 0xebd   : > { %7433 = vmatpush3.bf16.msra.mxu0 %v7430_v50  ;;  %v4382_v50 = vld [vmem:[%s9345_s11 + $0x38] sm:$0xff] }
 0xebe   : > { %7435 = vmatprep.subr.bf16.mxu0 %v7434_v57  ;;  %v7482_v51 = vpack.c.bf16 %v4382_v50, %v4381_v45 }
 0xec1   : > { %7437 = vmatpush3.bf16.msra.mxu0 %v7434_v57  ;;  %v4554_v57 = vld [vmem:[%s9344_s10 + $0x8] sm:$0xff] }
 0xec2   : > { %7439 = vmatprep.subr.bf16.mxu0 %v7438_v52  ;;  %v7486_v61 = vpack.c.bf16 %v4554_v57, %v4553_v55 }
 0xf67   : > { %v9157_v62 = vpop.f32.mrb[38].mxu0 }
 0xf68   : > { %v9159_v31 = vpop.f32.mrb[39].mxu0  ;;  %v3708_v60 = vadd.f32 %v9157_v62, %v5083_v29  ;;  %v4558_v62 = vld [vmem:[%s9344_s10 + $0x28] sm:$0xff] }
 0xf69   : > { %v3703_v40 = vadd.f32 %v5083_v29, %v9159_v31  ;;  %v4556_v31 = vld [vmem:[%s9344_s10 + $0x18] sm:$0xff] }
 0xf6b   : > { %v3711_v43 = vmax.f32 %v3703_v40, 0.0 }
 0xf77   : > { %v6574_v19 = vpop.f32.mrb[40].mxu0 }
 0xf78   : > { %v4174_v63 = vadd.f32 %v6574_v19, %v5137_v59  ;;  %v4168_v0 = vpop.f32.mrb[41].mxu0 }
 0xf79   : > { %v4169_v1 = vadd.f32 %v5137_v59, %v4168_v0  ;;  %v3712_v59 = vmax.f32 %v3708_v60, 0.0  ;;  %v7573_v0 = vld [vmem:[%s7793_s24] sm:$0xff] }
 0xf7a   : > { %v4178_v6 = vmax.f32 %v4174_v63, 0.0  ;;  %v4557_v63 = vld [vmem:[%s9344_s10 + $0x20] sm:$0xff] }
 0xf7b   : > { %v4177_v5 = vmax.f32 %v4169_v1, 0.0  ;;  %v7494_v1 = vpack.c.bf16 %v4558_v62, %v4557_v63 }
 0xf7d   : > { %6607 = vmatprep.mubr.f32.mxu0 %v4177_v5  ;;  %v7498_v5 = vpack.c.bf16 %v4560_v3, %v4559_v2 }
 0xf7e   : > { %6608 = vmatmul.mubr.f32.vlgmr.msra.gmra.mrb[42].mxu0 %v4178_v6  ;;  %v4561_v6 = vld [vmem:[%s9344_s10 + $0x40] sm:$0xff] }
 0xf7f   : > { %7441 = vmatpush3.bf16.msra.mxu0 %v7438_v52  ;;  %v4555_v52 = vld [vmem:[%s9344_s10 + $0x10] sm:$0xff] }
 0xf80   : > { %7443 = vmatprep.subr.bf16.mxu0 %v7442_v7  ;;  %v7490_v19 = vpack.c.bf16 %v4556_v31, %v4555_v52 }
 0xf83   : > { %7445 = vmatpush3.bf16.msra.mxu0 %v7442_v7  ;;  %v4562_v7 = vld [vmem:[%s9344_s10 + $0x48] sm:$0xff] }
 0xf84   : > { %7447 = vmatprep.subr.bf16.mxu0 %v7446_v10  ;;  %v7502_v8 = vpack.c.bf16 %v4562_v7, %v4561_v6 }
 0xf87   : > { %7449 = vmatpush3.bf16.msra.mxu0 %v7446_v10  ;;  %v5174_v10 = vld [vmem:[%s9347_s13] ss:$0 sm:$0xff] }
 0xf88   : > { %7451 = vmatprep.subr.bf16.mxu0 %v7450_v56 }
 0xf8b   : > { %7453 = vmatpush3.bf16.msra.mxu0 %v7450_v56 }
0x1051   : > { %v6609_v22 = vpop.f32.mrb[42].mxu0 }
0x1052   : > { %v4273_v24 = vadd.f32 %v6609_v22, %v5156_v20  ;;  %v4267_v26 = vpop.f32.mrb[43].mxu0 }
0x1053   : > { %v4268_v28 = vadd.f32 %v5156_v20, %v4267_v26 }
0x1054   : > { %v4277_v30 = vmax.f32 %v4273_v24, 0.0 }
0x1055   : > { %v4276_v17 = vmax.f32 %v4268_v28, 0.0 }
0x1057   : > { %6626 = vmatprep.mubr.msk.f32.mxu0 %vm935_vm1, %v4276_v17 }
0x1058   : > { %6627 = vmatmul.mubr.msk.f32.vlgmr.msra.gmra.mrb[44].mxu0 %vm935_vm1, %v4277_v30 }
0x112b   : > { %v6628_v48 = vpop.f32.mrb[44].mxu0 }
0x112c   : > { %v4370_v38 = vadd.f32 %v6628_v48, %v5165_v11  ;;  %v4364_v39 = vpop.f32.mrb[45].mxu0 }
0x112d   : > { %v4365_v27 = vadd.f32 %v5165_v11, %v4364_v39 }
0x112e   : > { %v4374_v42 = vmax.f32 %v4370_v38, 0.0 }
0x112f   : > { %v4373_v41 = vmax.f32 %v4365_v27, 0.0 }
0x1131   : > { %6645 = vmatprep.mubr.msk.f32.mxu1 %vm935_vm1, %v4373_v41 }
0x1132   : > { %6646 = vmatmul.mubr.msk.f32.vlgmr.msra.gmra.mrb[42].mxu1 %vm935_vm1, %v4374_v42 }
0x1133   : > { %7473 = vmatpush3.bf16.msra.mxu1 %v7470_v58  ;;  %6664 = vmatprep.mubr.msk.f32.mxu1 %vm935_vm1, %v3711_v43 }
0x1134   : > { %7475 = vmatprep.subr.bf16.mxu1 %v7474_v33 }
0x1137   : > { %7477 = vmatpush3.bf16.msra.mxu1 %v7474_v33 }
0x1138   : > { %7479 = vmatprep.subr.bf16.mxu1 %v7478_v35 }
0x113b   : > { %7481 = vmatpush3.bf16.msra.mxu1 %v7478_v35 }
0x113c   : > { %7483 = vmatprep.subr.bf16.mxu1 %v7482_v51 }
0x113f   : > { %7485 = vmatpush3.bf16.msra.mxu1 %v7482_v51 }
0x1140   : > { %7487 = vmatprep.subr.bf16.mxu1 %v7486_v61 }
0x1142   : > { %6665 = vmatmul.mubr.msk.f32.vlgmr.msra.gmra.mrb[42].mxu1 %vm935_vm1, %v3712_v59 }
0x1143   : > { %7489 = vmatpush3.bf16.msra.mxu1 %v7486_v61  ;;  %6687 = vmatprep.mubr.msk.f32.mxu1 %vm486_vm0, %v7573_v0 }
0x1144   : > { %7491 = vmatprep.subr.bf16.mxu1 %v7490_v19 }
0x1147   : > { %7493 = vmatpush3.bf16.msra.mxu1 %v7490_v19 }
0x1148   : > { %7495 = vmatprep.subr.bf16.mxu1 %v7494_v1 }
0x114b   : > { %7497 = vmatpush3.bf16.msra.mxu1 %v7494_v1 }
0x114c   : > { %7499 = vmatprep.subr.bf16.mxu1 %v7498_v5 }
0x114f   : > { %7501 = vmatpush3.bf16.msra.mxu1 %v7498_v5 }
0x1150   : > { %7503 = vmatprep.subr.bf16.mxu1 %v7502_v8 }
0x1153   : > { %7505 = vmatpush3.bf16.msra.mxu1 %v7502_v8 }
0x1156   : > { %6688 = vmatmul.mubr.msk.f32.vlgmr.msra.gmra.mrb[42].mxu1 %vm486_vm0, %v7574_v9 }
0x1229   : > { %v6689_v47 = vpop.f32.mrb[42].mxu1 }
0x122a   : > { %v4648_v49 = vadd.f32 %v6689_v47, %v5174_v10  ;;  %v4629_v56 = vpop.f32.mrb[43].mxu1 }
0x122b   : > { %v4647_v53 = vadd.f32 %v5174_v10, %v4629_v56 }
0x122c   : > { %4650 = vst [vmem:[%s461_s22 + $0x8] sm:$0xff] %v4648_v49 }
0x122d   : > { %4649 = vst [vmem:[%s461_s22] sm:$0xff] %v4647_v53 }
0x122e   : > { %7588 = shalt.err (!%p7585_p3)
}
0x122f   : > { %s7589_s26 = scalar_lea.hbm %s9291_s21, 256  ;;  %s7593_s24 = scalar_lea.hbm %s9348_s14, 512 }
0x1230   : > { %p7590_p4 = scmp.ne.s32.totalorder %s9291_s21, %s7589_s26  ;;  %p7594_p9 = scmp.lt.u32.totalorder %s9291_s21, %s9348_s14 }
0x1231   : > { %p7595_p10 = scmp.lt.u32.totalorder %s7593_s24, %s7589_s26  ;;  %p7597_p12 = scmp.lt.u32.totalorder %s7589_s26, %s9291_s21 }
0x1232   : > { %p7591_p7 = pnand %p7590_p4, %p7755_p5 }
0x1233   : > { %p7596_p11 = por %p7595_p10, %p7594_p9 }
0x1234   : > { %p7592_p8 = pneg %p7591_p7 }
0x1235   : > { %p7598_p13 = por %p7597_p12, %p7596_p11 }
0x1237   : > { %p7599_p0 = pnand %p7598_p13, %p7592_p8 }
0x1239   : > { %7602 = shalt.err (!%p7599_p0)
}
0x123a   : > { %s7640_s28 = smov 128   ;;  %s7641_s27 = smov 8  }
0x123b   : > { %7530 = dma.vmem_to_hbm [thread:$0]  (%p7755_p5), %s9286_s18, 256, %s9291_s21, %s9293_s25, %s7640_s28, %s7640_s28, %s7641_s27  }
0x123c PF: > { %p7536_p1 = scmp.ge.s32.totalorder %s7637_s16, 2  ;;  %s4680_s22 = sand.u32 1, %s7625_s29  }
0x123d   : > { %s4681_s26 = scalar_lea.sflag [#allocation3], %s4680_s22 }
0x123e   : > { %p7533_p2 = pnand %p7536_p1, %p7759_p6 }
0x1240   : > { %7620 = dma.done.wait (!%p7533_p2), %s4681_s26, 256  }
0x1241   : > { %7622 = vsyncadd (!%p7533_p2), %s4681_s26, 4294967040  ;;  %s9360_s16 = sld [smem:[#allocation6_spill]]  ;;  %s9361_s19 = sld [smem:[#allocation5_spill]] }
0x1242   : > { %s9362_s15 = sld [smem:[#allocation7_spill]]  ;;  %s9363_s29 = smov %s7629_s30 }
0x1247   : > { %p24_p3 = scmp.ge.s32.totalorder %s9360_s16, 4   ;;  %s9364_s30 = smov %s9361_s19 }
0x1249   :  { %26 = sbr.rel (!%p24_p3) target bundleno = 3 (0x3), region = 144 }
0x1250   :  { %4686 = vsyncpa [#allocation3], 1 }
0x1251   :  { %4688 = vsyncpa [#allocation3 + $0x1], 1 }

</bundles_post_ra>
